<compile_context>
chip_gen: v7x
topology: tpu7x:2x2x1
jax: 0.10.0
libtpu: 0.0.40
codegen_flags: <defaults>
</compile_context>

<pallas_src>
import functools
import math

import jax
import jax.numpy as jnp
from jax import lax
from jax.experimental import pallas as pl
from jax.experimental.pallas import tpu as pltpu

EPS = 1e-5
LANE = 128


def _round_up(x, m):
    return (x + m - 1) // m * m


# ----------------------------- Pallas kernels ------------------------------ #

def _stage_a_kernel(xpad_ref, w_up_ref, b_up_ref, w_sing_ref, b_sing_ref,
                    acc1_ref, y_ref, sum1_ref, ssq1_ref, *, H, W):
    """conv_up (3x3) + sing_conv (1x1) for one image + BN1 global statistics."""
    hw = H * W
    cinp = xpad_ref.shape[-1]
    coutp = acc1_ref.shape[-1]

    # conv_up: nine shifted matmuls over the halo-padded tile (no HBM im2col).
    acc = jnp.zeros((hw, coutp), jnp.float32)
    for k in range(9):
        dh, dw = k // 3, k % 3
        xs = xpad_ref[0, dh:dh + H, dw:dw + W, :].reshape(hw, cinp)
        acc = acc + jnp.dot(xs, w_up_ref[k], preferred_element_type=jnp.float32)
    acc = acc + b_up_ref[...]
    acc1_ref[...] = acc.reshape(1, H, W, coutp)

    # sing_conv: 1x1 conv on the un-shifted interior.
    xc = xpad_ref[0, 1:1 + H, 1:1 + W, :].reshape(hw, cinp)
    y = jnp.dot(xc, w_sing_ref[...], preferred_element_type=jnp.float32)
    y_ref[...] = (y + b_sing_ref[...]).reshape(1, H, W, coutp)

    # BN1 statistics: global sum / sum-of-squares accumulated across the grid.
    @pl.when(pl.program_id(0) == 0)
    def _():
        sum1_ref[...] = jnp.zeros_like(sum1_ref)
        ssq1_ref[...] = jnp.zeros_like(ssq1_ref)

    sum1_ref[...] += jnp.sum(acc, axis=0, keepdims=True)
    ssq1_ref[...] += jnp.sum(acc * acc, axis=0, keepdims=True)


def _stage_b_kernel(acc1_ref, s1_ref, t1_ref, w_same_ref, b_same_ref,
                    acc2_ref, sum2_ref, ssq2_ref, hpad_ref, *, H, W):
    """Fused relu(bn1(acc1)) + conv_same (3x3) + BN2 global statistics.

    h1 lives only in the VMEM scratch `hpad_ref`; it never hits HBM.
    """
    hw = H * W
    coutp = acc2_ref.shape[-1]

    # bn1 folded into scale/shift (computed in the wrapper) + ReLU.
    a1 = acc1_ref[0].reshape(hw, coutp)
    h = jnp.maximum(a1 * s1_ref[...] + t1_ref[...], 0.0)

    # zero-padded copy of h for the 'same' convolution.
    hpad_ref[...] = jnp.zeros_like(hpad_ref)
    hpad_ref[1:1 + H, 1:1 + W, :] = h.reshape(H, W, coutp)

    acc = jnp.zeros((hw, coutp), jnp.float32)
    for k in range(9):
        dh, dw = k // 3, k % 3
        hs = hpad_ref[dh:dh + H, dw:dw + W, :].reshape(hw, coutp)
        acc = acc + jnp.dot(hs, w_same_ref[k], preferred_element_type=jnp.float32)
    acc = acc + b_same_ref[...]
    acc2_ref[...] = acc.reshape(1, H, W, coutp)

    # BN2 statistics.
    @pl.when(pl.program_id(0) == 0)
    def _():
        sum2_ref[...] = jnp.zeros_like(sum2_ref)
        ssq2_ref[...] = jnp.zeros_like(ssq2_ref)

    sum2_ref[...] += jnp.sum(acc, axis=0, keepdims=True)
    ssq2_ref[...] += jnp.sum(acc * acc, axis=0, keepdims=True)


def _stage_c_kernel(acc2_ref, y_ref, s2_ref, t2_ref, o_ref, *, H, W):
    """out = relu(bn2(acc2) + y) — pure elementwise, lane-dense stores."""
    hw = H * W
    coutp = o_ref.shape[-1]
    a2 = acc2_ref[0].reshape(hw, coutp)
    yv = y_ref[0].reshape(hw, coutp)
    o = jnp.maximum(a2 * s2_ref[...] + t2_ref[...] + yv, 0.0)
    o_ref[...] = o.reshape(1, H, W, coutp)


# ------------------------------ JAX glue code ------------------------------ #

def resnet_forward(x_nchw, p):
    N, cin, H, W = x_nchw.shape
    cout = p['b_up'].shape[0]
    cinp = _round_up(cin, LANE)       # lane-dense channel padding
    coutp = _round_up(cout, LANE)
    hp, wp = H + 2, W + 2
    nhw = N * H * W
    f32 = jnp.float32

    # NHWC, 1-pixel spatial halo, channels zero-padded to a multiple of 128.
    x = jnp.transpose(x_nchw, (0, 2, 3, 1)).astype(f32)
    xpad = jnp.pad(x, ((0, 0), (1, 1), (1, 1), (0, cinp - cin)))

    # Weights: torch (Cout, Cin, kh, kw) -> (kh*3+kw, Cin_pad, Cout_pad).
    def prep_w3(w, ci_pad):
        w = jnp.transpose(w, (2, 3, 1, 0)).astype(f32)          # (3,3,ci,co)
        w = jnp.pad(w, ((0, 0), (0, 0),
                        (0, ci_pad - w.shape[2]), (0, coutp - w.shape[3])))
        return w.reshape(9, ci_pad, coutp)

    w_up = prep_w3(p['w_up'], cinp)
    w_same = prep_w3(p['w_same'], coutp)
    w_sing = jnp.pad(p['w_sing'][:, :, 0, 0].T.astype(f32),
                     ((0, cinp - cin), (0, coutp - cout)))

    def row(v):                                                  # (1, Cout_pad)
        return jnp.pad(v.astype(f32), (0, coutp - cout)).reshape(1, coutp)

    b_up, b_same, b_sing = row(p['b_up']), row(p['b_same']), row(p['b_sing'])
    g1, be1 = row(p['gamma1']), row(p['beta1'])
    g2, be2 = row(p['gamma2']), row(p['beta2'])

    cp_acc = pltpu.CompilerParams(dimension_semantics=("arbitrary",),
                                  vmem_limit_bytes=32 * 1024 * 1024)
    cp_par = pltpu.CompilerParams(dimension_semantics=("parallel",),
                                  vmem_limit_bytes=32 * 1024 * 1024)

    img_in = pl.BlockSpec((1, hp, wp, cinp), lambda i: (i, 0, 0, 0))
    img_out = pl.BlockSpec((1, H, W, coutp), lambda i: (i, 0, 0, 0))

    def full(shape):
        return pl.BlockSpec(shape, lambda i, _s=shape: (0,) * len(_s))

    # ---- stage A: conv_up + sing_conv + BN1 stats (grid over images) ------- #
    acc1, y, sum1, ssq1 = pl.pallas_call(
        functools.partial(_stage_a_kernel, H=H, W=W),
        grid=(N,),
        in_specs=[img_in, full((9, cinp, coutp)), full((1, coutp)),
                  full((cinp, coutp)), full((1, coutp))],
        out_specs=[img_out, img_out, full((1, coutp)), full((1, coutp))],
        out_shape=[jax.ShapeDtypeStruct((N, H, W, coutp), f32),
                   jax.ShapeDtypeStruct((N, H, W, coutp), f32),
                   jax.ShapeDtypeStruct((1, coutp), f32),
                   jax.ShapeDtypeStruct((1, coutp), f32)],
        compiler_params=cp_acc,
    )(xpad, w_up, b_up, w_sing, b_sing)

    # Fold global batch statistics (biased variance) into scale/shift.
    def fold_bn(s, ss, g, be):
        mean = s / nhw
        var = jnp.maximum(ss / nhw - mean * mean, 0.0)
        scale = g * lax.rsqrt(var + EPS)
        shift = be - mean * scale
        return scale, shift

    s1, t1 = fold_bn(sum1, ssq1, g1, be1)

    # ---- stage B: relu(bn1) + conv_same + BN2 stats (h1 stays in VMEM) ----- #
    acc2, sum2, ssq2 = pl.pallas_call(
        functools.partial(_stage_b_kernel, H=H, W=W),
        grid=(N,),
        in_specs=[img_out, full((1, coutp)), full((1, coutp)),
                  full((9, coutp, coutp)), full((1, coutp))],
        out_specs=[img_out, full((1, coutp)), full((1, coutp))],
        out_shape=[jax.ShapeDtypeStruct((N, H, W, coutp), f32),
                   jax.ShapeDtypeStruct((1, coutp), f32),
                   jax.ShapeDtypeStruct((1, coutp), f32)],
        scratch_shapes=[pltpu.VMEM((hp, wp, coutp), f32)],
        compiler_params=cp_acc,
    )(acc1, s1, t1, w_same, b_same)

    s2, t2 = fold_bn(sum2, ssq2, g2, be2)

    # ---- stage C: bn2 + residual add + relu (parallel, elementwise) -------- #
    out = pl.pallas_call(
        functools.partial(_stage_c_kernel, H=H, W=W),
        grid=(N,),
        in_specs=[img_out, img_out, full((1, coutp)), full((1, coutp))],
        out_specs=img_out,
        out_shape=jax.ShapeDtypeStruct((N, H, W, coutp), f32),
        compiler_params=cp_par,
    )(acc2, y, s2, t2)

    out = out[..., :cout]                                        # drop channel pad
    return jnp.transpose(out, (0, 3, 1, 2))                      # back to NCHW


# --------------------------- parameter creation ----------------------------- #

def init_params(key, nc_in, nc_out):
    ks = jax.random.split(key, 3)

    def conv_init(k, cout, cin, kh, kw):
        # PyTorch default Conv2d init: U(-1/sqrt(fan_in), 1/sqrt(fan_in))
        bound = 1.0 / math.sqrt(cin * kh * kw)
        kw_, kb_ = jax.random.split(k)
        w = jax.random.uniform(kw_, (cout, cin, kh, kw), jnp.float32, -bound, bound)
        b = jax.random.uniform(kb_, (cout,), jnp.float32, -bound, bound)
        return w, b

    w_up, b_up = conv_init(ks[0], nc_out, nc_in, 3, 3)
    w_same, b_same = conv_init(ks[1], nc_out, nc_out, 3, 3)
    w_sing, b_sing = conv_init(ks[2], nc_out, nc_in, 1, 1)
    return dict(w_up=w_up, b_up=b_up, w_same=w_same, b_same=b_same,
                w_sing=w_sing, b_sing=b_sing,
                gamma1=jnp.ones((nc_out,), jnp.float32),
                beta1=jnp.zeros((nc_out,), jnp.float32),
                gamma2=jnp.ones((nc_out,), jnp.float32),
                beta2=jnp.zeros((nc_out,), jnp.float32))


# ------------------------------ pure-JAX ref -------------------------------- #

def reference_forward(x_nchw, p):
    def conv(x, w, b):
        out = lax.conv_general_dilated(x, w, (1, 1), 'SAME',
                                       dimension_numbers=('NCHW', 'OIHW', 'NCHW'))
        return out + b.reshape(1, -1, 1, 1)

    def bn(x, g, be):
        mean = jnp.mean(x, axis=(0, 2, 3), keepdims=True)
        var = jnp.mean((x - mean) ** 2, axis=(0, 2, 3), keepdims=True)
        return ((x - mean) * lax.rsqrt(var + EPS) * g.reshape(1, -1, 1, 1)
                + be.reshape(1, -1, 1, 1))

    y = conv(x_nchw, p['w_sing'], p['b_sing'])
    h = conv(x_nchw, p['w_up'], p['b_up'])
    h = jnp.maximum(bn(h, p['gamma1'], p['beta1']), 0.0)
    h = conv(h, p['w_same'], p['b_same'])
    h = bn(h, p['gamma2'], p['beta2'])
    return jnp.maximum(h + y, 0.0)


if __name__ == "__main__":
    key = jax.random.PRNGKey(0)
    kx, kp = jax.random.split(key)
    nc_in, nc_out = 4, 8
    x = jax.random.normal(kx, (2, nc_in, 16, 16), jnp.float32)    # NCHW like torch
    params = init_params(kp, nc_in, nc_out)

    out = jax.block_until_ready(jax.jit(resnet_forward)(x, params))
    ref = jax.block_until_ready(reference_forward(x, params))

    assert out.shape == (2, nc_out, 16, 16), out.shape
    max_err = float(jnp.max(jnp.abs(out - ref)))
    assert jnp.allclose(out, ref, rtol=1e-2, atol=1e-2), f"max_err={max_err}"
    print("KERNEL_OK")
</pallas_src>

<mosaic_0001>
module attributes {stable_mosaic.version = 11 : i64} {
  func.func @_stage_a_kernel(%arg0: i32, %arg1: memref<1x18x18x128xf32, #tpu.memory_space<vmem>>, %arg2: memref<9x128x128xf32, #tpu.memory_space<vmem>>, %arg3: memref<1x128xf32, #tpu.memory_space<vmem>>, %arg4: memref<128x128xf32, #tpu.memory_space<vmem>>, %arg5: memref<1x128xf32, #tpu.memory_space<vmem>>, %arg6: memref<1x16x16x128xf32, #tpu.memory_space<vmem>>, %arg7: memref<1x16x16x128xf32, #tpu.memory_space<vmem>>, %arg8: memref<1x128xf32, #tpu.memory_space<vmem>>, %arg9: memref<1x128xf32, #tpu.memory_space<vmem>>) attributes {dimension_semantics = [#tpu.dimension_semantics<arbitrary>], iteration_bounds = array<i64: 2>, scalar_prefetch = 0 : i64, scratch_operands = 0 : i64, tpu.core_type = #tpu.core_type<tc>, window_params = [{transform_indices = @transform_0, window_bounds = array<i64: 1, 18, 18, 128>}, {pipeline_mode = #tpu.pipeline_mode<synchronous>, transform_indices = @transform_1, window_bounds = array<i64: 9, 128, 128>}, {pipeline_mode = #tpu.pipeline_mode<synchronous>, transform_indices = @transform_2, window_bounds = array<i64: 1, 128>}, {pipeline_mode = #tpu.pipeline_mode<synchronous>, transform_indices = @transform_3, window_bounds = array<i64: 128, 128>}, {pipeline_mode = #tpu.pipeline_mode<synchronous>, transform_indices = @transform_4, window_bounds = array<i64: 1, 128>}, {transform_indices = @transform_5, window_bounds = array<i64: 1, 16, 16, 128>}, {transform_indices = @transform_6, window_bounds = array<i64: 1, 16, 16, 128>}, {pipeline_mode = #tpu.pipeline_mode<synchronous>, transform_indices = @transform_7, window_bounds = array<i64: 1, 128>}, {pipeline_mode = #tpu.pipeline_mode<synchronous>, transform_indices = @transform_8, window_bounds = array<i64: 1, 128>}]} {
    %cst = arith.constant 0.000000e+00 : f32
    %0 = vector.broadcast %cst : f32 to vector<256x128xf32>
    %c0 = arith.constant 0 : index
    %c0_0 = arith.constant 0 : index
    %c0_1 = arith.constant 0 : index
    %c0_2 = arith.constant 0 : index
    %1 = vector.load %arg1[%c0, %c0_0, %c0_1, %c0_2] : memref<1x18x18x128xf32, #tpu.memory_space<vmem>>, vector<1x16x16x128xf32>
    %2 = vector.shape_cast %1 : vector<1x16x16x128xf32> to vector<16x16x128xf32>
    %3 = vector.shape_cast %2 : vector<16x16x128xf32> to vector<256x128xf32>
    %c0_3 = arith.constant 0 : index
    %c0_4 = arith.constant 0 : index
    %c0_5 = arith.constant 0 : index
    %4 = vector.load %arg2[%c0_3, %c0_4, %c0_5] : memref<9x128x128xf32, #tpu.memory_space<vmem>>, vector<1x128x128xf32>
    %5 = vector.shape_cast %4 : vector<1x128x128xf32> to vector<128x128xf32>
    %cst_6 = arith.constant dense<0.000000e+00> : vector<256x128xf32>
    %6 = tpu.matmul %3, %5, %cst_6 {dimension_numbers = #tpu.dot_dimension_numbers<[1], [0], [0], [1], [0, 0, 1, 1], [], []>} : vector<256x128xf32>, vector<128x128xf32>, vector<256x128xf32> -> vector<256x128xf32>
    %7 = arith.addf %0, %6 : vector<256x128xf32>
    %c0_7 = arith.constant 0 : index
    %c0_8 = arith.constant 0 : index
    %c1 = arith.constant 1 : index
    %c0_9 = arith.constant 0 : index
    %8 = vector.load %arg1[%c0_7, %c0_8, %c1, %c0_9] : memref<1x18x18x128xf32, #tpu.memory_space<vmem>>, vector<1x16x16x128xf32>
    %9 = vector.shape_cast %8 : vector<1x16x16x128xf32> to vector<16x16x128xf32>
    %10 = vector.shape_cast %9 : vector<16x16x128xf32> to vector<256x128xf32>
    %c1_10 = arith.constant 1 : index
    %c0_11 = arith.constant 0 : index
    %c0_12 = arith.constant 0 : index
    %11 = vector.load %arg2[%c1_10, %c0_11, %c0_12] : memref<9x128x128xf32, #tpu.memory_space<vmem>>, vector<1x128x128xf32>
    %12 = vector.shape_cast %11 : vector<1x128x128xf32> to vector<128x128xf32>
    %cst_13 = arith.constant dense<0.000000e+00> : vector<256x128xf32>
    %13 = tpu.matmul %10, %12, %cst_13 {dimension_numbers = #tpu.dot_dimension_numbers<[1], [0], [0], [1], [0, 0, 1, 1], [], []>} : vector<256x128xf32>, vector<128x128xf32>, vector<256x128xf32> -> vector<256x128xf32>
    %14 = arith.addf %7, %13 : vector<256x128xf32>
    %c0_14 = arith.constant 0 : index
    %c0_15 = arith.constant 0 : index
    %c2 = arith.constant 2 : index
    %c0_16 = arith.constant 0 : index
    %15 = vector.load %arg1[%c0_14, %c0_15, %c2, %c0_16] : memref<1x18x18x128xf32, #tpu.memory_space<vmem>>, vector<1x16x16x128xf32>
    %16 = vector.shape_cast %15 : vector<1x16x16x128xf32> to vector<16x16x128xf32>
    %17 = vector.shape_cast %16 : vector<16x16x128xf32> to vector<256x128xf32>
    %c2_17 = arith.constant 2 : index
    %c0_18 = arith.constant 0 : index
    %c0_19 = arith.constant 0 : index
    %18 = vector.load %arg2[%c2_17, %c0_18, %c0_19] : memref<9x128x128xf32, #tpu.memory_space<vmem>>, vector<1x128x128xf32>
    %19 = vector.shape_cast %18 : vector<1x128x128xf32> to vector<128x128xf32>
    %cst_20 = arith.constant dense<0.000000e+00> : vector<256x128xf32>
    %20 = tpu.matmul %17, %19, %cst_20 {dimension_numbers = #tpu.dot_dimension_numbers<[1], [0], [0], [1], [0, 0, 1, 1], [], []>} : vector<256x128xf32>, vector<128x128xf32>, vector<256x128xf32> -> vector<256x128xf32>
    %21 = arith.addf %14, %20 : vector<256x128xf32>
    %c0_21 = arith.constant 0 : index
    %c1_22 = arith.constant 1 : index
    %c0_23 = arith.constant 0 : index
    %c0_24 = arith.constant 0 : index
    %22 = vector.load %arg1[%c0_21, %c1_22, %c0_23, %c0_24] : memref<1x18x18x128xf32, #tpu.memory_space<vmem>>, vector<1x16x16x128xf32>
    %23 = vector.shape_cast %22 : vector<1x16x16x128xf32> to vector<16x16x128xf32>
    %24 = vector.shape_cast %23 : vector<16x16x128xf32> to vector<256x128xf32>
    %c3 = arith.constant 3 : index
    %c0_25 = arith.constant 0 : index
    %c0_26 = arith.constant 0 : index
    %25 = vector.load %arg2[%c3, %c0_25, %c0_26] : memref<9x128x128xf32, #tpu.memory_space<vmem>>, vector<1x128x128xf32>
    %26 = vector.shape_cast %25 : vector<1x128x128xf32> to vector<128x128xf32>
    %cst_27 = arith.constant dense<0.000000e+00> : vector<256x128xf32>
    %27 = tpu.matmul %24, %26, %cst_27 {dimension_numbers = #tpu.dot_dimension_numbers<[1], [0], [0], [1], [0, 0, 1, 1], [], []>} : vector<256x128xf32>, vector<128x128xf32>, vector<256x128xf32> -> vector<256x128xf32>
    %28 = arith.addf %21, %27 : vector<256x128xf32>
    %c0_28 = arith.constant 0 : index
    %c1_29 = arith.constant 1 : index
    %c1_30 = arith.constant 1 : index
    %c0_31 = arith.constant 0 : index
    %29 = vector.load %arg1[%c0_28, %c1_29, %c1_30, %c0_31] : memref<1x18x18x128xf32, #tpu.memory_space<vmem>>, vector<1x16x16x128xf32>
    %30 = vector.shape_cast %29 : vector<1x16x16x128xf32> to vector<16x16x128xf32>
    %31 = vector.shape_cast %30 : vector<16x16x128xf32> to vector<256x128xf32>
    %c4 = arith.constant 4 : index
    %c0_32 = arith.constant 0 : index
    %c0_33 = arith.constant 0 : index
    %32 = vector.load %arg2[%c4, %c0_32, %c0_33] : memref<9x128x128xf32, #tpu.memory_space<vmem>>, vector<1x128x128xf32>
    %33 = vector.shape_cast %32 : vector<1x128x128xf32> to vector<128x128xf32>
    %cst_34 = arith.constant dense<0.000000e+00> : vector<256x128xf32>
    %34 = tpu.matmul %31, %33, %cst_34 {dimension_numbers = #tpu.dot_dimension_numbers<[1], [0], [0], [1], [0, 0, 1, 1], [], []>} : vector<256x128xf32>, vector<128x128xf32>, vector<256x128xf32> -> vector<256x128xf32>
    %35 = arith.addf %28, %34 : vector<256x128xf32>
    %c0_35 = arith.constant 0 : index
    %c1_36 = arith.constant 1 : index
    %c2_37 = arith.constant 2 : index
    %c0_38 = arith.constant 0 : index
    %36 = vector.load %arg1[%c0_35, %c1_36, %c2_37, %c0_38] : memref<1x18x18x128xf32, #tpu.memory_space<vmem>>, vector<1x16x16x128xf32>
    %37 = vector.shape_cast %36 : vector<1x16x16x128xf32> to vector<16x16x128xf32>
    %38 = vector.shape_cast %37 : vector<16x16x128xf32> to vector<256x128xf32>
    %c5 = arith.constant 5 : index
    %c0_39 = arith.constant 0 : index
    %c0_40 = arith.constant 0 : index
    %39 = vector.load %arg2[%c5, %c0_39, %c0_40] : memref<9x128x128xf32, #tpu.memory_space<vmem>>, vector<1x128x128xf32>
    %40 = vector.shape_cast %39 : vector<1x128x128xf32> to vector<128x128xf32>
    %cst_41 = arith.constant dense<0.000000e+00> : vector<256x128xf32>
    %41 = tpu.matmul %38, %40, %cst_41 {dimension_numbers = #tpu.dot_dimension_numbers<[1], [0], [0], [1], [0, 0, 1, 1], [], []>} : vector<256x128xf32>, vector<128x128xf32>, vector<256x128xf32> -> vector<256x128xf32>
    %42 = arith.addf %35, %41 : vector<256x128xf32>
    %c0_42 = arith.constant 0 : index
    %c2_43 = arith.constant 2 : index
    %c0_44 = arith.constant 0 : index
    %c0_45 = arith.constant 0 : index
    %43 = vector.load %arg1[%c0_42, %c2_43, %c0_44, %c0_45] : memref<1x18x18x128xf32, #tpu.memory_space<vmem>>, vector<1x16x16x128xf32>
    %44 = vector.shape_cast %43 : vector<1x16x16x128xf32> to vector<16x16x128xf32>
    %45 = vector.shape_cast %44 : vector<16x16x128xf32> to vector<256x128xf32>
    %c6 = arith.constant 6 : index
    %c0_46 = arith.constant 0 : index
    %c0_47 = arith.constant 0 : index
    %46 = vector.load %arg2[%c6, %c0_46, %c0_47] : memref<9x128x128xf32, #tpu.memory_space<vmem>>, vector<1x128x128xf32>
    %47 = vector.shape_cast %46 : vector<1x128x128xf32> to vector<128x128xf32>
    %cst_48 = arith.constant dense<0.000000e+00> : vector<256x128xf32>
    %48 = tpu.matmul %45, %47, %cst_48 {dimension_numbers = #tpu.dot_dimension_numbers<[1], [0], [0], [1], [0, 0, 1, 1], [], []>} : vector<256x128xf32>, vector<128x128xf32>, vector<256x128xf32> -> vector<256x128xf32>
    %49 = arith.addf %42, %48 : vector<256x128xf32>
    %c0_49 = arith.constant 0 : index
    %c2_50 = arith.constant 2 : index
    %c1_51 = arith.constant 1 : index
    %c0_52 = arith.constant 0 : index
    %50 = vector.load %arg1[%c0_49, %c2_50, %c1_51, %c0_52] : memref<1x18x18x128xf32, #tpu.memory_space<vmem>>, vector<1x16x16x128xf32>
    %51 = vector.shape_cast %50 : vector<1x16x16x128xf32> to vector<16x16x128xf32>
    %52 = vector.shape_cast %51 : vector<16x16x128xf32> to vector<256x128xf32>
    %c7 = arith.constant 7 : index
    %c0_53 = arith.constant 0 : index
    %c0_54 = arith.constant 0 : index
    %53 = vector.load %arg2[%c7, %c0_53, %c0_54] : memref<9x128x128xf32, #tpu.memory_space<vmem>>, vector<1x128x128xf32>
    %54 = vector.shape_cast %53 : vector<1x128x128xf32> to vector<128x128xf32>
    %cst_55 = arith.constant dense<0.000000e+00> : vector<256x128xf32>
    %55 = tpu.matmul %52, %54, %cst_55 {dimension_numbers = #tpu.dot_dimension_numbers<[1], [0], [0], [1], [0, 0, 1, 1], [], []>} : vector<256x128xf32>, vector<128x128xf32>, vector<256x128xf32> -> vector<256x128xf32>
    %56 = arith.addf %49, %55 : vector<256x128xf32>
    %c0_56 = arith.constant 0 : index
    %c2_57 = arith.constant 2 : index
    %c2_58 = arith.constant 2 : index
    %c0_59 = arith.constant 0 : index
    %57 = vector.load %arg1[%c0_56, %c2_57, %c2_58, %c0_59] : memref<1x18x18x128xf32, #tpu.memory_space<vmem>>, vector<1x16x16x128xf32>
    %58 = vector.shape_cast %57 : vector<1x16x16x128xf32> to vector<16x16x128xf32>
    %59 = vector.shape_cast %58 : vector<16x16x128xf32> to vector<256x128xf32>
    %c8 = arith.constant 8 : index
    %c0_60 = arith.constant 0 : index
    %c0_61 = arith.constant 0 : index
    %60 = vector.load %arg2[%c8, %c0_60, %c0_61] : memref<9x128x128xf32, #tpu.memory_space<vmem>>, vector<1x128x128xf32>
    %61 = vector.shape_cast %60 : vector<1x128x128xf32> to vector<128x128xf32>
    %cst_62 = arith.constant dense<0.000000e+00> : vector<256x128xf32>
    %62 = tpu.matmul %59, %61, %cst_62 {dimension_numbers = #tpu.dot_dimension_numbers<[1], [0], [0], [1], [0, 0, 1, 1], [], []>} : vector<256x128xf32>, vector<128x128xf32>, vector<256x128xf32> -> vector<256x128xf32>
    %63 = arith.addf %56, %62 : vector<256x128xf32>
    %c0_63 = arith.constant 0 : index
    %c0_64 = arith.constant 0 : index
    %64 = vector.load %arg3[%c0_63, %c0_64] : memref<1x128xf32, #tpu.memory_space<vmem>>, vector<1x128xf32>
    %65 = vector.broadcast %64 : vector<1x128xf32> to vector<256x128xf32>
    %66 = arith.addf %63, %65 : vector<256x128xf32>
    %67 = vector.shape_cast %66 : vector<256x128xf32> to vector<1x16x16x128xf32>
    %c0_65 = arith.constant 0 : index
    %c0_66 = arith.constant 0 : index
    %c0_67 = arith.constant 0 : index
    %c0_68 = arith.constant 0 : index
    %68 = vector.load %arg6[%c0_65, %c0_66, %c0_67, %c0_68] : memref<1x16x16x128xf32, #tpu.memory_space<vmem>>, vector<1x16x16x128xf32>
    tpu.vector_store %arg6[%c0_65, %c0_66, %c0_67, %c0_68], %67 {strides = array<i32>} : memref<1x16x16x128xf32, #tpu.memory_space<vmem>>, vector<1x16x16x128xf32>,
    %c0_69 = arith.constant 0 : index
    %c1_70 = arith.constant 1 : index
    %c1_71 = arith.constant 1 : index
    %c0_72 = arith.constant 0 : index
    %69 = vector.load %arg1[%c0_69, %c1_70, %c1_71, %c0_72] : memref<1x18x18x128xf32, #tpu.memory_space<vmem>>, vector<1x16x16x128xf32>
    %70 = vector.shape_cast %69 : vector<1x16x16x128xf32> to vector<16x16x128xf32>
    %71 = vector.shape_cast %70 : vector<16x16x128xf32> to vector<256x128xf32>
    %c0_73 = arith.constant 0 : index
    %c0_74 = arith.constant 0 : index
    %72 = vector.load %arg4[%c0_73, %c0_74] : memref<128x128xf32, #tpu.memory_space<vmem>>, vector<128x128xf32>
    %cst_75 = arith.constant dense<0.000000e+00> : vector<256x128xf32>
    %73 = tpu.matmul %71, %72, %cst_75 {dimension_numbers = #tpu.dot_dimension_numbers<[1], [0], [0], [1], [0, 0, 1, 1], [], []>} : vector<256x128xf32>, vector<128x128xf32>, vector<256x128xf32> -> vector<256x128xf32>
    %c0_76 = arith.constant 0 : index
    %c0_77 = arith.constant 0 : index
    %74 = vector.load %arg5[%c0_76, %c0_77] : memref<1x128xf32, #tpu.memory_space<vmem>>, vector<1x128xf32>
    %75 = vector.broadcast %74 : vector<1x128xf32> to vector<256x128xf32>
    %76 = arith.addf %73, %75 : vector<256x128xf32>
    %77 = vector.shape_cast %76 : vector<256x128xf32> to vector<1x16x16x128xf32>
    %c0_78 = arith.constant 0 : index
    %c0_79 = arith.constant 0 : index
    %c0_80 = arith.constant 0 : index
    %c0_81 = arith.constant 0 : index
    %78 = vector.load %arg7[%c0_78, %c0_79, %c0_80, %c0_81] : memref<1x16x16x128xf32, #tpu.memory_space<vmem>>, vector<1x16x16x128xf32>
    tpu.vector_store %arg7[%c0_78, %c0_79, %c0_80, %c0_81], %77 {strides = array<i32>} : memref<1x16x16x128xf32, #tpu.memory_space<vmem>>, vector<1x16x16x128xf32>,
    %c0_i32 = arith.constant 0 : i32
    %79 = arith.cmpi eq, %arg0, %c0_i32 : i32
    %80 = arith.extui %79 : i1 to i32
    %c0_i32_82 = arith.constant 0 : i32
    %81 = arith.cmpi ne, %80, %c0_i32_82 : i32
    scf.if %81 {
      %cst_93 = arith.constant 0.000000e+00 : f32
      %93 = vector.broadcast %cst_93 : f32 to vector<1x128xf32>
      %c0_94 = arith.constant 0 : index
      %c0_95 = arith.constant 0 : index
      %94 = vector.load %arg8[%c0_94, %c0_95] : memref<1x128xf32, #tpu.memory_space<vmem>>, vector<1x128xf32>
      tpu.vector_store %arg8[%c0_94, %c0_95], %93 {strides = array<i32>} : memref<1x128xf32, #tpu.memory_space<vmem>>, vector<1x128xf32>,
      %cst_96 = arith.constant 0.000000e+00 : f32
      %95 = vector.broadcast %cst_96 : f32 to vector<1x128xf32>
      %c0_97 = arith.constant 0 : index
      %c0_98 = arith.constant 0 : index
      %96 = vector.load %arg9[%c0_97, %c0_98] : memref<1x128xf32, #tpu.memory_space<vmem>>, vector<1x128xf32>
      tpu.vector_store %arg9[%c0_97, %c0_98], %95 {strides = array<i32>} : memref<1x128xf32, #tpu.memory_space<vmem>>, vector<1x128xf32>,
    } else {
    }
    %c0_83 = arith.constant 0 : index
    %c0_84 = arith.constant 0 : index
    %82 = vector.load %arg8[%c0_83, %c0_84] : memref<1x128xf32, #tpu.memory_space<vmem>>, vector<1x128xf32>
    %cst_85 = arith.constant dense<0.000000e+00> : vector<128xf32>
    %83 = vector.multi_reduction <add>, %66, %cst_85 [0] : vector<256x128xf32> to vector<128xf32>
    %84 = vector.shape_cast %83 : vector<128xf32> to vector<1x128xf32>
    %85 = arith.addf %82, %84 : vector<1x128xf32>
    %c0_86 = arith.constant 0 : index
    %c0_87 = arith.constant 0 : index
    %86 = vector.load %arg8[%c0_86, %c0_87] : memref<1x128xf32, #tpu.memory_space<vmem>>, vector<1x128xf32>
    tpu.vector_store %arg8[%c0_86, %c0_87], %85 {strides = array<i32>} : memref<1x128xf32, #tpu.memory_space<vmem>>, vector<1x128xf32>,
    %c0_88 = arith.constant 0 : index
    %c0_89 = arith.constant 0 : index
    %87 = vector.load %arg9[%c0_88, %c0_89] : memref<1x128xf32, #tpu.memory_space<vmem>>, vector<1x128xf32>
    %88 = arith.mulf %66, %66 : vector<256x128xf32>
    %cst_90 = arith.constant dense<0.000000e+00> : vector<128xf32>
    %89 = vector.multi_reduction <add>, %88, %cst_90 [0] : vector<256x128xf32> to vector<128xf32>
    %90 = vector.shape_cast %89 : vector<128xf32> to vector<1x128xf32>
    %91 = arith.addf %87, %90 : vector<1x128xf32>
    %c0_91 = arith.constant 0 : index
    %c0_92 = arith.constant 0 : index
    %92 = vector.load %arg9[%c0_91, %c0_92] : memref<1x128xf32, #tpu.memory_space<vmem>>, vector<1x128xf32>
    tpu.vector_store %arg9[%c0_91, %c0_92], %91 {strides = array<i32>} : memref<1x128xf32, #tpu.memory_space<vmem>>, vector<1x128xf32>,
    return
  }
  func.func @transform_0(%arg0: i32) -> (i32, i32, i32, i32) {
    %c0_i32 = arith.constant 0 : i32
    %c0_i32_0 = arith.constant 0 : i32
    %c0_i32_1 = arith.constant 0 : i32
    %c0_i32_2 = arith.constant 0 : i32
    return %arg0, %c0_i32, %c0_i32_0, %c0_i32_1 : i32, i32, i32, i32
  }
  func.func @transform_1(%arg0: i32) -> (i32, i32, i32) {
    %c0_i32 = arith.constant 0 : i32
    %c0_i32_0 = arith.constant 0 : i32
    %c0_i32_1 = arith.constant 0 : i32
    %c0_i32_2 = arith.constant 0 : i32
    return %c0_i32, %c0_i32_0, %c0_i32_1 : i32, i32, i32
  }
  func.func @transform_2(%arg0: i32) -> (i32, i32) {
    %c0_i32 = arith.constant 0 : i32
    %c0_i32_0 = arith.constant 0 : i32
    %c0_i32_1 = arith.constant 0 : i32
    return %c0_i32, %c0_i32_0 : i32, i32
  }
  func.func @transform_3(%arg0: i32) -> (i32, i32) {
    %c0_i32 = arith.constant 0 : i32
    %c0_i32_0 = arith.constant 0 : i32
    %c0_i32_1 = arith.constant 0 : i32
    return %c0_i32, %c0_i32_0 : i32, i32
  }
  func.func @transform_4(%arg0: i32) -> (i32, i32) {
    %c0_i32 = arith.constant 0 : i32
    %c0_i32_0 = arith.constant 0 : i32
    %c0_i32_1 = arith.constant 0 : i32
    return %c0_i32, %c0_i32_0 : i32, i32
  }
  func.func @transform_5(%arg0: i32) -> (i32, i32, i32, i32) {
    %c0_i32 = arith.constant 0 : i32
    %c0_i32_0 = arith.constant 0 : i32
    %c0_i32_1 = arith.constant 0 : i32
    %c0_i32_2 = arith.constant 0 : i32
    return %arg0, %c0_i32, %c0_i32_0, %c0_i32_1 : i32, i32, i32, i32
  }
  func.func @transform_6(%arg0: i32) -> (i32, i32, i32, i32) {
    %c0_i32 = arith.constant 0 : i32
    %c0_i32_0 = arith.constant 0 : i32
    %c0_i32_1 = arith.constant 0 : i32
    %c0_i32_2 = arith.constant 0 : i32
    return %arg0, %c0_i32, %c0_i32_0, %c0_i32_1 : i32, i32, i32, i32
  }
  func.func @transform_7(%arg0: i32) -> (i32, i32) {
    %c0_i32 = arith.constant 0 : i32
    %c0_i32_0 = arith.constant 0 : i32
    %c0_i32_1 = arith.constant 0 : i32
    return %c0_i32, %c0_i32_0 : i32, i32
  }
  func.func @transform_8(%arg0: i32) -> (i32, i32) {
    %c0_i32 = arith.constant 0 : i32
    %c0_i32_0 = arith.constant 0 : i32
    %c0_i32_1 = arith.constant 0 : i32
    return %c0_i32, %c0_i32_0 : i32, i32
  }
}

module attributes {stable_mosaic.version = 11 : i64} {
  func.func @_stage_c_kernel(%arg0: i32, %arg1: memref<1x16x16x128xf32, #tpu.memory_space<vmem>>, %arg2: memref<1x16x16x128xf32, #tpu.memory_space<vmem>>, %arg3: memref<1x128xf32, #tpu.memory_space<vmem>>, %arg4: memref<1x128xf32, #tpu.memory_space<vmem>>, %arg5: memref<1x16x16x128xf32, #tpu.memory_space<vmem>>) attributes {dimension_semantics = [#tpu.dimension_semantics<parallel>], iteration_bounds = array<i64: 2>, scalar_prefetch = 0 : i64, scratch_operands = 0 : i64, tpu.core_type = #tpu.core_type<tc>, window_params = [{transform_indices = @transform_0, window_bounds = array<i64: 1, 16, 16, 128>}, {transform_indices = @transform_1, window_bounds = array<i64: 1, 16, 16, 128>}, {pipeline_mode = #tpu.pipeline_mode<synchronous>, transform_indices = @transform_2, window_bounds = array<i64: 1, 128>}, {pipeline_mode = #tpu.pipeline_mode<synchronous>, transform_indices = @transform_3, window_bounds = array<i64: 1, 128>}, {transform_indices = @transform_4, window_bounds = array<i64: 1, 16, 16, 128>}]} {
    %c0 = arith.constant 0 : index
    %c0_0 = arith.constant 0 : index
    %c0_1 = arith.constant 0 : index
    %c0_2 = arith.constant 0 : index
    %0 = vector.load %arg1[%c0, %c0_0, %c0_1, %c0_2] : memref<1x16x16x128xf32, #tpu.memory_space<vmem>>, vector<1x16x16x128xf32>
    %1 = vector.shape_cast %0 : vector<1x16x16x128xf32> to vector<16x16x128xf32>
    %2 = vector.shape_cast %1 : vector<16x16x128xf32> to vector<256x128xf32>
    %c0_3 = arith.constant 0 : index
    %c0_4 = arith.constant 0 : index
    %c0_5 = arith.constant 0 : index
    %c0_6 = arith.constant 0 : index
    %3 = vector.load %arg2[%c0_3, %c0_4, %c0_5, %c0_6] : memref<1x16x16x128xf32, #tpu.memory_space<vmem>>, vector<1x16x16x128xf32>
    %4 = vector.shape_cast %3 : vector<1x16x16x128xf32> to vector<16x16x128xf32>
    %5 = vector.shape_cast %4 : vector<16x16x128xf32> to vector<256x128xf32>
    %c0_7 = arith.constant 0 : index
    %c0_8 = arith.constant 0 : index
    %6 = vector.load %arg3[%c0_7, %c0_8] : memref<1x128xf32, #tpu.memory_space<vmem>>, vector<1x128xf32>
    %7 = vector.broadcast %6 : vector<1x128xf32> to vector<256x128xf32>
    %8 = arith.mulf %2, %7 : vector<256x128xf32>
    %c0_9 = arith.constant 0 : index
    %c0_10 = arith.constant 0 : index
    %9 = vector.load %arg4[%c0_9, %c0_10] : memref<1x128xf32, #tpu.memory_space<vmem>>, vector<1x128xf32>
    %10 = vector.broadcast %9 : vector<1x128xf32> to vector<256x128xf32>
    %11 = arith.addf %8, %10 : vector<256x128xf32>
    %12 = arith.addf %11, %5 : vector<256x128xf32>
    %cst = arith.constant 0.000000e+00 : f32
    %13 = vector.broadcast %cst : f32 to vector<256x128xf32>
    %14 = arith.maximumf %12, %13 : vector<256x128xf32>
    %15 = vector.shape_cast %14 : vector<256x128xf32> to vector<1x16x16x128xf32>
    %c0_11 = arith.constant 0 : index
    %c0_12 = arith.constant 0 : index
    %c0_13 = arith.constant 0 : index
    %c0_14 = arith.constant 0 : index
    %16 = vector.load %arg5[%c0_11, %c0_12, %c0_13, %c0_14] : memref<1x16x16x128xf32, #tpu.memory_space<vmem>>, vector<1x16x16x128xf32>
    tpu.vector_store %arg5[%c0_11, %c0_12, %c0_13, %c0_14], %15 {strides = array<i32>} : memref<1x16x16x128xf32, #tpu.memory_space<vmem>>, vector<1x16x16x128xf32>,
    return
  }
  func.func @transform_0(%arg0: i32) -> (i32, i32, i32, i32) {
    %c0_i32 = arith.constant 0 : i32
    %c0_i32_0 = arith.constant 0 : i32
    %c0_i32_1 = arith.constant 0 : i32
    %c0_i32_2 = arith.constant 0 : i32
    return %arg0, %c0_i32, %c0_i32_0, %c0_i32_1 : i32, i32, i32, i32
  }
  func.func @transform_1(%arg0: i32) -> (i32, i32, i32, i32) {
    %c0_i32 = arith.constant 0 : i32
    %c0_i32_0 = arith.constant 0 : i32
    %c0_i32_1 = arith.constant 0 : i32
    %c0_i32_2 = arith.constant 0 : i32
    return %arg0, %c0_i32, %c0_i32_0, %c0_i32_1 : i32, i32, i32, i32
  }
  func.func @transform_2(%arg0: i32) -> (i32, i32) {
    %c0_i32 = arith.constant 0 : i32
    %c0_i32_0 = arith.constant 0 : i32
    %c0_i32_1 = arith.constant 0 : i32
    return %c0_i32, %c0_i32_0 : i32, i32
  }
  func.func @transform_3(%arg0: i32) -> (i32, i32) {
    %c0_i32 = arith.constant 0 : i32
    %c0_i32_0 = arith.constant 0 : i32
    %c0_i32_1 = arith.constant 0 : i32
    return %c0_i32, %c0_i32_0 : i32, i32
  }
  func.func @transform_4(%arg0: i32) -> (i32, i32, i32, i32) {
    %c0_i32 = arith.constant 0 : i32
    %c0_i32_0 = arith.constant 0 : i32
    %c0_i32_1 = arith.constant 0 : i32
    %c0_i32_2 = arith.constant 0 : i32
    return %arg0, %c0_i32, %c0_i32_0, %c0_i32_1 : i32, i32, i32, i32
  }
}

module attributes {stable_mosaic.version = 11 : i64} {
  func.func @_stage_b_kernel(%arg0: i32, %arg1: memref<1x16x16x128xf32, #tpu.memory_space<vmem>>, %arg2: memref<1x128xf32, #tpu.memory_space<vmem>>, %arg3: memref<1x128xf32, #tpu.memory_space<vmem>>, %arg4: memref<9x128x128xf32, #tpu.memory_space<vmem>>, %arg5: memref<1x128xf32, #tpu.memory_space<vmem>>, %arg6: memref<1x16x16x128xf32, #tpu.memory_space<vmem>>, %arg7: memref<1x128xf32, #tpu.memory_space<vmem>>, %arg8: memref<1x128xf32, #tpu.memory_space<vmem>>, %arg9: memref<18x18x128xf32, #tpu.memory_space<vmem>>) attributes {dimension_semantics = [#tpu.dimension_semantics<arbitrary>], iteration_bounds = array<i64: 2>, scalar_prefetch = 0 : i64, scratch_operands = 1 : i64, tpu.core_type = #tpu.core_type<tc>, window_params = [{transform_indices = @transform_0, window_bounds = array<i64: 1, 16, 16, 128>}, {pipeline_mode = #tpu.pipeline_mode<synchronous>, transform_indices = @transform_1, window_bounds = array<i64: 1, 128>}, {pipeline_mode = #tpu.pipeline_mode<synchronous>, transform_indices = @transform_2, window_bounds = array<i64: 1, 128>}, {pipeline_mode = #tpu.pipeline_mode<synchronous>, transform_indices = @transform_3, window_bounds = array<i64: 9, 128, 128>}, {pipeline_mode = #tpu.pipeline_mode<synchronous>, transform_indices = @transform_4, window_bounds = array<i64: 1, 128>}, {transform_indices = @transform_5, window_bounds = array<i64: 1, 16, 16, 128>}, {pipeline_mode = #tpu.pipeline_mode<synchronous>, transform_indices = @transform_6, window_bounds = array<i64: 1, 128>}, {pipeline_mode = #tpu.pipeline_mode<synchronous>, transform_indices = @transform_7, window_bounds = array<i64: 1, 128>}]} {
    %c0 = arith.constant 0 : index
    %c0_0 = arith.constant 0 : index
    %c0_1 = arith.constant 0 : index
    %c0_2 = arith.constant 0 : index
    %0 = vector.load %arg1[%c0, %c0_0, %c0_1, %c0_2] : memref<1x16x16x128xf32, #tpu.memory_space<vmem>>, vector<1x16x16x128xf32>
    %1 = vector.shape_cast %0 : vector<1x16x16x128xf32> to vector<16x16x128xf32>
    %2 = vector.shape_cast %1 : vector<16x16x128xf32> to vector<256x128xf32>
    %c0_3 = arith.constant 0 : index
    %c0_4 = arith.constant 0 : index
    %3 = vector.load %arg2[%c0_3, %c0_4] : memref<1x128xf32, #tpu.memory_space<vmem>>, vector<1x128xf32>
    %4 = vector.broadcast %3 : vector<1x128xf32> to vector<256x128xf32>
    %5 = arith.mulf %2, %4 : vector<256x128xf32>
    %c0_5 = arith.constant 0 : index
    %c0_6 = arith.constant 0 : index
    %6 = vector.load %arg3[%c0_5, %c0_6] : memref<1x128xf32, #tpu.memory_space<vmem>>, vector<1x128xf32>
    %7 = vector.broadcast %6 : vector<1x128xf32> to vector<256x128xf32>
    %8 = arith.addf %5, %7 : vector<256x128xf32>
    %cst = arith.constant 0.000000e+00 : f32
    %9 = vector.broadcast %cst : f32 to vector<256x128xf32>
    %10 = arith.maximumf %8, %9 : vector<256x128xf32>
    %cst_7 = arith.constant 0.000000e+00 : f32
    %11 = vector.broadcast %cst_7 : f32 to vector<18x18x128xf32>
    %c0_8 = arith.constant 0 : index
    %c0_9 = arith.constant 0 : index
    %c0_10 = arith.constant 0 : index
    %12 = vector.load %arg9[%c0_8, %c0_9, %c0_10] : memref<18x18x128xf32, #tpu.memory_space<vmem>>, vector<18x18x128xf32>
    tpu.vector_store %arg9[%c0_8, %c0_9, %c0_10], %11 {strides = array<i32>} : memref<18x18x128xf32, #tpu.memory_space<vmem>>, vector<18x18x128xf32>,
    %13 = vector.shape_cast %10 : vector<256x128xf32> to vector<16x16x128xf32>
    %c1 = arith.constant 1 : index
    %c1_11 = arith.constant 1 : index
    %c0_12 = arith.constant 0 : index
    %14 = vector.load %arg9[%c1, %c1_11, %c0_12] : memref<18x18x128xf32, #tpu.memory_space<vmem>>, vector<16x16x128xf32>
    tpu.vector_store %arg9[%c1, %c1_11, %c0_12], %13 {strides = array<i32>} : memref<18x18x128xf32, #tpu.memory_space<vmem>>, vector<16x16x128xf32>,
    %cst_13 = arith.constant 0.000000e+00 : f32
    %15 = vector.broadcast %cst_13 : f32 to vector<256x128xf32>
    %c0_14 = arith.constant 0 : index
    %c0_15 = arith.constant 0 : index
    %c0_16 = arith.constant 0 : index
    %16 = vector.load %arg9[%c0_14, %c0_15, %c0_16] : memref<18x18x128xf32, #tpu.memory_space<vmem>>, vector<16x16x128xf32>
    %17 = vector.shape_cast %16 : vector<16x16x128xf32> to vector<256x128xf32>
    %c0_17 = arith.constant 0 : index
    %c0_18 = arith.constant 0 : index
    %c0_19 = arith.constant 0 : index
    %18 = vector.load %arg4[%c0_17, %c0_18, %c0_19] : memref<9x128x128xf32, #tpu.memory_space<vmem>>, vector<1x128x128xf32>
    %19 = vector.shape_cast %18 : vector<1x128x128xf32> to vector<128x128xf32>
    %cst_20 = arith.constant dense<0.000000e+00> : vector<256x128xf32>
    %20 = tpu.matmul %17, %19, %cst_20 {dimension_numbers = #tpu.dot_dimension_numbers<[1], [0], [0], [1], [0, 0, 1, 1], [], []>} : vector<256x128xf32>, vector<128x128xf32>, vector<256x128xf32> -> vector<256x128xf32>
    %21 = arith.addf %15, %20 : vector<256x128xf32>
    %c0_21 = arith.constant 0 : index
    %c1_22 = arith.constant 1 : index
    %c0_23 = arith.constant 0 : index
    %22 = vector.load %arg9[%c0_21, %c1_22, %c0_23] : memref<18x18x128xf32, #tpu.memory_space<vmem>>, vector<16x16x128xf32>
    %23 = vector.shape_cast %22 : vector<16x16x128xf32> to vector<256x128xf32>
    %c1_24 = arith.constant 1 : index
    %c0_25 = arith.constant 0 : index
    %c0_26 = arith.constant 0 : index
    %24 = vector.load %arg4[%c1_24, %c0_25, %c0_26] : memref<9x128x128xf32, #tpu.memory_space<vmem>>, vector<1x128x128xf32>
    %25 = vector.shape_cast %24 : vector<1x128x128xf32> to vector<128x128xf32>
    %cst_27 = arith.constant dense<0.000000e+00> : vector<256x128xf32>
    %26 = tpu.matmul %23, %25, %cst_27 {dimension_numbers = #tpu.dot_dimension_numbers<[1], [0], [0], [1], [0, 0, 1, 1], [], []>} : vector<256x128xf32>, vector<128x128xf32>, vector<256x128xf32> -> vector<256x128xf32>
    %27 = arith.addf %21, %26 : vector<256x128xf32>
    %c0_28 = arith.constant 0 : index
    %c2 = arith.constant 2 : index
    %c0_29 = arith.constant 0 : index
    %28 = vector.load %arg9[%c0_28, %c2, %c0_29] : memref<18x18x128xf32, #tpu.memory_space<vmem>>, vector<16x16x128xf32>
    %29 = vector.shape_cast %28 : vector<16x16x128xf32> to vector<256x128xf32>
    %c2_30 = arith.constant 2 : index
    %c0_31 = arith.constant 0 : index
    %c0_32 = arith.constant 0 : index
    %30 = vector.load %arg4[%c2_30, %c0_31, %c0_32] : memref<9x128x128xf32, #tpu.memory_space<vmem>>, vector<1x128x128xf32>
    %31 = vector.shape_cast %30 : vector<1x128x128xf32> to vector<128x128xf32>
    %cst_33 = arith.constant dense<0.000000e+00> : vector<256x128xf32>
    %32 = tpu.matmul %29, %31, %cst_33 {dimension_numbers = #tpu.dot_dimension_numbers<[1], [0], [0], [1], [0, 0, 1, 1], [], []>} : vector<256x128xf32>, vector<128x128xf32>, vector<256x128xf32> -> vector<256x128xf32>
    %33 = arith.addf %27, %32 : vector<256x128xf32>
    %c1_34 = arith.constant 1 : index
    %c0_35 = arith.constant 0 : index
    %c0_36 = arith.constant 0 : index
    %34 = vector.load %arg9[%c1_34, %c0_35, %c0_36] : memref<18x18x128xf32, #tpu.memory_space<vmem>>, vector<16x16x128xf32>
    %35 = vector.shape_cast %34 : vector<16x16x128xf32> to vector<256x128xf32>
    %c3 = arith.constant 3 : index
    %c0_37 = arith.constant 0 : index
    %c0_38 = arith.constant 0 : index
    %36 = vector.load %arg4[%c3, %c0_37, %c0_38] : memref<9x128x128xf32, #tpu.memory_space<vmem>>, vector<1x128x128xf32>
    %37 = vector.shape_cast %36 : vector<1x128x128xf32> to vector<128x128xf32>
    %cst_39 = arith.constant dense<0.000000e+00> : vector<256x128xf32>
    %38 = tpu.matmul %35, %37, %cst_39 {dimension_numbers = #tpu.dot_dimension_numbers<[1], [0], [0], [1], [0, 0, 1, 1], [], []>} : vector<256x128xf32>, vector<128x128xf32>, vector<256x128xf32> -> vector<256x128xf32>
    %39 = arith.addf %33, %38 : vector<256x128xf32>
    %c1_40 = arith.constant 1 : index
    %c1_41 = arith.constant 1 : index
    %c0_42 = arith.constant 0 : index
    %40 = vector.load %arg9[%c1_40, %c1_41, %c0_42] : memref<18x18x128xf32, #tpu.memory_space<vmem>>, vector<16x16x128xf32>
    %41 = vector.shape_cast %40 : vector<16x16x128xf32> to vector<256x128xf32>
    %c4 = arith.constant 4 : index
    %c0_43 = arith.constant 0 : index
    %c0_44 = arith.constant 0 : index
    %42 = vector.load %arg4[%c4, %c0_43, %c0_44] : memref<9x128x128xf32, #tpu.memory_space<vmem>>, vector<1x128x128xf32>
    %43 = vector.shape_cast %42 : vector<1x128x128xf32> to vector<128x128xf32>
    %cst_45 = arith.constant dense<0.000000e+00> : vector<256x128xf32>
    %44 = tpu.matmul %41, %43, %cst_45 {dimension_numbers = #tpu.dot_dimension_numbers<[1], [0], [0], [1], [0, 0, 1, 1], [], []>} : vector<256x128xf32>, vector<128x128xf32>, vector<256x128xf32> -> vector<256x128xf32>
    %45 = arith.addf %39, %44 : vector<256x128xf32>
    %c1_46 = arith.constant 1 : index
    %c2_47 = arith.constant 2 : index
    %c0_48 = arith.constant 0 : index
    %46 = vector.load %arg9[%c1_46, %c2_47, %c0_48] : memref<18x18x128xf32, #tpu.memory_space<vmem>>, vector<16x16x128xf32>
    %47 = vector.shape_cast %46 : vector<16x16x128xf32> to vector<256x128xf32>
    %c5 = arith.constant 5 : index
    %c0_49 = arith.constant 0 : index
    %c0_50 = arith.constant 0 : index
    %48 = vector.load %arg4[%c5, %c0_49, %c0_50] : memref<9x128x128xf32, #tpu.memory_space<vmem>>, vector<1x128x128xf32>
    %49 = vector.shape_cast %48 : vector<1x128x128xf32> to vector<128x128xf32>
    %cst_51 = arith.constant dense<0.000000e+00> : vector<256x128xf32>
    %50 = tpu.matmul %47, %49, %cst_51 {dimension_numbers = #tpu.dot_dimension_numbers<[1], [0], [0], [1], [0, 0, 1, 1], [], []>} : vector<256x128xf32>, vector<128x128xf32>, vector<256x128xf32> -> vector<256x128xf32>
    %51 = arith.addf %45, %50 : vector<256x128xf32>
    %c2_52 = arith.constant 2 : index
    %c0_53 = arith.constant 0 : index
    %c0_54 = arith.constant 0 : index
    %52 = vector.load %arg9[%c2_52, %c0_53, %c0_54] : memref<18x18x128xf32, #tpu.memory_space<vmem>>, vector<16x16x128xf32>
    %53 = vector.shape_cast %52 : vector<16x16x128xf32> to vector<256x128xf32>
    %c6 = arith.constant 6 : index
    %c0_55 = arith.constant 0 : index
    %c0_56 = arith.constant 0 : index
    %54 = vector.load %arg4[%c6, %c0_55, %c0_56] : memref<9x128x128xf32, #tpu.memory_space<vmem>>, vector<1x128x128xf32>
    %55 = vector.shape_cast %54 : vector<1x128x128xf32> to vector<128x128xf32>
    %cst_57 = arith.constant dense<0.000000e+00> : vector<256x128xf32>
    %56 = tpu.matmul %53, %55, %cst_57 {dimension_numbers = #tpu.dot_dimension_numbers<[1], [0], [0], [1], [0, 0, 1, 1], [], []>} : vector<256x128xf32>, vector<128x128xf32>, vector<256x128xf32> -> vector<256x128xf32>
    %57 = arith.addf %51, %56 : vector<256x128xf32>
    %c2_58 = arith.constant 2 : index
    %c1_59 = arith.constant 1 : index
    %c0_60 = arith.constant 0 : index
    %58 = vector.load %arg9[%c2_58, %c1_59, %c0_60] : memref<18x18x128xf32, #tpu.memory_space<vmem>>, vector<16x16x128xf32>
    %59 = vector.shape_cast %58 : vector<16x16x128xf32> to vector<256x128xf32>
    %c7 = arith.constant 7 : index
    %c0_61 = arith.constant 0 : index
    %c0_62 = arith.constant 0 : index
    %60 = vector.load %arg4[%c7, %c0_61, %c0_62] : memref<9x128x128xf32, #tpu.memory_space<vmem>>, vector<1x128x128xf32>
    %61 = vector.shape_cast %60 : vector<1x128x128xf32> to vector<128x128xf32>
    %cst_63 = arith.constant dense<0.000000e+00> : vector<256x128xf32>
    %62 = tpu.matmul %59, %61, %cst_63 {dimension_numbers = #tpu.dot_dimension_numbers<[1], [0], [0], [1], [0, 0, 1, 1], [], []>} : vector<256x128xf32>, vector<128x128xf32>, vector<256x128xf32> -> vector<256x128xf32>
    %63 = arith.addf %57, %62 : vector<256x128xf32>
    %c2_64 = arith.constant 2 : index
    %c2_65 = arith.constant 2 : index
    %c0_66 = arith.constant 0 : index
    %64 = vector.load %arg9[%c2_64, %c2_65, %c0_66] : memref<18x18x128xf32, #tpu.memory_space<vmem>>, vector<16x16x128xf32>
    %65 = vector.shape_cast %64 : vector<16x16x128xf32> to vector<256x128xf32>
    %c8 = arith.constant 8 : index
    %c0_67 = arith.constant 0 : index
    %c0_68 = arith.constant 0 : index
    %66 = vector.load %arg4[%c8, %c0_67, %c0_68] : memref<9x128x128xf32, #tpu.memory_space<vmem>>, vector<1x128x128xf32>
    %67 = vector.shape_cast %66 : vector<1x128x128xf32> to vector<128x128xf32>
    %cst_69 = arith.constant dense<0.000000e+00> : vector<256x128xf32>
    %68 = tpu.matmul %65, %67, %cst_69 {dimension_numbers = #tpu.dot_dimension_numbers<[1], [0], [0], [1], [0, 0, 1, 1], [], []>} : vector<256x128xf32>, vector<128x128xf32>, vector<256x128xf32> -> vector<256x128xf32>
    %69 = arith.addf %63, %68 : vector<256x128xf32>
    %c0_70 = arith.constant 0 : index
    %c0_71 = arith.constant 0 : index
    %70 = vector.load %arg5[%c0_70, %c0_71] : memref<1x128xf32, #tpu.memory_space<vmem>>, vector<1x128xf32>
    %71 = vector.broadcast %70 : vector<1x128xf32> to vector<256x128xf32>
    %72 = arith.addf %69, %71 : vector<256x128xf32>
    %73 = vector.shape_cast %72 : vector<256x128xf32> to vector<1x16x16x128xf32>
    %c0_72 = arith.constant 0 : index
    %c0_73 = arith.constant 0 : index
    %c0_74 = arith.constant 0 : index
    %c0_75 = arith.constant 0 : index
    %74 = vector.load %arg6[%c0_72, %c0_73, %c0_74, %c0_75] : memref<1x16x16x128xf32, #tpu.memory_space<vmem>>, vector<1x16x16x128xf32>
    tpu.vector_store %arg6[%c0_72, %c0_73, %c0_74, %c0_75], %73 {strides = array<i32>} : memref<1x16x16x128xf32, #tpu.memory_space<vmem>>, vector<1x16x16x128xf32>,
    %c0_i32 = arith.constant 0 : i32
    %75 = arith.cmpi eq, %arg0, %c0_i32 : i32
    %76 = arith.extui %75 : i1 to i32
    %c0_i32_76 = arith.constant 0 : i32
    %77 = arith.cmpi ne, %76, %c0_i32_76 : i32
    scf.if %77 {
      %cst_87 = arith.constant 0.000000e+00 : f32
      %89 = vector.broadcast %cst_87 : f32 to vector<1x128xf32>
      %c0_88 = arith.constant 0 : index
      %c0_89 = arith.constant 0 : index
      %90 = vector.load %arg7[%c0_88, %c0_89] : memref<1x128xf32, #tpu.memory_space<vmem>>, vector<1x128xf32>
      tpu.vector_store %arg7[%c0_88, %c0_89], %89 {strides = array<i32>} : memref<1x128xf32, #tpu.memory_space<vmem>>, vector<1x128xf32>,
      %cst_90 = arith.constant 0.000000e+00 : f32
      %91 = vector.broadcast %cst_90 : f32 to vector<1x128xf32>
      %c0_91 = arith.constant 0 : index
      %c0_92 = arith.constant 0 : index
      %92 = vector.load %arg8[%c0_91, %c0_92] : memref<1x128xf32, #tpu.memory_space<vmem>>, vector<1x128xf32>
      tpu.vector_store %arg8[%c0_91, %c0_92], %91 {strides = array<i32>} : memref<1x128xf32, #tpu.memory_space<vmem>>, vector<1x128xf32>,
    } else {
    }
    %c0_77 = arith.constant 0 : index
    %c0_78 = arith.constant 0 : index
    %78 = vector.load %arg7[%c0_77, %c0_78] : memref<1x128xf32, #tpu.memory_space<vmem>>, vector<1x128xf32>
    %cst_79 = arith.constant dense<0.000000e+00> : vector<128xf32>
    %79 = vector.multi_reduction <add>, %72, %cst_79 [0] : vector<256x128xf32> to vector<128xf32>
    %80 = vector.shape_cast %79 : vector<128xf32> to vector<1x128xf32>
    %81 = arith.addf %78, %80 : vector<1x128xf32>
    %c0_80 = arith.constant 0 : index
    %c0_81 = arith.constant 0 : index
    %82 = vector.load %arg7[%c0_80, %c0_81] : memref<1x128xf32, #tpu.memory_space<vmem>>, vector<1x128xf32>
    tpu.vector_store %arg7[%c0_80, %c0_81], %81 {strides = array<i32>} : memref<1x128xf32, #tpu.memory_space<vmem>>, vector<1x128xf32>,
    %c0_82 = arith.constant 0 : index
    %c0_83 = arith.constant 0 : index
    %83 = vector.load %arg8[%c0_82, %c0_83] : memref<1x128xf32, #tpu.memory_space<vmem>>, vector<1x128xf32>
    %84 = arith.mulf %72, %72 : vector<256x128xf32>
    %cst_84 = arith.constant dense<0.000000e+00> : vector<128xf32>
    %85 = vector.multi_reduction <add>, %84, %cst_84 [0] : vector<256x128xf32> to vector<128xf32>
    %86 = vector.shape_cast %85 : vector<128xf32> to vector<1x128xf32>
    %87 = arith.addf %83, %86 : vector<1x128xf32>
    %c0_85 = arith.constant 0 : index
    %c0_86 = arith.constant 0 : index
    %88 = vector.load %arg8[%c0_85, %c0_86] : memref<1x128xf32, #tpu.memory_space<vmem>>, vector<1x128xf32>
    tpu.vector_store %arg8[%c0_85, %c0_86], %87 {strides = array<i32>} : memref<1x128xf32, #tpu.memory_space<vmem>>, vector<1x128xf32>,
    return
  }
  func.func @transform_0(%arg0: i32) -> (i32, i32, i32, i32) {
    %c0_i32 = arith.constant 0 : i32
    %c0_i32_0 = arith.constant 0 : i32
    %c0_i32_1 = arith.constant 0 : i32
    %c0_i32_2 = arith.constant 0 : i32
    return %arg0, %c0_i32, %c0_i32_0, %c0_i32_1 : i32, i32, i32, i32
  }
  func.func @transform_1(%arg0: i32) -> (i32, i32) {
    %c0_i32 = arith.constant 0 : i32
    %c0_i32_0 = arith.constant 0 : i32
    %c0_i32_1 = arith.constant 0 : i32
    return %c0_i32, %c0_i32_0 : i32, i32
  }
  func.func @transform_2(%arg0: i32) -> (i32, i32) {
    %c0_i32 = arith.constant 0 : i32
    %c0_i32_0 = arith.constant 0 : i32
    %c0_i32_1 = arith.constant 0 : i32
    return %c0_i32, %c0_i32_0 : i32, i32
  }
  func.func @transform_3(%arg0: i32) -> (i32, i32, i32) {
    %c0_i32 = arith.constant 0 : i32
    %c0_i32_0 = arith.constant 0 : i32
    %c0_i32_1 = arith.constant 0 : i32
    %c0_i32_2 = arith.constant 0 : i32
    return %c0_i32, %c0_i32_0, %c0_i32_1 : i32, i32, i32
  }
  func.func @transform_4(%arg0: i32) -> (i32, i32) {
    %c0_i32 = arith.constant 0 : i32
    %c0_i32_0 = arith.constant 0 : i32
    %c0_i32_1 = arith.constant 0 : i32
    return %c0_i32, %c0_i32_0 : i32, i32
  }
  func.func @transform_5(%arg0: i32) -> (i32, i32, i32, i32) {
    %c0_i32 = arith.constant 0 : i32
    %c0_i32_0 = arith.constant 0 : i32
    %c0_i32_1 = arith.constant 0 : i32
    %c0_i32_2 = arith.constant 0 : i32
    return %arg0, %c0_i32, %c0_i32_0, %c0_i32_1 : i32, i32, i32, i32
  }
  func.func @transform_6(%arg0: i32) -> (i32, i32) {
    %c0_i32 = arith.constant 0 : i32
    %c0_i32_0 = arith.constant 0 : i32
    %c0_i32_1 = arith.constant 0 : i32
    return %c0_i32, %c0_i32_0 : i32, i32
  }
  func.func @transform_7(%arg0: i32) -> (i32, i32) {
    %c0_i32 = arith.constant 0 : i32
    %c0_i32_0 = arith.constant 0 : i32
    %c0_i32_1 = arith.constant 0 : i32
    return %c0_i32, %c0_i32_0 : i32, i32
  }
}

</mosaic_0001>

<bundles_post_ra>
// kernel: resnet_forward.5
= control target key start
LH: loop header
LB: loop body
LE: loop exit
PB: predicated region body
PF: predicated region fallthrough
CT: control target
= control target key end

     0   :  { %s582_s15 = smov 0   ;;  %s783_s0 = inlined_call_operand.vmem [shape: f32[2,16,16,128], index: 0, kind: input, shape index: {}]   ;;  %s784_s1 = inlined_call_operand.vmem [shape: f32[2,16,16,128], index: 1, kind: input, shape index: {}]   ;;  %s785_s2 = inlined_call_operand.vmem [shape: f32[1,128], index: 2, kind: input, shape index: {}]   ;;  %s786_s3 = inlined_call_operand.vmem [shape: f32[1,128], index: 3, kind: input, shape index: {}]   ;;  %s787_s4 = inlined_call_operand.vmem [shape: f32[2,16,16,128], index: 4, kind: output, shape index: {}]  }
   0x1 LB: > { %s523_s16 = sadd.s32 4294967295, %s555_s15   ;;  %p527_p0 = scmp.ge.s32.totalorder %s555_s15, 1  ;;  %s555_s15 = sphi %s582_s15, %s14_s15  }
   0x2   : > { %p172_p1 = scmp.lt.s32.totalorder %s555_s15, 3 }
   0x4   : > { %p173_p2 = pnand %p527_p0, %p172_p1 }
   0x5   : > { %p203_p3 = scmp.lt.s32.totalorder (!%p173_p2), %s523_s16, 1  ;;  %v595_v0 = vld [vmem:[%s785_s2] ss:$0 sm:$0xff] (!%p173_p2) }
   0x6   : > { %176 = sbr.rel (%p173_p2) target bundleno = 55 (0x37), region = 36  ;;  %v613_v2 = vld [vmem:[%s786_s3] ss:$0 sm:$0xff] (!%p173_p2) }
   0xd   : > { %s789_s16 = smov (!%p203_p3, %s523_s16), 1 }
   0xe   : > { %s590_s17 = sshll.u32 %s789_s16, 8 }
   0xf   : > { %s601_s22 = scalar_lea.vmem %s783_s0, %s590_s17  ;;  %s607_s25 = scalar_lea.vmem %s784_s1, %s590_s17 }
  0x10   : > { %v218_v1 = vld [vmem:[%s601_s22] sm:$0xff]  ;;  %v219_v3 = vld [vmem:[%s601_s22 + $0x8] sm:$0xff]  ;;  %v220_v7 = vld [vmem:[%s601_s22 + $0x10] sm:$0xff]  ;;  %s643_s30 = scalar_lea.vmem %s787_s4, %s590_s17 }
  0x11   : > { %v250_v4 = vld [vmem:[%s607_s25] sm:$0xff]  ;;  %v289_v5 = vmul.f32 %v595_v0, %v218_v1  ;;  %v290_v6 = vmul.f32 %v595_v0, %v219_v3  ;;  %v251_v8 = vld [vmem:[%s607_s25 + $0x8] sm:$0xff]  ;;  %v291_v9 = vmul.f32 %v595_v0, %v220_v7  ;;  %v221_v10 = vld [vmem:[%s601_s22 + $0x18] sm:$0xff] }
  0x12   : > { %v222_v11 = vld [vmem:[%s601_s22 + $0x20] sm:$0xff]  ;;  %v252_v14 = vld [vmem:[%s607_s25 + $0x10] sm:$0xff]  ;;  %v253_v15 = vld [vmem:[%s607_s25 + $0x18] sm:$0xff]  ;;  %v292_v16 = vmul.f32 %v595_v0, %v221_v10 }
  0x13   : > { %v328_v12 = vadd.f32 %v613_v2, %v289_v5  ;;  %v329_v13 = vadd.f32 %v613_v2, %v290_v6  ;;  %v293_v17 = vmul.f32 %v595_v0, %v222_v11  ;;  %v223_v18 = vld [vmem:[%s601_s22 + $0x28] sm:$0xff]  ;;  %v330_v19 = vadd.f32 %v613_v2, %v291_v9  ;;  %v254_v20 = vld [vmem:[%s607_s25 + $0x20] sm:$0xff]  ;;  %v224_v22 = vld [vmem:[%s601_s22 + $0x30] sm:$0xff] }
  0x14   : > { %v294_v21 = vmul.f32 %v595_v0, %v223_v18  ;;  %v225_v23 = vld [vmem:[%s601_s22 + $0x38] sm:$0xff]  ;;  %v331_v26 = vadd.f32 %v613_v2, %v292_v16  ;;  %v255_v28 = vld [vmem:[%s607_s25 + $0x28] sm:$0xff]  ;;  %v295_v31 = vmul.f32 %v595_v0, %v224_v22  ;;  %v226_v33 = vld [vmem:[%s601_s22 + $0x40] sm:$0xff] }
  0x15   : > { %v360_v24 = vadd.f32 %v328_v12, %v250_v4  ;;  %v361_v25 = vadd.f32 %v329_v13, %v251_v8  ;;  %v332_v27 = vadd.f32 %v613_v2, %v293_v17  ;;  %v362_v29 = vadd.f32 %v330_v19, %v252_v14  ;;  %v227_v34 = vld [vmem:[%s601_s22 + $0x48] sm:$0xff]  ;;  %v256_v39 = vld [vmem:[%s607_s25 + $0x30] sm:$0xff]  ;;  %v257_v40 = vld [vmem:[%s607_s25 + $0x38] sm:$0xff] }
  0x16   : > { %v333_v30 = vadd.f32 %v613_v2, %v294_v21  ;;  %v296_v32 = vmul.f32 %v595_v0, %v225_v23  ;;  %v363_v37 = vadd.f32 %v331_v26, %v253_v15  ;;  %v228_v41 = vld [vmem:[%s601_s22 + $0x50] sm:$0xff]  ;;  %v334_v44 = vadd.f32 %v613_v2, %v295_v31  ;;  %v229_v46 = vld [vmem:[%s601_s22 + $0x58] sm:$0xff]  ;;  %v230_v47 = vld [vmem:[%s601_s22 + $0x60] sm:$0xff] }
  0x17   : > { %v392_v35 = vmax.f32 %v360_v24, 0.0  ;;  %v393_v36 = vmax.f32 %v361_v25, 0.0  ;;  %v364_v38 = vadd.f32 %v332_v27, %v254_v20  ;;  %v394_v42 = vmax.f32 %v362_v29, 0.0  ;;  %v231_v52 = vld [vmem:[%s601_s22 + $0x68] sm:$0xff]  ;;  %v258_v56 = vld [vmem:[%s607_s25 + $0x40] sm:$0xff]  ;;  %v260_v61 = vld [vmem:[%s607_s25 + $0x50] sm:$0xff] }
  0x18   : > { %v365_v43 = vadd.f32 %v333_v30, %v255_v28  ;;  %v335_v45 = vadd.f32 %v613_v2, %v296_v32  ;;  %v395_v48 = vmax.f32 %v363_v37, 0.0  ;;  %v297_v50 = vmul.f32 %v595_v0, %v226_v33  ;;  %v259_v57 = vld [vmem:[%s607_s25 + $0x48] sm:$0xff]  ;;  %v232_v1 = vld [vmem:[%s601_s22 + $0x70] sm:$0xff]  ;;  %v233_v3 = vld [vmem:[%s601_s22 + $0x78] sm:$0xff] }
  0x19   : > { %424 = vst [vmem:[%s643_s30] sm:$0xff] %v392_v35  ;;  %425 = vst [vmem:[%s643_s30 + $0x8] sm:$0xff] %v393_v36  ;;  %v396_v49 = vmax.f32 %v364_v38, 0.0  ;;  %v298_v51 = vmul.f32 %v595_v0, %v227_v34  ;;  %v366_v54 = vadd.f32 %v334_v44, %v256_v39  ;;  %v299_v58 = vmul.f32 %v595_v0, %v228_v41  ;;  %v261_v7 = vld [vmem:[%s607_s25 + $0x58] sm:$0xff]  ;;  %v262_v8 = vld [vmem:[%s607_s25 + $0x60] sm:$0xff] }
  0x1a   : > { %426 = vst [vmem:[%s643_s30 + $0x10] sm:$0xff] %v394_v42  ;;  %v397_v53 = vmax.f32 %v365_v43, 0.0  ;;  %v367_v55 = vadd.f32 %v335_v45, %v257_v40  ;;  %427 = vst [vmem:[%s643_s30 + $0x18] sm:$0xff] %v395_v48  ;;  %v336_v59 = vadd.f32 %v613_v2, %v297_v50  ;;  %v300_v62 = vmul.f32 %v595_v0, %v229_v46  ;;  %v263_v14 = vld [vmem:[%s607_s25 + $0x68] sm:$0xff]  ;;  %v234_v19 = vld [vmem:[%s601_s22 + $0x80] sm:$0xff] }
  0x1b   : > { %428 = vst [vmem:[%s643_s30 + $0x20] sm:$0xff] %v396_v49  ;;  %v337_v60 = vadd.f32 %v613_v2, %v298_v51  ;;  %v301_v63 = vmul.f32 %v595_v0, %v230_v47  ;;  %v398_v4 = vmax.f32 %v366_v54, 0.0  ;;  %v338_v6 = vadd.f32 %v613_v2, %v299_v58  ;;  %v235_v20 = vld [vmem:[%s601_s22 + $0x88] sm:$0xff]  ;;  %v264_v25 = vld [vmem:[%s607_s25 + $0x70] sm:$0xff]  ;;  %v265_v26 = vld [vmem:[%s607_s25 + $0x78] sm:$0xff] }
  0x1c   : > { %429 = vst [vmem:[%s643_s30 + $0x28] sm:$0xff] %v397_v53  ;;  %v399_v5 = vmax.f32 %v367_v55, 0.0  ;;  %v302_v9 = vmul.f32 %v595_v0, %v231_v52  ;;  %v368_v10 = vadd.f32 %v336_v59, %v258_v56  ;;  %v339_v12 = vadd.f32 %v613_v2, %v300_v62  ;;  %v236_v27 = vld [vmem:[%s601_s22 + $0x90] sm:$0xff]  ;;  %v237_v32 = vld [vmem:[%s601_s22 + $0x98] sm:$0xff]  ;;  %v238_v33 = vld [vmem:[%s601_s22 + $0xa0] sm:$0xff] }
  0x1d   : > { %v369_v11 = vadd.f32 %v337_v60, %v259_v57  ;;  %v340_v13 = vadd.f32 %v613_v2, %v301_v63  ;;  %430 = vst [vmem:[%s643_s30 + $0x30] sm:$0xff] %v398_v4  ;;  %v370_v15 = vadd.f32 %v338_v6, %v260_v61  ;;  %v303_v17 = vmul.f32 %v595_v0, %v232_v1  ;;  %v239_v38 = vld [vmem:[%s601_s22 + $0xa8] sm:$0xff]  ;;  %v266_v42 = vld [vmem:[%s607_s25 + $0x80] sm:$0xff]  ;;  %v268_v47 = vld [vmem:[%s607_s25 + $0x90] sm:$0xff] }
  0x1e   : > { %431 = vst [vmem:[%s643_s30 + $0x38] sm:$0xff] %v399_v5  ;;  %v341_v16 = vadd.f32 %v613_v2, %v302_v9  ;;  %v304_v18 = vmul.f32 %v595_v0, %v233_v3  ;;  %v400_v21 = vmax.f32 %v368_v10, 0.0  ;;  %v371_v23 = vadd.f32 %v339_v12, %v261_v7  ;;  %v267_v43 = vld [vmem:[%s607_s25 + $0x88] sm:$0xff]  ;;  %v240_v50 = vld [vmem:[%s601_s22 + $0xb0] sm:$0xff]  ;;  %v241_v51 = vld [vmem:[%s601_s22 + $0xb8] sm:$0xff] }
  0x1f   : > { %v401_v22 = vmax.f32 %v369_v11, 0.0  ;;  %v372_v24 = vadd.f32 %v340_v13, %v262_v8  ;;  %v402_v28 = vmax.f32 %v370_v15, 0.0  ;;  %v342_v30 = vadd.f32 %v613_v2, %v303_v17  ;;  %v269_v55 = vld [vmem:[%s607_s25 + $0x98] sm:$0xff]  ;;  %v270_v56 = vld [vmem:[%s607_s25 + $0xa0] sm:$0xff]  ;;  %v271_v62 = vld [vmem:[%s607_s25 + $0xa8] sm:$0xff] }
  0x20   : > { %v373_v29 = vadd.f32 %v341_v16, %v263_v14  ;;  %v343_v31 = vadd.f32 %v613_v2, %v304_v18  ;;  %432 = vst [vmem:[%s643_s30 + $0x40] sm:$0xff] %v400_v21  ;;  %v403_v34 = vmax.f32 %v371_v23, 0.0  ;;  %v305_v36 = vmul.f32 %v595_v0, %v234_v19  ;;  %v242_v5 = vld [vmem:[%s601_s22 + $0xc0] sm:$0xff]  ;;  %v243_v6 = vld [vmem:[%s601_s22 + $0xc8] sm:$0xff]  ;;  %v272_v11 = vld [vmem:[%s607_s25 + $0xb0] sm:$0xff] }
  0x21   : > { %433 = vst [vmem:[%s643_s30 + $0x48] sm:$0xff] %v401_v22  ;;  %v404_v35 = vmax.f32 %v372_v24, 0.0  ;;  %v306_v37 = vmul.f32 %v595_v0, %v235_v20  ;;  %434 = vst [vmem:[%s643_s30 + $0x50] sm:$0xff] %v402_v28  ;;  %v374_v40 = vadd.f32 %v342_v30, %v264_v25  ;;  %v307_v44 = vmul.f32 %v595_v0, %v236_v27  ;;  %v273_v12 = vld [vmem:[%s607_s25 + $0xb8] sm:$0xff]  ;;  %v244_v13 = vld [vmem:[%s601_s22 + $0xd0] sm:$0xff] }
  0x22   : > { %v405_v39 = vmax.f32 %v373_v29, 0.0  ;;  %v375_v41 = vadd.f32 %v343_v31, %v265_v26  ;;  %435 = vst [vmem:[%s643_s30 + $0x58] sm:$0xff] %v403_v34  ;;  %v344_v45 = vadd.f32 %v613_v2, %v305_v36  ;;  %v308_v48 = vmul.f32 %v595_v0, %v237_v32  ;;  %v245_v18 = vld [vmem:[%s601_s22 + $0xd8] sm:$0xff]  ;;  %v246_v19 = vld [vmem:[%s601_s22 + $0xe0] sm:$0xff]  ;;  %v247_v24 = vld [vmem:[%s601_s22 + $0xe8] sm:$0xff] }
  0x23   : > { %436 = vst [vmem:[%s643_s30 + $0x60] sm:$0xff] %v404_v35  ;;  %v345_v46 = vadd.f32 %v613_v2, %v306_v37  ;;  %v309_v49 = vmul.f32 %v595_v0, %v238_v33  ;;  %v406_v52 = vmax.f32 %v374_v40, 0.0  ;;  %v346_v54 = vadd.f32 %v613_v2, %v307_v44  ;;  %v274_v28 = vld [vmem:[%s607_s25 + $0xc0] sm:$0xff]  ;;  %v275_v29 = vld [vmem:[%s607_s25 + $0xc8] sm:$0xff]  ;;  %v276_v33 = vld [vmem:[%s607_s25 + $0xd0] sm:$0xff] }
  0x24   : > { %437 = vst [vmem:[%s643_s30 + $0x68] sm:$0xff] %v405_v39  ;;  %v407_v53 = vmax.f32 %v375_v41, 0.0  ;;  %v310_v57 = vmul.f32 %v595_v0, %v239_v38  ;;  %v376_v58 = vadd.f32 %v344_v45, %v266_v42  ;;  %v347_v60 = vadd.f32 %v613_v2, %v308_v48  ;;  %v248_v36 = vld [vmem:[%s601_s22 + $0xf0] sm:$0xff]  ;;  %v249_v37 = vld [vmem:[%s601_s22 + $0xf8] sm:$0xff]  ;;  %v278_v42 = vld [vmem:[%s607_s25 + $0xe0] sm:$0xff] }
  0x25   : > { %v377_v59 = vadd.f32 %v345_v46, %v267_v43  ;;  %v348_v61 = vadd.f32 %v613_v2, %v309_v49  ;;  %438 = vst [vmem:[%s643_s30 + $0x70] sm:$0xff] %v406_v52  ;;  %v378_v63 = vadd.f32 %v346_v54, %v268_v47  ;;  %v311_v3 = vmul.f32 %v595_v0, %v240_v50  ;;  %v277_v41 = vld [vmem:[%s607_s25 + $0xd8] sm:$0xff]  ;;  %v279_v48 = vld [vmem:[%s607_s25 + $0xe8] sm:$0xff] }
  0x26   : > { %439 = vst [vmem:[%s643_s30 + $0x78] sm:$0xff] %v407_v53  ;;  %v349_v1 = vadd.f32 %v613_v2, %v310_v57  ;;  %v312_v4 = vmul.f32 %v595_v0, %v241_v51  ;;  %v408_v7 = vmax.f32 %v376_v58, 0.0  ;;  %v379_v9 = vadd.f32 %v347_v60, %v269_v55  ;;  %v280_v57 = vld [vmem:[%s607_s25 + $0xf0] sm:$0xff]  ;;  %v281_v58 = vld [vmem:[%s607_s25 + $0xf8] sm:$0xff] }
  0x27   : > { %v409_v8 = vmax.f32 %v377_v59, 0.0  ;;  %v380_v10 = vadd.f32 %v348_v61, %v270_v56  ;;  %v410_v14 = vmax.f32 %v378_v63, 0.0  ;;  %v350_v16 = vadd.f32 %v613_v2, %v311_v3 }
  0x28   : > { %v381_v15 = vadd.f32 %v349_v1, %v271_v62  ;;  %v351_v17 = vadd.f32 %v613_v2, %v312_v4  ;;  %440 = vst [vmem:[%s643_s30 + $0x80] sm:$0xff] %v408_v7  ;;  %v411_v20 = vmax.f32 %v379_v9, 0.0  ;;  %v313_v22 = vmul.f32 %v595_v0, %v242_v5 }
  0x29   : > { %441 = vst [vmem:[%s643_s30 + $0x88] sm:$0xff] %v409_v8  ;;  %v412_v21 = vmax.f32 %v380_v10, 0.0  ;;  %v314_v23 = vmul.f32 %v595_v0, %v243_v6  ;;  %442 = vst [vmem:[%s643_s30 + $0x90] sm:$0xff] %v410_v14  ;;  %v382_v26 = vadd.f32 %v350_v16, %v272_v11  ;;  %v315_v30 = vmul.f32 %v595_v0, %v244_v13 }
  0x2a   : > { %v413_v25 = vmax.f32 %v381_v15, 0.0  ;;  %v383_v27 = vadd.f32 %v351_v17, %v273_v12  ;;  %443 = vst [vmem:[%s643_s30 + $0x98] sm:$0xff] %v411_v20  ;;  %v352_v31 = vadd.f32 %v613_v2, %v313_v22  ;;  %v316_v34 = vmul.f32 %v595_v0, %v245_v18 }
  0x2b   : > { %444 = vst [vmem:[%s643_s30 + $0xa0] sm:$0xff] %v412_v21  ;;  %v353_v32 = vadd.f32 %v613_v2, %v314_v23  ;;  %v317_v35 = vmul.f32 %v595_v0, %v246_v19  ;;  %v414_v38 = vmax.f32 %v382_v26, 0.0  ;;  %v354_v40 = vadd.f32 %v613_v2, %v315_v30 }
  0x2c   : > { %445 = vst [vmem:[%s643_s30 + $0xa8] sm:$0xff] %v413_v25  ;;  %v415_v39 = vmax.f32 %v383_v27, 0.0  ;;  %v318_v43 = vmul.f32 %v595_v0, %v247_v24  ;;  %v384_v44 = vadd.f32 %v352_v31, %v274_v28  ;;  %v355_v46 = vadd.f32 %v613_v2, %v316_v34 }
  0x2d   : > { %v385_v45 = vadd.f32 %v353_v32, %v275_v29  ;;  %v356_v47 = vadd.f32 %v613_v2, %v317_v35  ;;  %446 = vst [vmem:[%s643_s30 + $0xb0] sm:$0xff] %v414_v38  ;;  %v386_v49 = vadd.f32 %v354_v40, %v276_v33  ;;  %v319_v51 = vmul.f32 %v595_v0, %v248_v36 }
  0x2e   : > { %447 = vst [vmem:[%s643_s30 + $0xb8] sm:$0xff] %v415_v39  ;;  %v357_v50 = vadd.f32 %v613_v2, %v318_v43  ;;  %v320_v52 = vmul.f32 %v595_v0, %v249_v37  ;;  %v416_v53 = vmax.f32 %v384_v44, 0.0  ;;  %v387_v55 = vadd.f32 %v355_v46, %v277_v41 }
  0x2f   : > { %v417_v54 = vmax.f32 %v385_v45, 0.0  ;;  %v388_v56 = vadd.f32 %v356_v47, %v278_v42  ;;  %v418_v59 = vmax.f32 %v386_v49, 0.0  ;;  %v358_v61 = vadd.f32 %v613_v2, %v319_v51 }
  0x30   : > { %v389_v60 = vadd.f32 %v357_v50, %v279_v48  ;;  %v359_v62 = vadd.f32 %v613_v2, %v320_v52  ;;  %448 = vst [vmem:[%s643_s30 + $0xc0] sm:$0xff] %v416_v53  ;;  %v419_v0 = vmax.f32 %v387_v55, 0.0 }
  0x31   : > { %449 = vst [vmem:[%s643_s30 + $0xc8] sm:$0xff] %v417_v54  ;;  %v420_v63 = vmax.f32 %v388_v56, 0.0  ;;  %450 = vst [vmem:[%s643_s30 + $0xd0] sm:$0xff] %v418_v59  ;;  %v390_v3 = vadd.f32 %v358_v61, %v280_v57 }
  0x32   : > { %v421_v1 = vmax.f32 %v389_v60, 0.0  ;;  %v391_v4 = vadd.f32 %v359_v62, %v281_v58  ;;  %451 = vst [vmem:[%s643_s30 + $0xd8] sm:$0xff] %v419_v0 }
  0x33   : > { %452 = vst [vmem:[%s643_s30 + $0xe0] sm:$0xff] %v420_v63  ;;  %v422_v5 = vmax.f32 %v390_v3, 0.0 }
  0x34   : > { %453 = vst [vmem:[%s643_s30 + $0xe8] sm:$0xff] %v421_v1  ;;  %v423_v6 = vmax.f32 %v391_v4, 0.0 }
  0x35   : > { %454 = vst [vmem:[%s643_s30 + $0xf0] sm:$0xff] %v422_v5 }
  0x36   : > { %455 = vst [vmem:[%s643_s30 + $0xf8] sm:$0xff] %v423_v6 }
  0x37 PF: > { %s14_s15 = sadd.s32 1, %s555_s15  }
  0x38   : > { %p11_p4 = scmp.ge.s32.totalorder %s14_s15, 4  }
  0x3a   :  { %13 = sbr.rel (!%p11_p4) target bundleno = 1 (0x1), region = 69 }

// kernel: resnet_forward.3
= control target key start
LH: loop header
LB: loop body
LE: loop exit
PB: predicated region body
PF: predicated region fallthrough
CT: control target
= control target key end

     0   :  { %s5894_s27 = smov 0   ;;  %s7427_s0 = inlined_call_operand.vmem [shape: f32[2,18,18,128], index: 0, kind: input, shape index: {}]   ;;  %s7428_s1 = inlined_call_operand.vmem [shape: f32[9,128,128], index: 1, kind: input, shape index: {}]   ;;  %s7429_s2 = inlined_call_operand.vmem [shape: f32[1,128], index: 2, kind: input, shape index: {}]   ;;  %s7430_s3 = inlined_call_operand.vmem [shape: f32[128,128], index: 3, kind: input, shape index: {}]   ;;  %s7431_s4 = inlined_call_operand.vmem [shape: f32[1,128], index: 4, kind: input, shape index: {}]   ;;  %s7432_s5 = inlined_call_operand.vmem [shape: f32[2,16,16,128], index: 5, kind: output, shape index: {0}]   ;;  %s7433_s6 = inlined_call_operand.vmem [shape: f32[2,16,16,128], index: 6, kind: output, shape index: {1}]   ;;  %s7434_s7 = inlined_call_operand.vmem [shape: f32[1,128], index: 7, kind: output, shape index: {2}]   ;;  %s7435_s8 = inlined_call_operand.vmem [shape: f32[1,128], index: 8, kind: output, shape index: {3}]  }
   0x1 LB: > { %s5900_s28 = sadd.s32 4294967295, %s5846_s27   ;;  %p3609_p0 = scmp.ge.s32.totalorder %s5846_s27, 1  ;;  %s5846_s27 = sphi %s5894_s27, %s19_s27  }
   0x2   : > { %p259_p1 = scmp.lt.s32.totalorder %s5846_s27, 3 }
   0x4   : > { %p260_p2 = pnand %p3609_p0, %p259_p1 }
   0x6   : > { %263 = sbr.rel (%p260_p2) target bundleno = 662 (0x296), region = 40 }
   0xd   : > { %v3615_v0 = vld [vmem:[%s7428_s1 + $0x80] sm:$0xff]  ;;  %v3616_v1 = vld [vmem:[%s7428_s1 + $0x88] sm:$0xff]  ;;  %p298_p3 = scmp.lt.s32.totalorder %s5900_s28, 1  ;;  %v3617_v5 = vld [vmem:[%s7428_s1 + $0x90] sm:$0xff]  ;;  %p3969_p4 = scmp.ne.s32.totalorder %s5900_s28, 0 }
   0xe   : > { %v3727_v2 = vld [vmem:[%s7428_s1 + $0x200] sm:$0xff]  ;;  %v5254_v3 = vpack.c.bf16 %v3616_v1, %v3615_v0  ;;  %v3728_v4 = vld [vmem:[%s7428_s1 + $0x208] sm:$0xff]  ;;  %v3618_v6 = vld [vmem:[%s7428_s1 + $0x98] sm:$0xff] }
   0xf   : > { %v5382_v7 = vpack.c.bf16 %v3728_v4, %v3727_v2  ;;  %v5258_v8 = vpack.c.bf16 %v3618_v6, %v3617_v5  ;;  %v3729_v9 = vld [vmem:[%s7428_s1 + $0x210] sm:$0xff]  ;;  %v3730_v10 = vld [vmem:[%s7428_s1 + $0x218] sm:$0xff]  ;;  %v3619_v11 = vld [vmem:[%s7428_s1 + $0xa0] sm:$0xff]  ;;  %s5933_s25 = scalar_select %p298_p3, %s5900_s28, 1 }
  0x10   : > { %5255 = vmatprep.subr.bf16.mxu1 %v5254_v3  ;;  %v5386_v12 = vpack.c.bf16 %v3730_v10, %v3729_v9  ;;  %v3620_v13 = vld [vmem:[%s7428_s1 + $0xa8] sm:$0xff]  ;;  %v3731_v14 = vld [vmem:[%s7428_s1 + $0x220] sm:$0xff]  ;;  %v3621_v18 = vld [vmem:[%s7428_s1 + $0xb0] sm:$0xff] }
  0x11   : > { %v3732_v15 = vld [vmem:[%s7428_s1 + $0x228] sm:$0xff]  ;;  %5383 = vmatprep.subr.bf16.mxu0 %v5382_v7  ;;  %5257 = vmatpush3.bf16.msra.mxu1 %v5254_v3  ;;  %s5830_s12 = smul.u32 432, %s5933_s25  ;;  %v5262_v16 = vpack.c.bf16 %v3620_v13, %v3619_v11  ;;  %v3622_v19 = vld [vmem:[%s7428_s1 + $0xb8] sm:$0xff]  ;;  %v3733_v20 = vld [vmem:[%s7428_s1 + $0x230] sm:$0xff] }
  0x12   : > { %5385 = vmatpush3.bf16.msra.mxu0 %v5382_v7  ;;  %5259 = vmatprep.subr.bf16.mxu1 %v5258_v8  ;;  %v5390_v17 = vpack.c.bf16 %v3732_v15, %v3731_v14  ;;  %v3734_v21 = vld [vmem:[%s7428_s1 + $0x238] sm:$0xff]  ;;  %v5266_v22 = vpack.c.bf16 %v3622_v19, %v3621_v18  ;;  %v3623_v24 = vld [vmem:[%s7428_s1 + $0xc0] sm:$0xff]  ;;  %v3624_v25 = vld [vmem:[%s7428_s1 + $0xc8] sm:$0xff] }
  0x13   : > { %5387 = vmatprep.subr.bf16.mxu0 %v5386_v12  ;;  %s5960_s23 = scalar_lea.vmem %s7427_s0, %s5830_s12  ;;  %v5394_v23 = vpack.c.bf16 %v3734_v21, %v3733_v20  ;;  %v3735_v27 = vld [vmem:[%s7428_s1 + $0x240] sm:$0xff]  ;;  %v3736_v28 = vld [vmem:[%s7428_s1 + $0x248] sm:$0xff]  ;;  %v5270_v30 = vpack.c.bf16 %v3624_v25, %v3623_v24  ;;  %v3625_v32 = vld [vmem:[%s7428_s1 + $0xd0] sm:$0xff] }
  0x14   : > { %v361_v26 = vld [vmem:[%s5960_s23 + $0x1] sm:$0xff]  ;;  %v5976_v29 = vld [vmem:[%s5960_s23 + $0x19] sm:$0xff]  ;;  %v5398_v31 = vpack.c.bf16 %v3736_v28, %v3735_v27  ;;  %v3737_v34 = vld [vmem:[%s7428_s1 + $0x250] sm:$0xff] }
  0x15   : > { %5261 = vmatpush3.bf16.msra.mxu1 %v5258_v8  ;;  %4486 = vmatprep.mubr.f32.mxu1 %v361_v26  ;;  %v3626_v33 = vld [vmem:[%s7428_s1 + $0xd8] sm:$0xff]  ;;  %v3627_v38 = vld [vmem:[%s7428_s1 + $0xe0] sm:$0xff]  ;;  %v3628_v39 = vld [vmem:[%s7428_s1 + $0xe8] sm:$0xff] }
  0x16   : > { %5389 = vmatpush3.bf16.msra.mxu0 %v5386_v12  ;;  %5263 = vmatprep.subr.bf16.mxu1 %v5262_v16  ;;  %v3738_v35 = vld [vmem:[%s7428_s1 + $0x258] sm:$0xff]  ;;  %v5274_v36 = vpack.c.bf16 %v3626_v33, %v3625_v32  ;;  %v3739_v40 = vld [vmem:[%s7428_s1 + $0x260] sm:$0xff]  ;;  %v3740_v41 = vld [vmem:[%s7428_s1 + $0x268] sm:$0xff]  ;;  %v5278_v42 = vpack.c.bf16 %v3628_v39, %v3627_v38 }
  0x17   : > { %5391 = vmatprep.subr.bf16.mxu0 %v5390_v17  ;;  %4806 = vmatprep.mubr.f32.mxu0 %v5976_v29  ;;  %v5402_v37 = vpack.c.bf16 %v3738_v35, %v3737_v34  ;;  %v5406_v43 = vpack.c.bf16 %v3740_v41, %v3739_v40  ;;  %v3629_v44 = vld [vmem:[%s7428_s1 + $0xf0] sm:$0xff]  ;;  %v3630_v45 = vld [vmem:[%s7428_s1 + $0xf8] sm:$0xff]  ;;  %v345_v50 = vld [vmem:[%s7428_s1] sm:$0xff] }
  0x18   : > { %v3741_v46 = vld [vmem:[%s7428_s1 + $0x270] sm:$0xff]  ;;  %v3742_v47 = vld [vmem:[%s7428_s1 + $0x278] sm:$0xff]  ;;  %v5282_v48 = vpack.c.bf16 %v3630_v45, %v3629_v44  ;;  %v346_v51 = vld [vmem:[%s7428_s1 + $0x8] sm:$0xff] }
  0x19   : > { %5265 = vmatpush3.bf16.msra.mxu1 %v5262_v16  ;;  %v5410_v49 = vpack.c.bf16 %v3742_v47, %v3741_v46  ;;  %v3775_v52 = vld [vmem:[%s7428_s1 + $0x280] sm:$0xff]  ;;  %v3776_v53 = vld [vmem:[%s7428_s1 + $0x288] sm:$0xff]  ;;  %v5286_v54 = vpack.c.bf16 %v346_v51, %v345_v50  ;;  %v3777_v56 = vld [vmem:[%s7428_s1 + $0x290] sm:$0xff] }
  0x1a   : > { %5393 = vmatpush3.bf16.msra.mxu0 %v5390_v17  ;;  %5267 = vmatprep.subr.bf16.mxu1 %v5266_v22  ;;  %v5414_v55 = vpack.c.bf16 %v3776_v53, %v3775_v52  ;;  %v3778_v57 = vld [vmem:[%s7428_s1 + $0x298] sm:$0xff]  ;;  %v362_v58 = vld [vmem:[%s5960_s23 + $0x9] sm:$0xff]  ;;  %v3696_v61 = vld [vmem:[%s5960_s23 + $0x21] sm:$0xff] }
  0x1b   : > { %5395 = vmatprep.subr.bf16.mxu0 %v5394_v23  ;;  %v347_v59 = vld [vmem:[%s7428_s1 + $0x10] sm:$0xff]  ;;  %v348_v60 = vld [vmem:[%s7428_s1 + $0x18] sm:$0xff]  ;;  %v5418_v62 = vpack.c.bf16 %v3778_v57, %v3777_v56  ;;  %v3779_v1 = vld [vmem:[%s7428_s1 + $0x2a0] sm:$0xff] }
  0x1c   : > { %v3697_v63 = vld [vmem:[%s5960_s23 + $0x31] sm:$0xff]  ;;  %v5290_v0 = vpack.c.bf16 %v348_v60, %v347_v59  ;;  %v3780_v2 = vld [vmem:[%s7428_s1 + $0x2a8] sm:$0xff]  ;;  %v349_v3 = vld [vmem:[%s7428_s1 + $0x20] sm:$0xff] }
  0x1d   : > { %5269 = vmatpush3.bf16.msra.mxu1 %v5266_v22  ;;  %v350_v4 = vld [vmem:[%s7428_s1 + $0x28] sm:$0xff]  ;;  %v3698_v5 = vld [vmem:[%s5960_s23 + $0x39] sm:$0xff]  ;;  %v5422_v7 = vpack.c.bf16 %v3780_v2, %v3779_v1  ;;  %v3781_v9 = vld [vmem:[%s7428_s1 + $0x2b0] sm:$0xff] }
  0x1e   : > { %5397 = vmatpush3.bf16.msra.mxu0 %v5394_v23  ;;  %5271 = vmatprep.subr.bf16.mxu1 %v5270_v30  ;;  %v3699_v6 = vld [vmem:[%s5960_s23 + $0x49] sm:$0xff]  ;;  %v5294_v8 = vpack.c.bf16 %v350_v4, %v349_v3  ;;  %v3782_v10 = vld [vmem:[%s7428_s1 + $0x2b8] sm:$0xff]  ;;  %v3701_v14 = vld [vmem:[%s5960_s23 + $0x61] sm:$0xff] }
  0x1f   : > { %5399 = vmatprep.subr.bf16.mxu0 %v5398_v31  ;;  %v351_v11 = vld [vmem:[%s7428_s1 + $0x30] sm:$0xff]  ;;  %v352_v12 = vld [vmem:[%s7428_s1 + $0x38] sm:$0xff]  ;;  %v5426_v15 = vpack.c.bf16 %v3782_v10, %v3781_v9  ;;  %v3783_v17 = vld [vmem:[%s7428_s1 + $0x2c0] sm:$0xff] }
  0x20   : > { %v3700_v13 = vld [vmem:[%s5960_s23 + $0x51] sm:$0xff]  ;;  %v5298_v16 = vpack.c.bf16 %v352_v12, %v351_v11  ;;  %v3784_v18 = vld [vmem:[%s7428_s1 + $0x2c8] sm:$0xff]  ;;  %v353_v19 = vld [vmem:[%s7428_s1 + $0x40] sm:$0xff] }
  0x21   : > { %5273 = vmatpush3.bf16.msra.mxu1 %v5270_v30  ;;  %v354_v20 = vld [vmem:[%s7428_s1 + $0x48] sm:$0xff]  ;;  %v3703_v22 = vld [vmem:[%s5960_s23 + $0x79] sm:$0xff]  ;;  %v5430_v23 = vpack.c.bf16 %v3784_v18, %v3783_v17  ;;  %v3785_v25 = vld [vmem:[%s7428_s1 + $0x2d0] sm:$0xff] }
  0x22   : > { %5401 = vmatpush3.bf16.msra.mxu0 %v5398_v31  ;;  %5275 = vmatprep.subr.bf16.mxu1 %v5274_v36  ;;  %v3702_v21 = vld [vmem:[%s5960_s23 + $0x69] sm:$0xff]  ;;  %v5302_v24 = vpack.c.bf16 %v354_v20, %v353_v19  ;;  %v3786_v26 = vld [vmem:[%s7428_s1 + $0x2d8] sm:$0xff]  ;;  %v3787_v33 = vld [vmem:[%s7428_s1 + $0x2e0] sm:$0xff] }
  0x23   : > { %5403 = vmatprep.subr.bf16.mxu0 %v5402_v37  ;;  %v355_v27 = vld [vmem:[%s7428_s1 + $0x50] sm:$0xff]  ;;  %v356_v28 = vld [vmem:[%s7428_s1 + $0x58] sm:$0xff]  ;;  %v5434_v31 = vpack.c.bf16 %v3786_v26, %v3785_v25  ;;  %v3788_v34 = vld [vmem:[%s7428_s1 + $0x2e8] sm:$0xff] }
  0x24   : > { %v3705_v30 = vld [vmem:[%s5960_s23 + $0x91] sm:$0xff]  ;;  %v5306_v32 = vpack.c.bf16 %v356_v28, %v355_v27  ;;  %v357_v35 = vld [vmem:[%s7428_s1 + $0x60] sm:$0xff]  ;;  %v3707_v38 = vld [vmem:[%s5960_s23 + $0xa9] sm:$0xff]  ;;  %v5438_v39 = vpack.c.bf16 %v3788_v34, %v3787_v33 }
  0x25   : > { %5277 = vmatpush3.bf16.msra.mxu1 %v5274_v36  ;;  %v358_v36 = vld [vmem:[%s7428_s1 + $0x68] sm:$0xff]  ;;  %v3789_v41 = vld [vmem:[%s7428_s1 + $0x2f0] sm:$0xff]  ;;  %v360_v44 = vld [vmem:[%s7428_s1 + $0x78] sm:$0xff] }
  0x26   : > { %5405 = vmatpush3.bf16.msra.mxu0 %v5402_v37  ;;  %5279 = vmatprep.subr.bf16.mxu1 %v5278_v42  ;;  %v3706_v37 = vld [vmem:[%s5960_s23 + $0x99] sm:$0xff]  ;;  %v5310_v40 = vpack.c.bf16 %v358_v36, %v357_v35  ;;  %v3708_v45 = vld [vmem:[%s5960_s23 + $0xb1] sm:$0xff]  ;;  %v3709_v46 = vld [vmem:[%s5960_s23 + $0xc1] sm:$0xff] }
  0x27   : > { %5407 = vmatprep.subr.bf16.mxu0 %v5406_v43  ;;  %v3824_v50 = vld [vmem:[%s7428_s1 + $0x308] sm:$0xff]  ;;  %v3631_v51 = vld [vmem:[%s7428_s1 + $0x100] sm:$0xff]  ;;  %v3721_v2 = vld [vmem:[%s5960_s23 + $0x151] sm:$0xff] }
  0x28   : > { %v3632_v52 = vld [vmem:[%s7428_s1 + $0x108] sm:$0xff]  ;;  %v3714_v59 = vld [vmem:[%s5960_s23 + $0xf9] sm:$0xff]  ;;  %v3825_v10 = vld [vmem:[%s7428_s1 + $0x310] sm:$0xff] }
  0x29   : > { %5281 = vmatpush3.bf16.msra.mxu1 %v5278_v42  ;;  %v3790_v42 = vld [vmem:[%s7428_s1 + $0x2f8] sm:$0xff]  ;;  %v3710_v53 = vld [vmem:[%s5960_s23 + $0xc9] sm:$0xff]  ;;  %v6143_v56 = vpack.c.bf16 %v3632_v52, %v3631_v51  ;;  %v3712_v57 = vld [vmem:[%s5960_s23 + $0xe1] sm:$0xff] }
  0x2a   : > { %5409 = vmatpush3.bf16.msra.mxu0 %v5406_v43  ;;  %5283 = vmatprep.subr.bf16.mxu1 %v5282_v48  ;;  %v359_v43 = vld [vmem:[%s7428_s1 + $0x70] sm:$0xff]  ;;  %v5442_v47 = vpack.c.bf16 %v3790_v42, %v3789_v41  ;;  %v3720_v1 = vld [vmem:[%s5960_s23 + $0x141] sm:$0xff]  ;;  %v3722_v3 = vld [vmem:[%s5960_s23 + $0x159] sm:$0xff] }
  0x2b   : > { %5411 = vmatprep.subr.bf16.mxu0 %v5410_v49  ;;  %v3715_v60 = vld [vmem:[%s5960_s23 + $0x109] sm:$0xff]  ;;  %v6164_v9 = vld [vmem:[%s5960_s23 + $0x1a] sm:$0xff]  ;;  %v6187_v18 = vld [vmem:[%s5960_s23 + $0x32] sm:$0xff] }
  0x2c   : > { %v3723_v4 = vld [vmem:[%s5960_s23 + $0x169] sm:$0xff]  ;;  %v3826_v11 = vld [vmem:[%s7428_s1 + $0x318] sm:$0xff]  ;;  %v3827_v20 = vld [vmem:[%s7428_s1 + $0x320] sm:$0xff] }
  0x2d   : > { %5285 = vmatpush3.bf16.msra.mxu1 %v5282_v48  ;;  %v5314_v48 = vpack.c.bf16 %v360_v44, %v359_v43  ;;  %v314_v12 = vld [vmem:[%s5960_s23 + $0x8] sm:$0xff]  ;;  %v5450_v17 = vpack.c.bf16 %v3826_v11, %v3825_v10  ;;  %v6209_v25 = vld [vmem:[%s5960_s23 + $0x3a] sm:$0xff]  ;;  %v6212_v26 = vld [vmem:[%s5960_s23 + $0x30] sm:$0xff] }
  0x2e   : > { %5413 = vmatpush3.bf16.msra.mxu0 %v5410_v49  ;;  %5287 = vmatprep.subr.bf16.mxu1 %v5286_v54  ;;  %v3823_v49 = vld [vmem:[%s7428_s1 + $0x300] sm:$0xff]  ;;  %v6216_v27 = vld [vmem:[%s5960_s23 + $0x4a] sm:$0xff]  ;;  %v3638_v34 = vld [vmem:[%s7428_s1 + $0x138] sm:$0xff] }
  0x2f   : > { %5415 = vmatprep.subr.bf16.mxu0 %v5414_v55  ;;  %v3637_v33 = vld [vmem:[%s7428_s1 + $0x130] sm:$0xff]  ;;  %v6241_v36 = vld [vmem:[%s5960_s23 + $0x48] sm:$0xff]  ;;  %v3639_v43 = vld [vmem:[%s7428_s1 + $0x140] sm:$0xff] }
  0x30   : > { %4487 = vmatmul.mubr.f32.vlgmr.msra.gmra.mrb[0].mxu1 %v362_v58  ;;  %v3713_v58 = vld [vmem:[%s5960_s23 + $0xf1] sm:$0xff]  ;;  %v3832_v41 = vld [vmem:[%s7428_s1 + $0x348] sm:$0xff] }
  0x31   : > { %4807 = vmatmul.mubr.f32.vlgmr.msra.gmra.mrb[0].mxu0 %v3696_v61  ;;  %4489 = vmatprep.mubr.f32.mxu1 %v5976_v29  ;;  %v3704_v29 = vld [vmem:[%s5960_s23 + $0x81] sm:$0xff]  ;;  %v6238_v35 = vld [vmem:[%s5960_s23 + $0x52] sm:$0xff] }
  0x32   : > { %5417 = vmatpush3.bf16.msra.mxu0 %v5414_v55  ;;  %5289 = vmatpush3.bf16.msra.mxu1 %v5286_v54  ;;  %v3711_v54 = vld [vmem:[%s5960_s23 + $0xd9] sm:$0xff]  ;;  %v6141_v55 = vpack.c.bf16 %v3824_v50, %v3823_v49  ;;  %v6256_v42 = vld [vmem:[%s5960_s23 + $0x50] sm:$0xff]  ;;  %v3640_v44 = vld [vmem:[%s7428_s1 + $0x148] sm:$0xff] }
  0x33   : > { %4809 = vmatprep.mubr.f32.mxu0 %v3697_v63  ;;  %5419 = vmatprep.subr.bf16.mxu0 %v5418_v62  ;;  %v5334_v49 = vpack.c.bf16 %v3640_v44, %v3639_v43  ;;  %v3833_v50 = vld [vmem:[%s7428_s1 + $0x350] sm:$0xff]  ;;  %v3834_v51 = vld [vmem:[%s7428_s1 + $0x358] sm:$0xff]  ;;  %v6284_v52 = vld [vmem:[%s5960_s23 + $0x68] sm:$0xff] }
  0x34   : > { %4490 = vmatmul.mubr.f32.gmra.mrb[2].mxu1 %v3696_v61  ;;  %5291 = vmatprep.subr.bf16.mxu1 %v5290_v0  ;;  %v3716_v61 = vld [vmem:[%s5960_s23 + $0x111] sm:$0xff]  ;;  %v6412_v43 = vld [vmem:[%s5960_s23 + $0xe0] sm:$0xff] }
  0x35   : > { %4810 = vmatmul.mubr.f32.gmra.mrb[2].mxu0 %v3698_v5  ;;  %4492 = vmatprep.mubr.f32.mxu1 %v3697_v63  ;;  %v3718_v63 = vld [vmem:[%s5960_s23 + $0x129] sm:$0xff]  ;;  %v3646_v11 = vld [vmem:[%s7428_s1 + $0x178] sm:$0xff] }
  0x36   : > { %4812 = vmatprep.mubr.f32.mxu0 %v3699_v6  ;;  %5421 = vmatpush3.bf16.msra.mxu0 %v5418_v62  ;;  %v3717_v62 = vld [vmem:[%s5960_s23 + $0x121] sm:$0xff]  ;;  %v3645_v10 = vld [vmem:[%s7428_s1 + $0x170] sm:$0xff] }
  0x37   : > { %5293 = vmatpush3.bf16.msra.mxu1 %v5290_v0  ;;  %5423 = vmatprep.subr.bf16.mxu0 %v5422_v7  ;;  %v3719_v0 = vld [vmem:[%s5960_s23 + $0x139] sm:$0xff] }
  0x38   : > { %4493 = vmatmul.mubr.f32.gmra.mrb[4].mxu1 %v3698_v5  ;;  %5295 = vmatprep.subr.bf16.mxu1 %v5294_v8  ;;  %v3724_v5 = vld [vmem:[%s5960_s23 + $0x171] sm:$0xff]  ;;  %v6416_v44 = vld [vmem:[%s5960_s23 + $0xfa] sm:$0xff] }
  0x39   : > { %4813 = vmatmul.mubr.f32.gmra.mrb[4].mxu0 %v3700_v13  ;;  %4495 = vmatprep.mubr.f32.mxu1 %v3699_v6  ;;  %v3725_v6 = vld [vmem:[%s5960_s23 + $0x181] sm:$0xff] }
  0x3a   : > { %4815 = vmatprep.mubr.f32.mxu0 %v3701_v14  ;;  %5425 = vmatpush3.bf16.msra.mxu0 %v5422_v7  ;;  %v3726_v7 = vld [vmem:[%s5960_s23 + $0x189] sm:$0xff] }
  0x3b   : > { %5297 = vmatpush3.bf16.msra.mxu1 %v5294_v8  ;;  %5427 = vmatprep.subr.bf16.mxu0 %v5426_v15  ;;  %v313_v8 = vld [vmem:[%s5960_s23] sm:$0xff] }
  0x3c   : > { %4496 = vmatmul.mubr.f32.gmra.mrb[6].mxu1 %v3700_v13  ;;  %5299 = vmatprep.subr.bf16.mxu1 %v5298_v16  ;;  %v3633_v13 = vld [vmem:[%s7428_s1 + $0x110] sm:$0xff] }
  0x3d   : > { %4816 = vmatmul.mubr.f32.gmra.mrb[6].mxu0 %v3702_v21  ;;  %4498 = vmatprep.mubr.f32.mxu1 %v3701_v14  ;;  %v3634_v14 = vld [vmem:[%s7428_s1 + $0x118] sm:$0xff] }
  0x3e   : > { %4818 = vmatprep.mubr.f32.mxu0 %v3703_v22  ;;  %5429 = vmatpush3.bf16.msra.mxu0 %v5426_v15  ;;  %v6181_v15 = vld [vmem:[%s5960_s23 + $0x22] sm:$0xff]  ;;  %v5322_v19 = vpack.c.bf16 %v3634_v14, %v3633_v13 }
  0x3f   : > { %5301 = vmatpush3.bf16.msra.mxu1 %v5298_v16  ;;  %5431 = vmatprep.subr.bf16.mxu0 %v5430_v23  ;;  %v6184_v16 = vld [vmem:[%s5960_s23 + $0x18] sm:$0xff]  ;;  %v6353_v13 = vld [vmem:[%s5960_s23 + $0xa8] sm:$0xff] }
  0x40   : > { %4499 = vmatmul.mubr.f32.gmra.mrb[8].mxu1 %v3702_v21  ;;  %5303 = vmatprep.subr.bf16.mxu1 %v5302_v24  ;;  %7445 = vst [vmem:[#allocation2_spill] sm:$0xff] %v6184_v16  ;;  %v3828_v21 = vld [vmem:[%s7428_s1 + $0x328] sm:$0xff] }
  0x41   : > { %4819 = vmatmul.mubr.f32.gmra.mrb[8].mxu0 %v3704_v29  ;;  %4501 = vmatprep.mubr.f32.mxu1 %v3703_v22  ;;  %v6198_v22 = vld [vmem:[%s5960_s23 + $0x20] sm:$0xff]  ;;  %v5454_v28 = vpack.c.bf16 %v3828_v21, %v3827_v20  ;;  %v3872_v21 = vld [vmem:[%s7428_s1 + $0x388] sm:$0xff] }
  0x42   : > { %4821 = vmatprep.mubr.f32.mxu0 %v3705_v30  ;;  %5433 = vmatpush3.bf16.msra.mxu0 %v5430_v23  ;;  %7446 = vst [vmem:[#allocation3_spill] sm:$0xff] %v6198_v22  ;;  %v3635_v23 = vld [vmem:[%s7428_s1 + $0x120] sm:$0xff] }
  0x43   : > { %5305 = vmatpush3.bf16.msra.mxu1 %v5302_v24  ;;  %5435 = vmatprep.subr.bf16.mxu0 %v5434_v31  ;;  %v3636_v24 = vld [vmem:[%s7428_s1 + $0x128] sm:$0xff]  ;;  %v3871_v20 = vld [vmem:[%s7428_s1 + $0x380] sm:$0xff] }
  0x44   : > { %4502 = vmatmul.mubr.f32.gmra.mrb[10].mxu1 %v3704_v29  ;;  %5307 = vmatprep.subr.bf16.mxu1 %v5306_v32  ;;  %v5326_v29 = vpack.c.bf16 %v3636_v24, %v3635_v23  ;;  %v6356_v14 = vld [vmem:[%s5960_s23 + $0xc2] sm:$0xff]  ;;  %v6368_v23 = vld [vmem:[%s5960_s23 + $0xb0] sm:$0xff] }
  0x45   : > { %4822 = vmatmul.mubr.f32.gmra.mrb[10].mxu0 %v3706_v37  ;;  %4504 = vmatprep.mubr.f32.mxu1 %v3705_v30  ;;  %v3829_v30 = vld [vmem:[%s7428_s1 + $0x330] sm:$0xff]  ;;  %v3679_v24 = vld [vmem:[%s7428_s1 + $0x180] sm:$0xff] }
  0x46   : > { %4824 = vmatprep.mubr.f32.mxu0 %v3707_v38  ;;  %5437 = vmatpush3.bf16.msra.mxu0 %v5434_v31  ;;  %v3830_v31 = vld [vmem:[%s7428_s1 + $0x338] sm:$0xff] }
  0x47   : > { %5309 = vmatpush3.bf16.msra.mxu1 %v5306_v32  ;;  %5439 = vmatprep.subr.bf16.mxu0 %v5438_v39  ;;  %v6228_v32 = vld [vmem:[%s5960_s23 + $0x38] sm:$0xff] }
  0x48   : > { %4505 = vmatmul.mubr.f32.gmra.mrb[12].mxu1 %v3706_v37  ;;  %5311 = vmatprep.subr.bf16.mxu1 %v5310_v40  ;;  %v6244_v37 = vld [vmem:[%s5960_s23 + $0x62] sm:$0xff] }
  0x49   : > { %4825 = vmatmul.mubr.f32.gmra.mrb[12].mxu0 %v3708_v45  ;;  %4507 = vmatprep.mubr.f32.mxu1 %v3707_v38  ;;  %v5458_v38 = vpack.c.bf16 %v3830_v31, %v3829_v30  ;;  %v6381_v30 = vld [vmem:[%s5960_s23 + $0xc0] sm:$0xff] }
  0x4a   : > { %4827 = vmatprep.mubr.f32.mxu0 %v3709_v46  ;;  %5441 = vmatpush3.bf16.msra.mxu0 %v5438_v39  ;;  %v5330_v39 = vpack.c.bf16 %v3638_v34, %v3637_v33  ;;  %v6384_v31 = vld [vmem:[%s5960_s23 + $0xda] sm:$0xff]  ;;  %v6386_v33 = vpack.c.bf16 %v3872_v21, %v3871_v20  ;;  %v6499_v20 = vld [vmem:[%s5960_s23 + $0x168] sm:$0xff] }
  0x4b   : > { %5313 = vmatpush3.bf16.msra.mxu1 %v5310_v40  ;;  %5443 = vmatprep.subr.bf16.mxu0 %v5442_v47  ;;  %v3831_v40 = vld [vmem:[%s7428_s1 + $0x340] sm:$0xff] }
  0x4c   : > { %4508 = vmatmul.mubr.f32.gmra.mrb[14].mxu1 %v3708_v45  ;;  %5315 = vmatprep.subr.bf16.mxu1 %v5314_v48  ;;  %v6266_v45 = vld [vmem:[%s5960_s23 + $0x6a] sm:$0xff]  ;;  %v3773_v21 = vld [vmem:[%s5960_s23 + $0x182] sm:$0xff] }
  0x4d   : > { %4828 = vmatmul.mubr.f32.gmra.mrb[14].mxu0 %v3710_v53  ;;  %4510 = vmatprep.mubr.f32.mxu1 %v3709_v46  ;;  %v6269_v46 = vld [vmem:[%s5960_s23 + $0x60] sm:$0xff] }
  0x4e   : > { %4830 = vmatprep.mubr.f32.mxu0 %v3711_v54  ;;  %5445 = vmatpush3.bf16.msra.mxu0 %v5442_v47  ;;  %v6272_v47 = vld [vmem:[%s5960_s23 + $0x7a] sm:$0xff] }
  0x4f   : > { %5317 = vmatpush3.bf16.msra.mxu1 %v5314_v48  ;;  %5447 = vmatprep.subr.bf16.mxu0 %v6141_v55  ;;  %v5462_v48 = vpack.c.bf16 %v3832_v41, %v3831_v40  ;;  %v6401_v40 = vld [vmem:[%s5960_s23 + $0xd8] sm:$0xff] }
  0x50   : > { %4511 = vmatmul.mubr.f32.gmra.mrb[16].mxu1 %v3710_v53  ;;  %5319 = vmatprep.subr.bf16.mxu1 %v6143_v56  ;;  %v3641_v53 = vld [vmem:[%s7428_s1 + $0x150] sm:$0xff] }
  0x51   : > { %4831 = vmatmul.mubr.f32.gmra.mrb[16].mxu0 %v3712_v57  ;;  %4513 = vmatprep.mubr.f32.mxu1 %v3711_v54  ;;  %v3642_v54 = vld [vmem:[%s7428_s1 + $0x158] sm:$0xff] }
  0x52   : > { %4833 = vmatprep.mubr.f32.mxu0 %v3713_v58  ;;  %v6404_v41 = vld [vmem:[%s5960_s23 + $0xf2] sm:$0xff] }
  0x54   : > { %4514 = vmatmul.mubr.f32.gmra.mrb[18].mxu1 %v3712_v57  ;;  %v6300_v57 = vld [vmem:[%s5960_s23 + $0x92] sm:$0xff] }
  0x55   : > { %4834 = vmatmul.mubr.f32.gmra.mrb[18].mxu0 %v3714_v59  ;;  %4516 = vmatprep.mubr.f32.mxu1 %v3713_v58  ;;  %v5466_v58 = vpack.c.bf16 %v3834_v51, %v3833_v50  ;;  %v6428_v50 = vld [vmem:[%s5960_s23 + $0xf8] sm:$0xff] }
  0x56   : > { %4836 = vmatprep.mubr.f32.mxu0 %v3715_v60  ;;  %v6432_v51 = vld [vmem:[%s5960_s23 + $0x112] sm:$0xff] }
  0x58   : > { %4517 = vmatmul.mubr.f32.gmra.mrb[20].mxu1 %v3714_v59  ;;  %v5338_v59 = vpack.c.bf16 %v3642_v54, %v3641_v53  ;;  %v6435_v53 = vld [vmem:[%s5960_s23 + $0x108] sm:$0xff] }
  0x59   : > { %4837 = vmatmul.mubr.f32.gmra.mrb[20].mxu0 %v3716_v61  ;;  %4519 = vmatprep.mubr.f32.mxu1 %v3715_v60  ;;  %v3835_v60 = vld [vmem:[%s7428_s1 + $0x360] sm:$0xff] }
  0x5a   : > { %4839 = vmatprep.mubr.f32.mxu0 %v3717_v62  ;;  %v6438_v54 = vld [vmem:[%s5960_s23 + $0x122] sm:$0xff] }
  0x5c   : > { %4520 = vmatmul.mubr.f32.gmra.mrb[22].mxu1 %v3716_v61  ;;  %v3836_v61 = vld [vmem:[%s7428_s1 + $0x368] sm:$0xff] }
  0x5d   : > { %4840 = vmatmul.mubr.f32.gmra.mrb[22].mxu0 %v3718_v63  ;;  %4522 = vmatprep.mubr.f32.mxu1 %v3717_v62  ;;  %v6312_v62 = vld [vmem:[%s5960_s23 + $0x80] sm:$0xff] }
  0x5e   : > { %4842 = vmatprep.mubr.f32.mxu0 %v3719_v0 }
  0x60   : > { %4523 = vmatmul.mubr.f32.gmra.mrb[24].mxu1 %v3718_v63  ;;  %v3643_v63 = vld [vmem:[%s7428_s1 + $0x160] sm:$0xff] }
  0x61   : > { %4843 = vmatmul.mubr.f32.gmra.mrb[24].mxu0 %v3720_v1  ;;  %4525 = vmatprep.mubr.f32.mxu1 %v3719_v0  ;;  %v3644_v0 = vld [vmem:[%s7428_s1 + $0x168] sm:$0xff] }
  0x62   : > { %4845 = vmatprep.mubr.f32.mxu0 %v3721_v2 }
  0x64   : > { %4526 = vmatmul.mubr.f32.gmra.mrb[26].mxu1 %v3720_v1  ;;  %v6322_v1 = vld [vmem:[%s5960_s23 + $0x9a] sm:$0xff] }
  0x65   : > { %4846 = vmatmul.mubr.f32.gmra.mrb[26].mxu0 %v3722_v3  ;;  %4528 = vmatprep.mubr.f32.mxu1 %v3721_v2  ;;  %v6325_v2 = vld [vmem:[%s5960_s23 + $0x90] sm:$0xff] }
  0x66   : > { %4848 = vmatprep.mubr.f32.mxu0 %v3723_v4 }
  0x68   : > { %4529 = vmatmul.mubr.f32.gmra.mrb[28].mxu1 %v3722_v3  ;;  %v6328_v3 = vld [vmem:[%s5960_s23 + $0xaa] sm:$0xff] }
  0x69   : > { %4849 = vmatmul.mubr.f32.gmra.mrb[28].mxu0 %v3724_v5  ;;  %4531 = vmatprep.mubr.f32.mxu1 %v3723_v4  ;;  %v5470_v4 = vpack.c.bf16 %v3836_v61, %v3835_v60  ;;  %v6451_v60 = vld [vmem:[%s5960_s23 + $0x120] sm:$0xff] }
  0x6a   : > { %4851 = vmatprep.mubr.f32.mxu0 %v3725_v6  ;;  %v3837_v6 = vld [vmem:[%s7428_s1 + $0x370] sm:$0xff]  ;;  %v6454_v61 = vld [vmem:[%s5960_s23 + $0x13a] sm:$0xff] }
  0x6c   : > { %4532 = vmatmul.mubr.f32.gmra.mrb[30].mxu1 %v3724_v5  ;;  %v5342_v5 = vpack.c.bf16 %v3644_v0, %v3643_v63  ;;  %v6460_v63 = vld [vmem:[%s5960_s23 + $0x128] sm:$0xff] }
  0x6d   : > { %4852 = vmatmul.mubr.f32.gmra.mrb[30].mxu0 %v3726_v7  ;;  %4566 = vmatprep.mubr.f32.mxu1 %v313_v8  ;;  %v3838_v7 = vld [vmem:[%s7428_s1 + $0x378] sm:$0xff]  ;;  %v6464_v0 = vld [vmem:[%s5960_s23 + $0x142] sm:$0xff] }
  0x6e   : > { %4886 = vmatprep.mubr.f32.mxu0 %v6164_v9  ;;  %v6340_v8 = vld [vmem:[%s5960_s23 + $0x98] sm:$0xff]  ;;  %7447 = vst [vmem:[#allocation4_spill] sm:$0xff] %v6464_v0 }
  0x70   : > { %4567 = vmatmul.mubr.f32.vlgmr.msra.gmra.mrb[0].mxu1 %v314_v12  ;;  %v6350_v12 = vld [vmem:[%s5960_s23 + $0xb2] sm:$0xff] }
  0x71   : > { %4887 = vmatmul.mubr.f32.vlgmr.msra.gmra.mrb[0].mxu0 %v6181_v15  ;;  %4569 = vmatprep.mubr.f32.mxu1 %v6184_v16  ;;  %v3873_v16 = vld [vmem:[%s7428_s1 + $0x390] sm:$0xff] }
  0x72   : > { %5449 = vmatpush3.bf16.msra.mxu0 %v6141_v55  ;;  %5321 = vmatpush3.bf16.msra.mxu1 %v6143_v56  ;;  %v6294_v55 = vld [vmem:[%s5960_s23 + $0x82] sm:$0xff]  ;;  %v6297_v56 = vld [vmem:[%s5960_s23 + $0x78] sm:$0xff] }
  0x73   : > { %4889 = vmatprep.mubr.f32.mxu0 %v6187_v18  ;;  %5451 = vmatprep.subr.bf16.mxu0 %v5450_v17 }
  0x74   : > { %4570 = vmatmul.mubr.f32.gmra.mrb[2].mxu1 %v6198_v22  ;;  %5323 = vmatprep.subr.bf16.mxu1 %v5322_v19  ;;  %v860_v22 = vld [vmem:[%s5960_s23 + $0x2] sm:$0xff] }
  0x75   : > { %4890 = vmatmul.mubr.f32.gmra.mrb[2].mxu0 %v6209_v25  ;;  %4572 = vmatprep.mubr.f32.mxu1 %v6212_v26 }
  0x76   : > { %4892 = vmatprep.mubr.f32.mxu0 %v6216_v27  ;;  %5453 = vmatpush3.bf16.msra.mxu0 %v5450_v17  ;;  %v5474_v17 = vpack.c.bf16 %v3838_v7, %v3837_v6  ;;  %v6476_v6 = vld [vmem:[%s5960_s23 + $0x140] sm:$0xff] }
  0x77   : > { %5325 = vmatpush3.bf16.msra.mxu1 %v5322_v19  ;;  %5455 = vmatprep.subr.bf16.mxu0 %v5454_v28  ;;  %v5346_v19 = vpack.c.bf16 %v3646_v11, %v3645_v10  ;;  %v6480_v7 = vld [vmem:[%s5960_s23 + $0x15a] sm:$0xff]  ;;  %v6483_v10 = vld [vmem:[%s5960_s23 + $0x150] sm:$0xff] }
  0x78   : > { %4573 = vmatmul.mubr.f32.gmra.mrb[4].mxu1 %v6228_v32  ;;  %5327 = vmatprep.subr.bf16.mxu1 %v5326_v29  ;;  %7449 = vst [vmem:[#allocation6_spill] sm:$0xff] %v6480_v7  ;;  %v6486_v11 = vld [vmem:[%s5960_s23 + $0x16a] sm:$0xff] }
  0x79   : > { %4893 = vmatmul.mubr.f32.gmra.mrb[4].mxu0 %v6238_v35  ;;  %4575 = vmatprep.mubr.f32.mxu1 %v6241_v36  ;;  %7450 = vst [vmem:[#allocation7_spill] sm:$0xff] %v6486_v11 }
  0x7a   : > { %4895 = vmatprep.mubr.f32.mxu0 %v6244_v37  ;;  %5457 = vmatpush3.bf16.msra.mxu0 %v5454_v28  ;;  %v3680_v28 = vld [vmem:[%s7428_s1 + $0x188] sm:$0xff] }
  0x7b   : > { %5329 = vmatpush3.bf16.msra.mxu1 %v5326_v29  ;;  %5459 = vmatprep.subr.bf16.mxu0 %v5458_v38  ;;  %v6378_v29 = vld [vmem:[%s5960_s23 + $0xca] sm:$0xff]  ;;  %v6389_v34 = vpack.c.bf16 %v3680_v28, %v3679_v24 }
  0x7c   : > { %4576 = vmatmul.mubr.f32.gmra.mrb[6].mxu1 %v6256_v42  ;;  %5331 = vmatprep.subr.bf16.mxu1 %v5330_v39  ;;  %v6506_v24 = vld [vmem:[%s5960_s23 + $0x170] sm:$0xff] }
  0x7d   : > { %4896 = vmatmul.mubr.f32.gmra.mrb[6].mxu0 %v6266_v45  ;;  %4578 = vmatprep.mubr.f32.mxu1 %v6269_v46  ;;  %7452 = vst [vmem:[#allocation9_spill] sm:$0xff] %v6506_v24  ;;  %v3774_v28 = vld [vmem:[%s5960_s23 + $0x18a] sm:$0xff] }
  0x7e   : > { %4898 = vmatprep.mubr.f32.mxu0 %v6272_v47  ;;  %5461 = vmatpush3.bf16.msra.mxu0 %v5458_v38  ;;  %v6394_v38 = vld [vmem:[%s5960_s23 + $0xc8] sm:$0xff] }
  0x7f   : > { %5333 = vmatpush3.bf16.msra.mxu1 %v5330_v39  ;;  %5463 = vmatprep.subr.bf16.mxu0 %v5462_v48  ;;  %v6398_v39 = vld [vmem:[%s5960_s23 + $0xe2] sm:$0xff] }
  0x80   : > { %4579 = vmatmul.mubr.f32.gmra.mrb[8].mxu1 %v6284_v52  ;;  %5335 = vmatprep.subr.bf16.mxu1 %v5334_v49 }
  0x81   : > { %4899 = vmatmul.mubr.f32.gmra.mrb[8].mxu0 %v6294_v55  ;;  %4581 = vmatprep.mubr.f32.mxu1 %v6297_v56 }
  0x82   : > { %4901 = vmatprep.mubr.f32.mxu0 %v6300_v57  ;;  %5465 = vmatpush3.bf16.msra.mxu0 %v5462_v48  ;;  %v6419_v48 = vld [vmem:[%s5960_s23 + $0xf0] sm:$0xff] }
  0x83   : > { %5337 = vmatpush3.bf16.msra.mxu1 %v5334_v49  ;;  %5467 = vmatprep.subr.bf16.mxu0 %v5466_v58  ;;  %v6422_v49 = vld [vmem:[%s5960_s23 + $0x10a] sm:$0xff] }
  0x84   : > { %4582 = vmatmul.mubr.f32.gmra.mrb[10].mxu1 %v6312_v62  ;;  %5339 = vmatprep.subr.bf16.mxu1 %v5338_v59 }
  0x85   : > { %4902 = vmatmul.mubr.f32.gmra.mrb[10].mxu0 %v6322_v1  ;;  %4584 = vmatprep.mubr.f32.mxu1 %v6325_v2 }
  0x86   : > { %4904 = vmatprep.mubr.f32.mxu0 %v6328_v3  ;;  %5469 = vmatpush3.bf16.msra.mxu0 %v5466_v58  ;;  %v6444_v58 = vld [vmem:[%s5960_s23 + $0x110] sm:$0xff] }
  0x87   : > { %5341 = vmatpush3.bf16.msra.mxu1 %v5338_v59  ;;  %5471 = vmatprep.subr.bf16.mxu0 %v5470_v4  ;;  %v6448_v59 = vld [vmem:[%s5960_s23 + $0x12a] sm:$0xff] }
  0x88   : > { %4585 = vmatmul.mubr.f32.gmra.mrb[12].mxu1 %v6340_v8  ;;  %5343 = vmatprep.subr.bf16.mxu1 %v5342_v5 }
  0x89   : > { %4905 = vmatmul.mubr.f32.gmra.mrb[12].mxu0 %v6350_v12  ;;  %4587 = vmatprep.mubr.f32.mxu1 %v6353_v13 }
  0x8a   : > { %4907 = vmatprep.mubr.f32.mxu0 %v6356_v14  ;;  %5473 = vmatpush3.bf16.msra.mxu0 %v5470_v4  ;;  %v6467_v4 = vld [vmem:[%s5960_s23 + $0x138] sm:$0xff] }
  0x8b   : > { %5345 = vmatpush3.bf16.msra.mxu1 %v5342_v5  ;;  %5475 = vmatprep.subr.bf16.mxu0 %v5474_v17  ;;  %v6470_v5 = vld [vmem:[%s5960_s23 + $0x152] sm:$0xff] }
  0x8c   : > { %4588 = vmatmul.mubr.f32.gmra.mrb[14].mxu1 %v6368_v23  ;;  %5347 = vmatprep.subr.bf16.mxu1 %v5346_v19  ;;  %7448 = vst [vmem:[#allocation5_spill] sm:$0xff] %v6470_v5 }
  0x8d   : > { %4908 = vmatmul.mubr.f32.gmra.mrb[14].mxu0 %v6378_v29  ;;  %4590 = vmatprep.mubr.f32.mxu1 %v6381_v30 }
  0x8e   : > { %4910 = vmatprep.mubr.f32.mxu0 %v6384_v31  ;;  %5477 = vmatpush3.bf16.msra.mxu0 %v5474_v17  ;;  %v6492_v17 = vld [vmem:[%s5960_s23 + $0x158] sm:$0xff] }
  0x8f   : > { %5349 = vmatpush3.bf16.msra.mxu1 %v5346_v19  ;;  %5479 = vmatprep.subr.bf16.mxu0 %v6386_v33  ;;  %v6496_v19 = vld [vmem:[%s5960_s23 + $0x172] sm:$0xff] }
  0x90   : > { %4591 = vmatmul.mubr.f32.gmra.mrb[16].mxu1 %v6394_v38  ;;  %5351 = vmatprep.subr.bf16.mxu1 %v6389_v34  ;;  %7451 = vst [vmem:[#allocation8_spill] sm:$0xff] %v6496_v19 }
  0x91   : > { %4911 = vmatmul.mubr.f32.gmra.mrb[16].mxu0 %v6398_v39  ;;  %4593 = vmatprep.mubr.f32.mxu1 %v6401_v40 }
  0x92   : > { %4913 = vmatprep.mubr.f32.mxu0 %v6404_v41 }
  0x94   : > { %4594 = vmatmul.mubr.f32.gmra.mrb[18].mxu1 %v6412_v43 }
  0x95   : > { %4914 = vmatmul.mubr.f32.gmra.mrb[18].mxu0 %v6416_v44  ;;  %4596 = vmatprep.mubr.f32.mxu1 %v6419_v48 }
  0x96   : > { %4916 = vmatprep.mubr.f32.mxu0 %v6422_v49 }
  0x98   : > { %4597 = vmatmul.mubr.f32.gmra.mrb[20].mxu1 %v6428_v50 }
  0x99   : > { %4917 = vmatmul.mubr.f32.gmra.mrb[20].mxu0 %v6432_v51  ;;  %4599 = vmatprep.mubr.f32.mxu1 %v6435_v53 }
  0x9a   : > { %4919 = vmatprep.mubr.f32.mxu0 %v6438_v54 }
  0x9c   : > { %4600 = vmatmul.mubr.f32.gmra.mrb[22].mxu1 %v6444_v58 }
  0x9d   : > { %4920 = vmatmul.mubr.f32.gmra.mrb[22].mxu0 %v6448_v59  ;;  %4602 = vmatprep.mubr.f32.mxu1 %v6451_v60 }
  0x9e   : > { %4922 = vmatprep.mubr.f32.mxu0 %v6454_v61 }
  0xa0   : > { %4603 = vmatmul.mubr.f32.gmra.mrb[24].mxu1 %v6460_v63 }
  0xa1   : > { %4923 = vmatmul.mubr.f32.gmra.mrb[24].mxu0 %v6464_v0  ;;  %4605 = vmatprep.mubr.f32.mxu1 %v6467_v4  ;;  %v3875_v0 = vld [vmem:[%s7428_s1 + $0x3a0] sm:$0xff] }
  0xa2   : > { %4925 = vmatprep.mubr.f32.mxu0 %v6470_v5 }
  0xa4   : > { %4606 = vmatmul.mubr.f32.gmra.mrb[26].mxu1 %v6476_v6 }
  0xa5   : > { %4926 = vmatmul.mubr.f32.gmra.mrb[26].mxu0 %v6480_v7  ;;  %4608 = vmatprep.mubr.f32.mxu1 %v6483_v10  ;;  %v3681_v7 = vld [vmem:[%s7428_s1 + $0x190] sm:$0xff] }
  0xa6   : > { %4928 = vmatprep.mubr.f32.mxu0 %v6486_v11  ;;  %v3874_v11 = vld [vmem:[%s7428_s1 + $0x398] sm:$0xff] }
  0xa7   : > { %v5482_v5 = vpack.c.bf16 %v3874_v11, %v3873_v16  ;;  %v3684_v16 = vld [vmem:[%s7428_s1 + $0x1a8] sm:$0xff]  ;;  %v3877_v11 = vld [vmem:[%s7428_s1 + $0x3b0] sm:$0xff] }
  0xa8   : > { %4609 = vmatmul.mubr.f32.gmra.mrb[28].mxu1 %v6492_v17 }
  0xa9   : > { %4929 = vmatmul.mubr.f32.gmra.mrb[28].mxu0 %v6496_v19  ;;  %4611 = vmatprep.mubr.f32.mxu1 %v6499_v20  ;;  %v861_v19 = vld [vmem:[%s5960_s23 + $0xa] sm:$0xff] }
  0xaa   : > { %4931 = vmatprep.mubr.f32.mxu0 %v3773_v21  ;;  %v3682_v21 = vld [vmem:[%s7428_s1 + $0x198] sm:$0xff] }
  0xac   : > { %4612 = vmatmul.mubr.f32.gmra.mrb[30].mxu1 %v6506_v24  ;;  %v5354_v24 = vpack.c.bf16 %v3682_v21, %v3681_v7  ;;  %v3880_v21 = vld [vmem:[%s7428_s1 + $0x3c8] sm:$0xff] }
  0xad   : > { %4932 = vmatmul.mubr.f32.gmra.mrb[30].mxu0 %v3774_v28  ;;  %4646 = vmatprep.mubr.f32.mxu1 %v860_v22  ;;  %v3876_v22 = vld [vmem:[%s7428_s1 + $0x3a8] sm:$0xff]  ;;  %v3683_v28 = vld [vmem:[%s7428_s1 + $0x1a0] sm:$0xff] }
  0xae   : > { %4966 = vmatprep.mubr.f32.mxu0 %v6212_v26  ;;  %v5486_v7 = vpack.c.bf16 %v3876_v22, %v3875_v0 }
  0xb0   : > { %4647 = vmatmul.mubr.f32.vlgmr.msra.gmra.mrb[0].mxu1 %v861_v19  ;;  %v3878_v19 = vld [vmem:[%s7428_s1 + $0x3b8] sm:$0xff] }
  0xb1   : > { %4967 = vmatmul.mubr.f32.vlgmr.msra.gmra.mrb[0].mxu0 %v6228_v32  ;;  %4649 = vmatprep.mubr.f32.mxu1 %v6164_v9  ;;  %v5358_v9 = vpack.c.bf16 %v3684_v16, %v3683_v28  ;;  %v3882_v28 = vld [vmem:[%s7428_s1 + $0x3d8] sm:$0xff]  ;;  %v3689_v16 = vld [vmem:[%s7428_s1 + $0x1d0] sm:$0xff] }
  0xb2   : > { %5481 = vmatpush3.bf16.msra.mxu0 %v6386_v33  ;;  %5353 = vmatpush3.bf16.msra.mxu1 %v6389_v34  ;;  %v3685_v33 = vld [vmem:[%s7428_s1 + $0x1b0] sm:$0xff]  ;;  %v5490_v34 = vpack.c.bf16 %v3878_v19, %v3877_v11  ;;  %v3884_v11 = vld [vmem:[%s7428_s1 + $0x3e8] sm:$0xff]  ;;  %v3691_v19 = vld [vmem:[%s7428_s1 + $0x1e0] sm:$0xff] }
  0xb3   : > { %4969 = vmatprep.mubr.f32.mxu0 %v6241_v36  ;;  %5483 = vmatprep.subr.bf16.mxu0 %v5482_v5 }
  0xb4   : > { %4650 = vmatmul.mubr.f32.gmra.mrb[2].mxu1 %v6181_v15  ;;  %5355 = vmatprep.subr.bf16.mxu1 %v5354_v24  ;;  %v3686_v15 = vld [vmem:[%s7428_s1 + $0x1b8] sm:$0xff] }
  0xb5   : > { %4970 = vmatmul.mubr.f32.gmra.mrb[2].mxu0 %v6256_v42  ;;  %4652 = vmatprep.mubr.f32.mxu1 %v6187_v18  ;;  %v5362_v0 = vpack.c.bf16 %v3686_v15, %v3685_v33  ;;  %v3879_v18 = vld [vmem:[%s7428_s1 + $0x3c0] sm:$0xff] }
  0xb6   : > { %4972 = vmatprep.mubr.f32.mxu0 %v6269_v46  ;;  %5485 = vmatpush3.bf16.msra.mxu0 %v5482_v5  ;;  %v3687_v5 = vld [vmem:[%s7428_s1 + $0x1c0] sm:$0xff] }
  0xb7   : > { %5357 = vmatpush3.bf16.msra.mxu1 %v5354_v24  ;;  %5487 = vmatprep.subr.bf16.mxu0 %v5486_v7  ;;  %v5494_v24 = vpack.c.bf16 %v3880_v21, %v3879_v18 }
  0xb8   : > { %4653 = vmatmul.mubr.f32.gmra.mrb[4].mxu1 %v6209_v25  ;;  %5359 = vmatprep.subr.bf16.mxu1 %v5358_v9  ;;  %v3688_v25 = vld [vmem:[%s7428_s1 + $0x1c8] sm:$0xff] }
  0xb9   : > { %4973 = vmatmul.mubr.f32.gmra.mrb[4].mxu0 %v6284_v52  ;;  %4655 = vmatprep.mubr.f32.mxu1 %v6216_v27  ;;  %v5366_v22 = vpack.c.bf16 %v3688_v25, %v3687_v5  ;;  %v3881_v27 = vld [vmem:[%s7428_s1 + $0x3d0] sm:$0xff]  ;;  %v3920_v5 = vld [vmem:[%s7428_s1 + $0x408] sm:$0xff]  ;;  %v3107_v25 = vld [vmem:[%s7430_s3] sm:$0xff] }
  0xba   : > { %4975 = vmatprep.mubr.f32.mxu0 %v6297_v56  ;;  %5489 = vmatpush3.bf16.msra.mxu0 %v5486_v7  ;;  %v5498_v7 = vpack.c.bf16 %v3882_v28, %v3881_v27  ;;  %v7459_v27 = vld [vmem:[#allocation2_spill] sm:$0xff]  ;;  %v3109_v28 = vld [vmem:[%s7430_s3 + $0x10] sm:$0xff] }
  0xbb   : > { %5361 = vmatpush3.bf16.msra.mxu1 %v5358_v9  ;;  %5491 = vmatprep.subr.bf16.mxu0 %v5490_v34 }
  0xbc   : > { %4656 = vmatmul.mubr.f32.gmra.mrb[6].mxu1 %v6238_v35  ;;  %5363 = vmatprep.subr.bf16.mxu1 %v5362_v0  ;;  %v3690_v35 = vld [vmem:[%s7428_s1 + $0x1d8] sm:$0xff] }
  0xbd   : > { %4976 = vmatmul.mubr.f32.gmra.mrb[6].mxu0 %v6312_v62  ;;  %4658 = vmatprep.mubr.f32.mxu1 %v6244_v37  ;;  %v5370_v9 = vpack.c.bf16 %v3690_v35, %v3689_v16  ;;  %v3883_v37 = vld [vmem:[%s7428_s1 + $0x3e0] sm:$0xff]  ;;  %v3110_v16 = vld [vmem:[%s7430_s3 + $0x18] sm:$0xff] }
  0xbe   : > { %4978 = vmatprep.mubr.f32.mxu0 %v6325_v2  ;;  %5493 = vmatpush3.bf16.msra.mxu0 %v5490_v34  ;;  %v5502_v33 = vpack.c.bf16 %v3884_v11, %v3883_v37  ;;  %v3886_v34 = vld [vmem:[%s7428_s1 + $0x3f8] sm:$0xff]  ;;  %v7460_v37 = vld [vmem:[#allocation3_spill] sm:$0xff]  ;;  %v5546_v11 = vpack.c.bf16 %v3110_v16, %v3109_v28  ;;  %v3119_v16 = vld [vmem:[%s7430_s3 + $0x60] sm:$0xff] }
  0xbf   : > { %5365 = vmatpush3.bf16.msra.mxu1 %v5362_v0  ;;  %5495 = vmatprep.subr.bf16.mxu0 %v5494_v24  ;;  %v3693_v0 = vld [vmem:[%s7428_s1 + $0x1f0] sm:$0xff]  ;;  %v6696_v35 = vld [vmem:[%s5960_s23 + $0x39] sm:$0xff]  ;;  %v3932_v28 = vld [vmem:[%s7428_s1 + $0x468] sm:$0xff] }
  0xc0   : > { %4659 = vmatmul.mubr.f32.gmra.mrb[8].mxu1 %v6266_v45  ;;  %5367 = vmatprep.subr.bf16.mxu1 %v5366_v22  ;;  %v3692_v45 = vld [vmem:[%s7428_s1 + $0x1e8] sm:$0xff] }
  0xc1   : > { %4979 = vmatmul.mubr.f32.gmra.mrb[8].mxu0 %v6340_v8  ;;  %4661 = vmatprep.mubr.f32.mxu1 %v6272_v47  ;;  %v5374_v15 = vpack.c.bf16 %v3692_v45, %v3691_v19  ;;  %v3885_v47 = vld [vmem:[%s7428_s1 + $0x3f0] sm:$0xff]  ;;  %v3923_v19 = vld [vmem:[%s7428_s1 + $0x420] sm:$0xff]  ;;  %v3924_v45 = vld [vmem:[%s7428_s1 + $0x428] sm:$0xff] }
  0xc2   : > { %4981 = vmatprep.mubr.f32.mxu0 %v6353_v13  ;;  %5497 = vmatpush3.bf16.msra.mxu0 %v5494_v24  ;;  %v5506_v18 = vpack.c.bf16 %v3886_v34, %v3885_v47  ;;  %v6718_v47 = vld [vmem:[%s5960_s23 + $0x51] sm:$0xff]  ;;  %v6721_v34 = vld [vmem:[%s5960_s23 + $0x61] sm:$0xff] }
  0xc3   : > { %5369 = vmatpush3.bf16.msra.mxu1 %v5366_v22  ;;  %5499 = vmatprep.subr.bf16.mxu0 %v5498_v7 }
  0xc4   : > { %4662 = vmatmul.mubr.f32.gmra.mrb[10].mxu1 %v6294_v55  ;;  %5371 = vmatprep.subr.bf16.mxu1 %v5370_v9  ;;  %v3694_v55 = vld [vmem:[%s7428_s1 + $0x1f8] sm:$0xff] }
  0xc5   : > { %4982 = vmatmul.mubr.f32.gmra.mrb[10].mxu0 %v6368_v23  ;;  %4664 = vmatprep.mubr.f32.mxu1 %v6300_v57  ;;  %v5378_v21 = vpack.c.bf16 %v3694_v55, %v3693_v0  ;;  %v3919_v57 = vld [vmem:[%s7428_s1 + $0x400] sm:$0xff]  ;;  %v3925_v55 = vld [vmem:[%s7428_s1 + $0x430] sm:$0xff] }
  0xc6   : > { %4984 = vmatprep.mubr.f32.mxu0 %v6381_v30  ;;  %5501 = vmatpush3.bf16.msra.mxu0 %v5498_v7  ;;  %v5510_v24 = vpack.c.bf16 %v3920_v5, %v3919_v57  ;;  %v6699_v7 = vld [vmem:[%s5960_s23 + $0x49] sm:$0xff]  ;;  %v6743_v5 = vld [vmem:[%s5960_s23 + $0x79] sm:$0xff] }
  0xc7   : > { %5373 = vmatpush3.bf16.msra.mxu1 %v5370_v9  ;;  %5503 = vmatprep.subr.bf16.mxu0 %v5502_v33  ;;  %v6740_v57 = vld [vmem:[%s5960_s23 + $0x69] sm:$0xff] }
  0xc8   : > { %4665 = vmatmul.mubr.f32.gmra.mrb[12].mxu1 %v6322_v1  ;;  %5375 = vmatprep.subr.bf16.mxu1 %v5374_v15  ;;  %v3108_v1 = vld [vmem:[%s7430_s3 + $0x8] sm:$0xff] }
  0xc9   : > { %4985 = vmatmul.mubr.f32.gmra.mrb[12].mxu0 %v6394_v38  ;;  %4667 = vmatprep.mubr.f32.mxu1 %v6328_v3  ;;  %v5542_v22 = vpack.c.bf16 %v3108_v1, %v3107_v25  ;;  %v6663_v3 = vld [vmem:[%s5960_s23 + $0x180] sm:$0xff] }
  0xca   : > { %4987 = vmatprep.mubr.f32.mxu0 %v6401_v40  ;;  %5505 = vmatpush3.bf16.msra.mxu0 %v5502_v33  ;;  %v3111_v33 = vld [vmem:[%s7430_s3 + $0x20] sm:$0xff] }
  0xcb   : > { %5377 = vmatpush3.bf16.msra.mxu1 %v5374_v15  ;;  %5507 = vmatprep.subr.bf16.mxu0 %v5506_v18  ;;  %v3112_v15 = vld [vmem:[%s7430_s3 + $0x28] sm:$0xff]  ;;  %v3927_v1 = vld [vmem:[%s7428_s1 + $0x440] sm:$0xff] }
  0xcc   : > { %4668 = vmatmul.mubr.f32.gmra.mrb[14].mxu1 %v6350_v12  ;;  %5379 = vmatprep.subr.bf16.mxu1 %v5378_v21  ;;  %v7453_v12 = vld [vmem:[#allocation4_spill] sm:$0xff]  ;;  %v5550_v0 = vpack.c.bf16 %v3112_v15, %v3111_v33 }
  0xcd   : > { %4988 = vmatmul.mubr.f32.gmra.mrb[14].mxu0 %v6412_v43  ;;  %4670 = vmatprep.mubr.f32.mxu1 %v6356_v14  ;;  %v7454_v14 = vld [vmem:[#allocation9_spill] sm:$0xff]  ;;  %v3121_v33 = vld [vmem:[%s7430_s3 + $0x70] sm:$0xff] }
  0xce   : > { %4990 = vmatprep.mubr.f32.mxu0 %v6419_v48  ;;  %5509 = vmatpush3.bf16.msra.mxu0 %v5506_v18  ;;  %v3926_v18 = vld [vmem:[%s7428_s1 + $0x438] sm:$0xff]  ;;  %v6828_v15 = vld [vmem:[%s5960_s23 + $0xc9] sm:$0xff] }
  0xcf   : > { %5381 = vmatpush3.bf16.msra.mxu1 %v5378_v21  ;;  %5511 = vmatprep.subr.bf16.mxu0 %v5510_v24  ;;  %v3113_v21 = vld [vmem:[%s7430_s3 + $0x30] sm:$0xff] }
  0xd0   : > { %4671 = vmatmul.mubr.f32.gmra.mrb[16].mxu1 %v6378_v29  ;;  %5543 = vmatprep.subr.bf16.mxu1 %v5542_v22  ;;  %v7455_v29 = vld [vmem:[#allocation5_spill] sm:$0xff] }
  0xd1   : > { %4991 = vmatmul.mubr.f32.gmra.mrb[16].mxu0 %v6428_v50  ;;  %4673 = vmatprep.mubr.f32.mxu1 %v6384_v31  ;;  %v6670_v31 = vld [vmem:[%s5960_s23 + $0x188] sm:$0xff] }
  0xd2   : > { %4993 = vmatprep.mubr.f32.mxu0 %v6435_v53 }
  0xd4   : > { %4674 = vmatmul.mubr.f32.gmra.mrb[18].mxu1 %v6398_v39  ;;  %v3821_v39 = vld [vmem:[%s5960_s23 + $0x198] sm:$0xff] }
  0xd5   : > { %4994 = vmatmul.mubr.f32.gmra.mrb[18].mxu0 %v6444_v58  ;;  %4676 = vmatprep.mubr.f32.mxu1 %v6404_v41  ;;  %v7456_v41 = vld [vmem:[#allocation6_spill] sm:$0xff] }
  0xd6   : > { %4996 = vmatprep.mubr.f32.mxu0 %v6451_v60 }
  0xd8   : > { %4677 = vmatmul.mubr.f32.gmra.mrb[20].mxu1 %v6416_v44  ;;  %v7457_v44 = vld [vmem:[#allocation7_spill] sm:$0xff] }
  0xd9   : > { %4997 = vmatmul.mubr.f32.gmra.mrb[20].mxu0 %v6460_v63  ;;  %4679 = vmatprep.mubr.f32.mxu1 %v6422_v49  ;;  %v3822_v49 = vld [vmem:[%s5960_s23 + $0x1a0] sm:$0xff] }
  0xda   : > { %4999 = vmatprep.mubr.f32.mxu0 %v6467_v4 }
  0xdc   : > { %4680 = vmatmul.mubr.f32.gmra.mrb[22].mxu1 %v6432_v51  ;;  %v6678_v51 = vld [vmem:[%s5960_s23 + $0x31] sm:$0xff] }
  0xdd   : > { %5000 = vmatmul.mubr.f32.gmra.mrb[22].mxu0 %v6476_v6  ;;  %4682 = vmatprep.mubr.f32.mxu1 %v6438_v54  ;;  %v7458_v54 = vld [vmem:[#allocation8_spill] sm:$0xff] }
  0xde   : > { %5002 = vmatprep.mubr.f32.mxu0 %v6483_v10 }
  0xe0   : > { %4683 = vmatmul.mubr.f32.gmra.mrb[24].mxu1 %v6448_v59  ;;  %v3921_v59 = vld [vmem:[%s7428_s1 + $0x410] sm:$0xff] }
  0xe1   : > { %5003 = vmatmul.mubr.f32.gmra.mrb[24].mxu0 %v6492_v17  ;;  %4685 = vmatprep.mubr.f32.mxu1 %v6454_v61  ;;  %v3922_v61 = vld [vmem:[%s7428_s1 + $0x418] sm:$0xff] }
  0xe2   : > { %5005 = vmatprep.mubr.f32.mxu0 %v6499_v20  ;;  %v5514_v9 = vpack.c.bf16 %v3922_v61, %v3921_v59  ;;  %v6787_v59 = vld [vmem:[%s5960_s23 + $0xa9] sm:$0xff] }
  0xe4   : > { %4686 = vmatmul.mubr.f32.gmra.mrb[26].mxu1 %v7453_v12  ;;  %v6762_v12 = vld [vmem:[%s5960_s23 + $0x81] sm:$0xff] }
  0xe5   : > { %5006 = vmatmul.mubr.f32.gmra.mrb[26].mxu0 %v7454_v14  ;;  %4688 = vmatprep.mubr.f32.mxu1 %v7455_v29  ;;  %v6765_v29 = vld [vmem:[%s5960_s23 + $0x91] sm:$0xff] }
  0xe6   : > { %5008 = vmatprep.mubr.f32.mxu0 %v6663_v3 }
  0xe8   : > { %4689 = vmatmul.mubr.f32.gmra.mrb[28].mxu1 %v7456_v41  ;;  %v3929_v41 = vld [vmem:[%s7428_s1 + $0x450] sm:$0xff] }
  0xe9   : > { %5009 = vmatmul.mubr.f32.gmra.mrb[28].mxu0 %v6670_v31  ;;  %4691 = vmatprep.mubr.f32.mxu1 %v7457_v44  ;;  %v3930_v44 = vld [vmem:[%s7428_s1 + $0x458] sm:$0xff] }
  0xea   : > { %5011 = vmatprep.mubr.f32.mxu0 %v3821_v39 }
  0xec   : > { %4692 = vmatmul.mubr.f32.gmra.mrb[30].mxu1 %v7458_v54  ;;  %v6784_v54 = vld [vmem:[%s5960_s23 + $0x99] sm:$0xff] }
  0xed   : > { %5012 = vmatmul.mubr.f32.gmra.mrb[30].mxu0 %v3822_v49  ;;  %4726 = vmatprep.mubr.f32.mxu1 %v7459_v27  ;;  %v3117_v49 = vld [vmem:[%s7430_s3 + $0x50] sm:$0xff]  ;;  %v3931_v27 = vld [vmem:[%s7428_s1 + $0x460] sm:$0xff] }
  0xee   : > { %5046 = vmatprep.mubr.f32.mxu0 %v6678_v51 }
  0xf0   : > { %4727 = vmatmul.mubr.f32.vlgmr.msra.gmra.mrb[0].mxu1 %v7460_v37  ;;  %v6809_v37 = vld [vmem:[%s5960_s23 + $0xc1] sm:$0xff] }
  0xf1   : > { %5047 = vmatmul.mubr.f32.vlgmr.msra.gmra.mrb[0].mxu0 %v6696_v35  ;;  %4729 = vmatprep.mubr.f32.mxu1 %v6212_v26  ;;  %v5518_v26 = vpack.c.bf16 %v3924_v45, %v3923_v19  ;;  %v3933_v19 = vld [vmem:[%s7428_s1 + $0x470] sm:$0xff]  ;;  %v3934_v45 = vld [vmem:[%s7428_s1 + $0x478] sm:$0xff] }
  0xf2   : > { %5513 = vmatpush3.bf16.msra.mxu0 %v5510_v24  ;;  %5049 = vmatprep.mubr.f32.mxu0 %v6699_v7  ;;  %v3928_v24 = vld [vmem:[%s7428_s1 + $0x448] sm:$0xff] }
  0xf3   : > { %5545 = vmatpush3.bf16.msra.mxu1 %v5542_v22  ;;  %5515 = vmatprep.subr.bf16.mxu0 %v5514_v9  ;;  %v3115_v22 = vld [vmem:[%s7430_s3 + $0x40] sm:$0xff] }
  0xf4   : > { %4730 = vmatmul.mubr.f32.gmra.mrb[2].mxu1 %v6228_v32  ;;  %5547 = vmatprep.subr.bf16.mxu1 %v5546_v11  ;;  %v3114_v32 = vld [vmem:[%s7430_s3 + $0x38] sm:$0xff] }
  0xf5   : > { %5050 = vmatmul.mubr.f32.gmra.mrb[2].mxu0 %v6718_v47  ;;  %4732 = vmatprep.mubr.f32.mxu1 %v6241_v36  ;;  %v5522_v36 = vpack.c.bf16 %v3926_v18, %v3925_v55  ;;  %v5554_v25 = vpack.c.bf16 %v3114_v32, %v3113_v21  ;;  %v6838_v55 = vld [vmem:[%s5960_s23 + $0xe1] sm:$0xff]  ;;  %v6841_v18 = vld [vmem:[%s5960_s23 + $0xf1] sm:$0xff]  ;;  %v6871_v21 = vld [vmem:[%s5960_s23 + $0x139] sm:$0xff] }
  0xf6   : > { %5052 = vmatprep.mubr.f32.mxu0 %v6721_v34  ;;  %5517 = vmatpush3.bf16.msra.mxu0 %v5514_v9  ;;  %v6806_v9 = vld [vmem:[%s5960_s23 + $0xb1] sm:$0xff] }
  0xf7   : > { %5549 = vmatpush3.bf16.msra.mxu1 %v5546_v11  ;;  %5519 = vmatprep.subr.bf16.mxu0 %v5518_v26  ;;  %v3887_v32 = vld [vmem:[%s5960_s23 + $0x32] sm:$0xff] }
  0xf8   : > { %4733 = vmatmul.mubr.f32.gmra.mrb[4].mxu1 %v6256_v42  ;;  %5551 = vmatprep.subr.bf16.mxu1 %v5550_v0  ;;  %v3116_v42 = vld [vmem:[%s7430_s3 + $0x48] sm:$0xff] }
  0xf9   : > { %5053 = vmatmul.mubr.f32.gmra.mrb[4].mxu0 %v6740_v57  ;;  %4735 = vmatprep.mubr.f32.mxu1 %v6269_v46  ;;  %v5526_v46 = vpack.c.bf16 %v3928_v24, %v3927_v1  ;;  %v5558_v39 = vpack.c.bf16 %v3116_v42, %v3115_v22  ;;  %v3893_v1 = vld [vmem:[%s5960_s23 + $0x7a] sm:$0xff]  ;;  %v3895_v24 = vld [vmem:[%s5960_s23 + $0x92] sm:$0xff]  ;;  %v3902_v22 = vld [vmem:[%s5960_s23 + $0xe2] sm:$0xff] }
  0xfa   : > { %5055 = vmatprep.mubr.f32.mxu0 %v6743_v5  ;;  %5521 = vmatpush3.bf16.msra.mxu0 %v5518_v26  ;;  %v6831_v26 = vld [vmem:[%s5960_s23 + $0xd9] sm:$0xff] }
  0xfb   : > { %5553 = vmatpush3.bf16.msra.mxu1 %v5550_v0  ;;  %5523 = vmatprep.subr.bf16.mxu0 %v5522_v36  ;;  %v3903_v42 = vld [vmem:[%s5960_s23 + $0xf2] sm:$0xff] }
  0xfc   : > { %4736 = vmatmul.mubr.f32.gmra.mrb[6].mxu1 %v6284_v52  ;;  %5555 = vmatprep.subr.bf16.mxu1 %v5554_v25  ;;  %v3118_v52 = vld [vmem:[%s7430_s3 + $0x58] sm:$0xff] }
  0xfd   : > { %5056 = vmatmul.mubr.f32.gmra.mrb[6].mxu0 %v6762_v12  ;;  %4738 = vmatprep.mubr.f32.mxu1 %v6297_v56  ;;  %v5530_v56 = vpack.c.bf16 %v3930_v44, %v3929_v41  ;;  %v5562_v61 = vpack.c.bf16 %v3118_v52, %v3117_v49  ;;  %v3908_v41 = vld [vmem:[%s5960_s23 + $0x12a] sm:$0xff]  ;;  %v3909_v44 = vld [vmem:[%s5960_s23 + $0x13a] sm:$0xff]  ;;  %v3910_v49 = vld [vmem:[%s5960_s23 + $0x142] sm:$0xff] }
  0xfe   : > { %5058 = vmatprep.mubr.f32.mxu0 %v6765_v29  ;;  %5525 = vmatpush3.bf16.msra.mxu0 %v5522_v36  ;;  %v3888_v36 = vld [vmem:[%s5960_s23 + $0x3a] sm:$0xff]  ;;  %v3911_v52 = vld [vmem:[%s5960_s23 + $0x152] sm:$0xff] }
  0xff   : > { %5557 = vmatpush3.bf16.msra.mxu1 %v5554_v25  ;;  %5527 = vmatprep.subr.bf16.mxu0 %v5526_v46  ;;  %v3891_v25 = vld [vmem:[%s5960_s23 + $0x62] sm:$0xff] }
 0x100   : > { %4739 = vmatmul.mubr.f32.gmra.mrb[8].mxu1 %v6312_v62  ;;  %5559 = vmatprep.subr.bf16.mxu1 %v5558_v39  ;;  %v3120_v62 = vld [vmem:[%s7430_s3 + $0x68] sm:$0xff] }
 0x101   : > { %5059 = vmatmul.mubr.f32.gmra.mrb[8].mxu0 %v6784_v54  ;;  %4741 = vmatprep.mubr.f32.mxu1 %v6325_v2  ;;  %v5534_v2 = vpack.c.bf16 %v3932_v28, %v3931_v27  ;;  %v5566_v11 = vpack.c.bf16 %v3120_v62, %v3119_v16  ;;  %v3916_v27 = vld [vmem:[%s5960_s23 + $0x18a] sm:$0xff]  ;;  %v3917_v28 = vld [vmem:[%s5960_s23 + $0x19a] sm:$0xff]  ;;  %v3918_v16 = vld [vmem:[%s5960_s23 + $0x1a2] sm:$0xff] }
 0x102   : > { %5061 = vmatprep.mubr.f32.mxu0 %v6787_v59  ;;  %5529 = vmatpush3.bf16.msra.mxu0 %v5526_v46  ;;  %v3906_v46 = vld [vmem:[%s5960_s23 + $0x112] sm:$0xff] }
 0x103   : > { %5561 = vmatpush3.bf16.msra.mxu1 %v5558_v39  ;;  %5531 = vmatprep.subr.bf16.mxu0 %v5530_v56  ;;  %v3907_v39 = vld [vmem:[%s5960_s23 + $0x122] sm:$0xff] }
 0x104   : > { %4742 = vmatmul.mubr.f32.gmra.mrb[10].mxu1 %v6340_v8  ;;  %5563 = vmatprep.subr.bf16.mxu1 %v5562_v61  ;;  %v3122_v8 = vld [vmem:[%s7430_s3 + $0x78] sm:$0xff] }
 0x105   : > { %5062 = vmatmul.mubr.f32.gmra.mrb[10].mxu0 %v6806_v9  ;;  %4744 = vmatprep.mubr.f32.mxu1 %v6353_v13  ;;  %v5538_v13 = vpack.c.bf16 %v3934_v45, %v3933_v19  ;;  %v5570_v0 = vpack.c.bf16 %v3122_v8, %v3121_v33 }
 0x106   : > { %5064 = vmatprep.mubr.f32.mxu0 %v6809_v37  ;;  %5533 = vmatpush3.bf16.msra.mxu0 %v5530_v56  ;;  %v3914_v56 = vld [vmem:[%s5960_s23 + $0x172] sm:$0xff] }
 0x107   : > { %5565 = vmatpush3.bf16.msra.mxu1 %v5562_v61  ;;  %5535 = vmatprep.subr.bf16.mxu0 %v5534_v2  ;;  %v3915_v61 = vld [vmem:[%s5960_s23 + $0x182] sm:$0xff] }
 0x108   : > { %4745 = vmatmul.mubr.f32.gmra.mrb[12].mxu1 %v6368_v23  ;;  %5567 = vmatprep.subr.bf16.mxu1 %v5566_v11  ;;  %v6848_v23 = vld [vmem:[%s5960_s23 + $0xf9] sm:$0xff] }
 0x109   : > { %5065 = vmatmul.mubr.f32.gmra.mrb[12].mxu0 %v6828_v15  ;;  %4747 = vmatprep.mubr.f32.mxu1 %v6381_v30  ;;  %v6851_v30 = vld [vmem:[%s5960_s23 + $0x109] sm:$0xff] }
 0x10a   : > { %5067 = vmatprep.mubr.f32.mxu0 %v6831_v26  ;;  %5537 = vmatpush3.bf16.msra.mxu0 %v5534_v2 }
 0x10b   : > { %5569 = vmatpush3.bf16.msra.mxu1 %v5566_v11  ;;  %5539 = vmatprep.subr.bf16.mxu0 %v5538_v13 }
 0x10c   : > { %4748 = vmatmul.mubr.f32.gmra.mrb[14].mxu1 %v6394_v38  ;;  %5571 = vmatprep.subr.bf16.mxu1 %v5570_v0  ;;  %v6858_v38 = vld [vmem:[%s5960_s23 + $0x111] sm:$0xff] }
 0x10d   : > { %5068 = vmatmul.mubr.f32.gmra.mrb[14].mxu0 %v6838_v55  ;;  %4750 = vmatprep.mubr.f32.mxu1 %v6401_v40  ;;  %v6861_v40 = vld [vmem:[%s5960_s23 + $0x121] sm:$0xff] }
 0x10e   : > { %5070 = vmatprep.mubr.f32.mxu0 %v6841_v18  ;;  %5541 = vmatpush3.bf16.msra.mxu0 %v5538_v13 }
 0x10f   : > { %5573 = vmatpush3.bf16.msra.mxu1 %v5570_v0 }
 0x110   : > { %4751 = vmatmul.mubr.f32.gmra.mrb[16].mxu1 %v6412_v43  ;;  %v6868_v43 = vld [vmem:[%s5960_s23 + $0x129] sm:$0xff] }
 0x111   : > { %5071 = vmatmul.mubr.f32.gmra.mrb[16].mxu0 %v6848_v23  ;;  %4753 = vmatprep.mubr.f32.mxu1 %v6419_v48  ;;  %v6878_v48 = vld [vmem:[%s5960_s23 + $0x141] sm:$0xff] }
 0x112   : > { %5073 = vmatprep.mubr.f32.mxu0 %v6851_v30 }
 0x114   : > { %4754 = vmatmul.mubr.f32.gmra.mrb[18].mxu1 %v6428_v50  ;;  %v6881_v50 = vld [vmem:[%s5960_s23 + $0x151] sm:$0xff] }
 0x115   : > { %5074 = vmatmul.mubr.f32.gmra.mrb[18].mxu0 %v6858_v38  ;;  %4756 = vmatprep.mubr.f32.mxu1 %v6435_v53  ;;  %v6888_v53 = vld [vmem:[%s5960_s23 + $0x159] sm:$0xff] }
 0x116   : > { %5076 = vmatprep.mubr.f32.mxu0 %v6861_v40 }
 0x118   : > { %4757 = vmatmul.mubr.f32.gmra.mrb[20].mxu1 %v6444_v58  ;;  %v6891_v58 = vld [vmem:[%s5960_s23 + $0x169] sm:$0xff] }
 0x119   : > { %5077 = vmatmul.mubr.f32.gmra.mrb[20].mxu0 %v6868_v43  ;;  %4759 = vmatprep.mubr.f32.mxu1 %v6451_v60  ;;  %v6898_v60 = vld [vmem:[%s5960_s23 + $0x171] sm:$0xff] }
 0x11a   : > { %5079 = vmatprep.mubr.f32.mxu0 %v6871_v21 }
 0x11c   : > { %4760 = vmatmul.mubr.f32.gmra.mrb[22].mxu1 %v6460_v63  ;;  %v6901_v63 = vld [vmem:[%s5960_s23 + $0x181] sm:$0xff] }
 0x11d   : > { %5080 = vmatmul.mubr.f32.gmra.mrb[22].mxu0 %v6878_v48  ;;  %4762 = vmatprep.mubr.f32.mxu1 %v6467_v4  ;;  %v6908_v4 = vld [vmem:[%s5960_s23 + $0x189] sm:$0xff] }
 0x11e   : > { %5082 = vmatprep.mubr.f32.mxu0 %v6881_v50 }
 0x120   : > { %4763 = vmatmul.mubr.f32.gmra.mrb[24].mxu1 %v6476_v6  ;;  %v3869_v6 = vld [vmem:[%s5960_s23 + $0x199] sm:$0xff] }
 0x121   : > { %5083 = vmatmul.mubr.f32.gmra.mrb[24].mxu0 %v6888_v53  ;;  %4765 = vmatprep.mubr.f32.mxu1 %v6483_v10  ;;  %v3870_v10 = vld [vmem:[%s5960_s23 + $0x1a1] sm:$0xff] }
 0x122   : > { %5085 = vmatprep.mubr.f32.mxu0 %v6891_v58 }
 0x124   : > { %4766 = vmatmul.mubr.f32.gmra.mrb[26].mxu1 %v6492_v17  ;;  %v3936_v17 = vld [vmem:[%s5960_s23 + $0x19] sm:$0xff] }
 0x125   : > { %5086 = vmatmul.mubr.f32.gmra.mrb[26].mxu0 %v6898_v60  ;;  %4768 = vmatprep.mubr.f32.mxu1 %v6499_v20  ;;  %v3937_v20 = vld [vmem:[%s5960_s23 + $0x21] sm:$0xff] }
 0x126   : > { %5088 = vmatprep.mubr.f32.mxu0 %v6901_v63 }
 0x128   : > { %4769 = vmatmul.mubr.f32.gmra.mrb[28].mxu1 %v7454_v14  ;;  %v3889_v14 = vld [vmem:[%s5960_s23 + $0x4a] sm:$0xff] }
 0x129   : > { %5089 = vmatmul.mubr.f32.gmra.mrb[28].mxu0 %v6908_v4  ;;  %4771 = vmatprep.mubr.f32.mxu1 %v6663_v3  ;;  %v3890_v3 = vld [vmem:[%s5960_s23 + $0x52] sm:$0xff] }
 0x12a   : > { %5091 = vmatprep.mubr.f32.mxu0 %v3869_v6 }
 0x12c   : > { %4772 = vmatmul.mubr.f32.gmra.mrb[30].mxu1 %v6670_v31  ;;  %v3892_v31 = vld [vmem:[%s5960_s23 + $0x6a] sm:$0xff] }
 0x12d   : > { %5092 = vmatmul.mubr.f32.gmra.mrb[30].mxu0 %v3870_v10  ;;  %5206 = vmatprep.mubr.f32.mxu1 %v3936_v17 }
 0x12e   : > { %5126 = vmatprep.mubr.f32.mxu0 %v3887_v32 }
 0x130   : > { %5207 = vmatmul.mubr.f32.vlgmr.msra.gmra.mrb[32].mxu1 %v3937_v20  ;;  %v7040_v20 = vld [vmem:[%s7431_s4] ss:$0 sm:$0xff] }
 0x131   : > { %5127 = vmatmul.mubr.f32.vlgmr.msra.gmra.mrb[0].mxu0 %v3888_v36  ;;  %5209 = vmatprep.mubr.f32.mxu1 %v6678_v51  ;;  %v3894_v51 = vld [vmem:[%s5960_s23 + $0x82] sm:$0xff] }
 0x132   : > { %5129 = vmatprep.mubr.f32.mxu0 %v3889_v14 }
 0x134   : > { %5210 = vmatmul.mubr.f32.gmra.mrb[34].mxu1 %v6696_v35  ;;  %v3896_v35 = vld [vmem:[%s5960_s23 + $0x9a] sm:$0xff] }
 0x135   : > { %5130 = vmatmul.mubr.f32.gmra.mrb[2].mxu0 %v3890_v3  ;;  %5212 = vmatprep.mubr.f32.mxu1 %v6699_v7  ;;  %v3897_v7 = vld [vmem:[%s5960_s23 + $0xaa] sm:$0xff]  ;;  %v7050_v3 = vld [vmem:[%s7429_s2] ss:$0 sm:$0xff] }
 0x136   : > { %5132 = vmatprep.mubr.f32.mxu0 %v3891_v25 }
 0x138   : > { %5213 = vmatmul.mubr.f32.gmra.mrb[36].mxu1 %v6718_v47  ;;  %v3898_v47 = vld [vmem:[%s5960_s23 + $0xb2] sm:$0xff] }
 0x139   : > { %5133 = vmatmul.mubr.f32.gmra.mrb[4].mxu0 %v3892_v31  ;;  %5215 = vmatprep.mubr.f32.mxu1 %v6721_v34  ;;  %v3899_v34 = vld [vmem:[%s5960_s23 + $0xc2] sm:$0xff] }
 0x13a   : > { %5135 = vmatprep.mubr.f32.mxu0 %v3893_v1 }
 0x13c   : > { %5216 = vmatmul.mubr.f32.gmra.mrb[38].mxu1 %v6740_v57  ;;  %v3900_v57 = vld [vmem:[%s5960_s23 + $0xca] sm:$0xff] }
 0x13d   : > { %5136 = vmatmul.mubr.f32.gmra.mrb[6].mxu0 %v3894_v51  ;;  %5218 = vmatprep.mubr.f32.mxu1 %v6743_v5  ;;  %v3901_v5 = vld [vmem:[%s5960_s23 + $0xda] sm:$0xff] }
 0x13e   : > { %5138 = vmatprep.mubr.f32.mxu0 %v3895_v24 }
 0x140   : > { %5219 = vmatmul.mubr.f32.gmra.mrb[40].mxu1 %v6762_v12  ;;  %v3904_v12 = vld [vmem:[%s5960_s23 + $0xfa] sm:$0xff] }
 0x141   : > { %5139 = vmatmul.mubr.f32.gmra.mrb[8].mxu0 %v3896_v35  ;;  %5221 = vmatprep.mubr.f32.mxu1 %v6765_v29  ;;  %v3905_v29 = vld [vmem:[%s5960_s23 + $0x10a] sm:$0xff] }
 0x142   : > { %5141 = vmatprep.mubr.f32.mxu0 %v3897_v7 }
 0x144   : > { %5222 = vmatmul.mubr.f32.gmra.mrb[42].mxu1 %v6784_v54  ;;  %v3912_v54 = vld [vmem:[%s5960_s23 + $0x15a] sm:$0xff] }
 0x145   : > { %5142 = vmatmul.mubr.f32.gmra.mrb[10].mxu0 %v3898_v47  ;;  %5224 = vmatprep.mubr.f32.mxu1 %v6787_v59  ;;  %v3913_v59 = vld [vmem:[%s5960_s23 + $0x16a] sm:$0xff]  ;;  %s3972_s23 = sshll.u32 %s5933_s25, 8 }
 0x146   : > { %5144 = vmatprep.mubr.f32.mxu0 %v3899_v34  ;;  %s7045_s9 = scalar_lea.vmem %s7433_s6, %s3972_s23  ;;  %s7057_s13 = scalar_lea.vmem %s7432_s5, %s3972_s23 }
 0x148   : > { %5225 = vmatmul.mubr.f32.gmra.mrb[44].mxu1 %v6806_v9 }
 0x149   : > { %5145 = vmatmul.mubr.f32.gmra.mrb[12].mxu0 %v3900_v57  ;;  %5227 = vmatprep.mubr.f32.mxu1 %v6809_v37 }
 0x14a   : > { %5147 = vmatprep.mubr.f32.mxu0 %v3901_v5 }
 0x14c   : > { %5228 = vmatmul.mubr.f32.gmra.mrb[46].mxu1 %v6828_v15 }
 0x14d   : > { %5148 = vmatmul.mubr.f32.gmra.mrb[14].mxu0 %v3902_v22  ;;  %5230 = vmatprep.mubr.f32.mxu1 %v6831_v26 }
 0x14e   : > { %5150 = vmatprep.mubr.f32.mxu0 %v3903_v42 }
 0x150   : > { %5231 = vmatmul.mubr.f32.gmra.mrb[48].mxu1 %v6838_v55 }
 0x151   : > { %5151 = vmatmul.mubr.f32.gmra.mrb[16].mxu0 %v3904_v12  ;;  %5233 = vmatprep.mubr.f32.mxu1 %v6841_v18 }
 0x152   : > { %5153 = vmatprep.mubr.f32.mxu0 %v3905_v29 }
 0x154   : > { %5234 = vmatmul.mubr.f32.gmra.mrb[50].mxu1 %v6848_v23 }
 0x155   : > { %5154 = vmatmul.mubr.f32.gmra.mrb[18].mxu0 %v3906_v46  ;;  %5236 = vmatprep.mubr.f32.mxu1 %v6851_v30 }
 0x156   : > { %5156 = vmatprep.mubr.f32.mxu0 %v3907_v39 }
 0x158   : > { %5237 = vmatmul.mubr.f32.gmra.mrb[52].mxu1 %v6858_v38 }
 0x159   : > { %5157 = vmatmul.mubr.f32.gmra.mrb[20].mxu0 %v3908_v41  ;;  %5239 = vmatprep.mubr.f32.mxu1 %v6861_v40 }
 0x15a   : > { %5159 = vmatprep.mubr.f32.mxu0 %v3909_v44 }
 0x15c   : > { %5240 = vmatmul.mubr.f32.gmra.mrb[54].mxu1 %v6868_v43 }
 0x15d   : > { %5160 = vmatmul.mubr.f32.gmra.mrb[22].mxu0 %v3910_v49  ;;  %5242 = vmatprep.mubr.f32.mxu1 %v6871_v21 }
 0x15e   : > { %5162 = vmatprep.mubr.f32.mxu0 %v3911_v52 }
 0x160   : > { %5243 = vmatmul.mubr.f32.gmra.mrb[56].mxu1 %v6878_v48 }
 0x161   : > { %5163 = vmatmul.mubr.f32.gmra.mrb[24].mxu0 %v3912_v54  ;;  %5245 = vmatprep.mubr.f32.mxu1 %v6881_v50 }
 0x162   : > { %5165 = vmatprep.mubr.f32.mxu0 %v3913_v59 }
 0x164   : > { %5246 = vmatmul.mubr.f32.gmra.mrb[58].mxu1 %v6888_v53 }
 0x165   : > { %5166 = vmatmul.mubr.f32.gmra.mrb[26].mxu0 %v3914_v56  ;;  %5248 = vmatprep.mubr.f32.mxu1 %v6891_v58 }
 0x166   : > { %5168 = vmatprep.mubr.f32.mxu0 %v3915_v61 }
 0x168   : > { %5249 = vmatmul.mubr.f32.gmra.mrb[60].mxu1 %v6898_v60 }
 0x169   : > { %5169 = vmatmul.mubr.f32.gmra.mrb[28].mxu0 %v3916_v27  ;;  %5251 = vmatprep.mubr.f32.mxu1 %v6901_v63 }
 0x16a   : > { %5171 = vmatprep.mubr.f32.mxu0 %v3917_v28 }
 0x16c   : > { %5252 = vmatmul.mubr.f32.gmra.mrb[62].mxu1 %v6908_v4 }
 0x16d   : > { %5172 = vmatmul.mubr.f32.gmra.mrb[30].mxu0 %v3918_v16 }
 0x1c3   : > { %v4728_v62 = vpop.f32.mrb[0].mxu1 }
 0x1c4   : > { %v1282_v9 = vpop.f32.mrb[1].mxu1 }
 0x1c7   : > { %v4731_v37 = vpop.f32.mrb[2].mxu1 }
 0x1c8   : > { %v1292_v2 = vpop.f32.mrb[3].mxu1 }
 0x1cb   : > { %v6980_v11 = vpop.f32.mrb[4].mxu1 }
 0x1cc   : > { %v6982_v19 = vpop.f32.mrb[5].mxu1 }
 0x1cf   : > { %v6984_v45 = vpop.f32.mrb[6].mxu1 }
 0x1d0   : > { %v6986_v33 = vpop.f32.mrb[7].mxu1 }
 0x1d3   : > { %v6988_v8 = vpop.f32.mrb[8].mxu1 }
 0x1d4   : > { %v6990_v15 = vpop.f32.mrb[9].mxu1 }
 0x1d7   : > { %v6992_v26 = vpop.f32.mrb[10].mxu1 }
 0x1d8   : > { %v6994_v13 = vpop.f32.mrb[11].mxu1 }
 0x1db   : > { %v6996_v0 = vpop.f32.mrb[12].mxu1 }
 0x1dc   : > { %v6998_v55 = vpop.f32.mrb[13].mxu1 }
 0x1df   : > { %v7000_v18 = vpop.f32.mrb[14].mxu1 }
 0x1e0   : > { %v7002_v23 = vpop.f32.mrb[15].mxu1 }
 0x1e3   : > { %v7004_v30 = vpop.f32.mrb[16].mxu1 }
 0x1e4   : > { %v7006_v38 = vpop.f32.mrb[17].mxu1 }
 0x1e7   : > { %v7008_v40 = vpop.f32.mrb[18].mxu1 }
 0x1e8   : > { %v7010_v43 = vpop.f32.mrb[19].mxu1 }
 0x1eb   : > { %v7012_v21 = vpop.f32.mrb[20].mxu1 }
 0x1ec   : > { %v7014_v48 = vpop.f32.mrb[21].mxu1 }
 0x1ef   : > { %v7016_v50 = vpop.f32.mrb[22].mxu1 }
 0x1f0   : > { %v7018_v53 = vpop.f32.mrb[23].mxu1 }
 0x1f3   : > { %v7020_v58 = vpop.f32.mrb[24].mxu1 }
 0x1f4   : > { %v7022_v60 = vpop.f32.mrb[25].mxu1 }
 0x1f7   : > { %v7024_v63 = vpop.f32.mrb[26].mxu1 }
 0x1f8   : > { %v7026_v4 = vpop.f32.mrb[27].mxu1 }
 0x1fb   : > { %v7028_v6 = vpop.f32.mrb[28].mxu1 }
 0x1fc   : > { %v7030_v10 = vpop.f32.mrb[29].mxu1 }
 0x1ff   : > { %v7032_v17 = vpop.f32.mrb[30].mxu1 }
 0x200   : > { %v7034_v32 = vpop.f32.mrb[31].mxu1 }
 0x203   : > { %v5208_v36 = vpop.f32.mrb[32].mxu1 }
 0x204   : > { %v5128_v14 = vpop.f32.mrb[0].mxu0  ;;  %v3202_v25 = vadd.f32 %v5208_v36, %v7040_v20  ;;  %v3196_v31 = vpop.f32.mrb[33].mxu1 }
 0x205   : > { %v5574_v1 = vadd.f32 %v5128_v14, %v4728_v62  ;;  %v2813_v51 = vpop.f32.mrb[1].mxu0  ;;  %v3197_v24 = vadd.f32 %v7040_v20, %v3196_v31 }
 0x206   : > { %v5575_v35 = vadd.f32 %v2813_v51, %v1282_v9  ;;  %3356 = vst [vmem:[%s7045_s9 + $0x8] sm:$0xff] %v3202_v25 }
 0x207   : > { %v7061_v7 = vadd.f32 %v5574_v1, %v7050_v3  ;;  %3355 = vst [vmem:[%s7045_s9] sm:$0xff] %v3197_v24  ;;  %v5211_v47 = vpop.f32.mrb[34].mxu1 }
 0x208   : > { %v7065_v34 = vadd.f32 %v5575_v35, %v7050_v3  ;;  %v5131_v57 = vpop.f32.mrb[2].mxu0  ;;  %v3212_v5 = vadd.f32 %v5211_v47, %v7040_v20  ;;  %v3206_v22 = vpop.f32.mrb[35].mxu1 }
 0x209   : > { %3044 = vst [vmem:[%s7057_s13 + $0x8] sm:$0xff] %v7061_v7  ;;  %v5576_v42 = vadd.f32 %v5131_v57, %v4731_v37  ;;  %v2823_v12 = vpop.f32.mrb[3].mxu0  ;;  %v3207_v29 = vadd.f32 %v7040_v20, %v3206_v22 }
 0x20a   : > { %3043 = vst [vmem:[%s7057_s13] sm:$0xff] %v7065_v34  ;;  %v5577_v46 = vadd.f32 %v2823_v12, %v1292_v2  ;;  %3358 = vst [vmem:[%s7045_s9 + $0x18] sm:$0xff] %v3212_v5 }
 0x20b   : > { %v7075_v39 = vadd.f32 %v5576_v42, %v7050_v3  ;;  %3357 = vst [vmem:[%s7045_s9 + $0x10] sm:$0xff] %v3207_v29  ;;  %v5214_v41 = vpop.f32.mrb[36].mxu1 }
 0x20c   : > { %v7079_v44 = vadd.f32 %v5577_v46, %v7050_v3  ;;  %v5134_v49 = vpop.f32.mrb[4].mxu0  ;;  %v3222_v52 = vadd.f32 %v5214_v41, %v7040_v20  ;;  %v3216_v54 = vpop.f32.mrb[37].mxu1 }
 0x20d   : > { %3046 = vst [vmem:[%s7057_s13 + $0x18] sm:$0xff] %v7075_v39  ;;  %v5578_v59 = vadd.f32 %v5134_v49, %v6980_v11  ;;  %v2833_v56 = vpop.f32.mrb[5].mxu0  ;;  %v3217_v61 = vadd.f32 %v7040_v20, %v3216_v54 }
 0x20e   : > { %3045 = vst [vmem:[%s7057_s13 + $0x10] sm:$0xff] %v7079_v44  ;;  %v5579_v27 = vadd.f32 %v2833_v56, %v6982_v19  ;;  %3360 = vst [vmem:[%s7045_s9 + $0x28] sm:$0xff] %v3222_v52 }
 0x20f   : > { %v7091_v28 = vadd.f32 %v5578_v59, %v7050_v3  ;;  %3359 = vst [vmem:[%s7045_s9 + $0x20] sm:$0xff] %v3217_v61  ;;  %v5217_v16 = vpop.f32.mrb[38].mxu1 }
 0x210   : > { %v7095_v62 = vadd.f32 %v5579_v27, %v7050_v3  ;;  %v5137_v9 = vpop.f32.mrb[6].mxu0  ;;  %v3232_v37 = vadd.f32 %v5217_v16, %v7040_v20  ;;  %v3226_v2 = vpop.f32.mrb[39].mxu1 }
 0x211   : > { %3048 = vst [vmem:[%s7057_s13 + $0x28] sm:$0xff] %v7091_v28  ;;  %v5580_v11 = vadd.f32 %v5137_v9, %v6984_v45  ;;  %v2843_v19 = vpop.f32.mrb[7].mxu0  ;;  %v3227_v36 = vadd.f32 %v7040_v20, %v3226_v2 }
 0x212   : > { %3047 = vst [vmem:[%s7057_s13 + $0x20] sm:$0xff] %v7095_v62  ;;  %v5581_v14 = vadd.f32 %v2843_v19, %v6986_v33  ;;  %3362 = vst [vmem:[%s7045_s9 + $0x38] sm:$0xff] %v3232_v37 }
 0x213   : > { %v7107_v25 = vadd.f32 %v5580_v11, %v7050_v3  ;;  %3361 = vst [vmem:[%s7045_s9 + $0x30] sm:$0xff] %v3227_v36  ;;  %v5220_v31 = vpop.f32.mrb[40].mxu1 }
 0x214   : > { %v7111_v1 = vadd.f32 %v5581_v14, %v7050_v3  ;;  %v5140_v45 = vpop.f32.mrb[8].mxu0  ;;  %v3242_v51 = vadd.f32 %v5220_v31, %v7040_v20  ;;  %v3236_v24 = vpop.f32.mrb[41].mxu1 }
 0x215   : > { %3050 = vst [vmem:[%s7057_s13 + $0x38] sm:$0xff] %v7107_v25  ;;  %v5582_v35 = vadd.f32 %v5140_v45, %v6988_v8  ;;  %v2853_v33 = vpop.f32.mrb[9].mxu0  ;;  %v3237_v47 = vadd.f32 %v7040_v20, %v3236_v24 }
 0x216   : > { %3049 = vst [vmem:[%s7057_s13 + $0x30] sm:$0xff] %v7111_v1  ;;  %v5583_v57 = vadd.f32 %v2853_v33, %v6990_v15  ;;  %3364 = vst [vmem:[%s7045_s9 + $0x48] sm:$0xff] %v3242_v51 }
 0x217   : > { %v7123_v5 = vadd.f32 %v5582_v35, %v7050_v3  ;;  %3363 = vst [vmem:[%s7045_s9 + $0x40] sm:$0xff] %v3237_v47  ;;  %v5223_v22 = vpop.f32.mrb[42].mxu1 }
 0x218   : > { %v7127_v42 = vadd.f32 %v5583_v57, %v7050_v3  ;;  %v5143_v8 = vpop.f32.mrb[10].mxu0  ;;  %v3252_v12 = vadd.f32 %v5223_v22, %v7040_v20  ;;  %v3246_v29 = vpop.f32.mrb[43].mxu1 }
 0x219   : > { %3052 = vst [vmem:[%s7057_s13 + $0x48] sm:$0xff] %v7123_v5  ;;  %v5584_v46 = vadd.f32 %v5143_v8, %v6992_v26  ;;  %v2863_v15 = vpop.f32.mrb[11].mxu0  ;;  %v3247_v41 = vadd.f32 %v7040_v20, %v3246_v29 }
 0x21a   : > { %3051 = vst [vmem:[%s7057_s13 + $0x40] sm:$0xff] %v7127_v42  ;;  %v5585_v49 = vadd.f32 %v2863_v15, %v6994_v13  ;;  %3366 = vst [vmem:[%s7045_s9 + $0x58] sm:$0xff] %v3252_v12 }
 0x21b   : > { %v7139_v52 = vadd.f32 %v5584_v46, %v7050_v3  ;;  %3365 = vst [vmem:[%s7045_s9 + $0x50] sm:$0xff] %v3247_v41  ;;  %v5226_v54 = vpop.f32.mrb[44].mxu1 }
 0x21c   : > { %v7143_v59 = vadd.f32 %v5585_v49, %v7050_v3  ;;  %v5146_v26 = vpop.f32.mrb[12].mxu0  ;;  %v3262_v56 = vadd.f32 %v5226_v54, %v7040_v20  ;;  %v3256_v61 = vpop.f32.mrb[45].mxu1 }
 0x21d   : > { %3054 = vst [vmem:[%s7057_s13 + $0x58] sm:$0xff] %v7139_v52  ;;  %v5586_v27 = vadd.f32 %v5146_v26, %v6996_v0  ;;  %v2873_v13 = vpop.f32.mrb[13].mxu0  ;;  %v3257_v16 = vadd.f32 %v7040_v20, %v3256_v61 }
 0x21e   : > { %3053 = vst [vmem:[%s7057_s13 + $0x50] sm:$0xff] %v7143_v59  ;;  %v5587_v9 = vadd.f32 %v2873_v13, %v6998_v55  ;;  %3368 = vst [vmem:[%s7045_s9 + $0x68] sm:$0xff] %v3262_v56 }
 0x21f   : > { %v7155_v37 = vadd.f32 %v5586_v27, %v7050_v3  ;;  %3367 = vst [vmem:[%s7045_s9 + $0x60] sm:$0xff] %v3257_v16  ;;  %v5229_v2 = vpop.f32.mrb[46].mxu1 }
 0x220   : > { %v7159_v11 = vadd.f32 %v5587_v9, %v7050_v3  ;;  %v5149_v0 = vpop.f32.mrb[14].mxu0  ;;  %v3272_v19 = vadd.f32 %v5229_v2, %v7040_v20  ;;  %v3266_v36 = vpop.f32.mrb[47].mxu1 }
 0x221   : > { %3056 = vst [vmem:[%s7057_s13 + $0x68] sm:$0xff] %v7155_v37  ;;  %v5588_v14 = vadd.f32 %v5149_v0, %v7000_v18  ;;  %v2883_v55 = vpop.f32.mrb[15].mxu0  ;;  %v3267_v31 = vadd.f32 %v7040_v20, %v3266_v36 }
 0x222   : > { %3055 = vst [vmem:[%s7057_s13 + $0x60] sm:$0xff] %v7159_v11  ;;  %v5589_v45 = vadd.f32 %v2883_v55, %v7002_v23  ;;  %3370 = vst [vmem:[%s7045_s9 + $0x78] sm:$0xff] %v3272_v19 }
 0x223   : > { %v7171_v51 = vadd.f32 %v5588_v14, %v7050_v3  ;;  %3369 = vst [vmem:[%s7045_s9 + $0x70] sm:$0xff] %v3267_v31  ;;  %v5232_v24 = vpop.f32.mrb[48].mxu1 }
 0x224   : > { %v7175_v35 = vadd.f32 %v5589_v45, %v7050_v3  ;;  %v5152_v18 = vpop.f32.mrb[16].mxu0  ;;  %v3282_v33 = vadd.f32 %v5232_v24, %v7040_v20  ;;  %v3276_v47 = vpop.f32.mrb[49].mxu1 }
 0x225   : > { %3058 = vst [vmem:[%s7057_s13 + $0x78] sm:$0xff] %v7171_v51  ;;  %v5590_v57 = vadd.f32 %v5152_v18, %v7004_v30  ;;  %v2893_v23 = vpop.f32.mrb[17].mxu0  ;;  %v3277_v22 = vadd.f32 %v7040_v20, %v3276_v47 }
 0x226   : > { %3057 = vst [vmem:[%s7057_s13 + $0x70] sm:$0xff] %v7175_v35  ;;  %v5591_v8 = vadd.f32 %v2893_v23, %v7006_v38  ;;  %3372 = vst [vmem:[%s7045_s9 + $0x88] sm:$0xff] %v3282_v33 }
 0x227   : > { %v7187_v12 = vadd.f32 %v5590_v57, %v7050_v3  ;;  %3371 = vst [vmem:[%s7045_s9 + $0x80] sm:$0xff] %v3277_v22  ;;  %v5235_v29 = vpop.f32.mrb[50].mxu1 }
 0x228   : > { %v7191_v46 = vadd.f32 %v5591_v8, %v7050_v3  ;;  %v5155_v30 = vpop.f32.mrb[18].mxu0  ;;  %v3292_v15 = vadd.f32 %v5235_v29, %v7040_v20  ;;  %v3286_v41 = vpop.f32.mrb[51].mxu1 }
 0x229   : > { %3060 = vst [vmem:[%s7057_s13 + $0x88] sm:$0xff] %v7187_v12  ;;  %v5592_v49 = vadd.f32 %v5155_v30, %v7008_v40  ;;  %v2903_v38 = vpop.f32.mrb[19].mxu0  ;;  %v3287_v54 = vadd.f32 %v7040_v20, %v3286_v41 }
 0x22a   : > { %3059 = vst [vmem:[%s7057_s13 + $0x80] sm:$0xff] %v7191_v46  ;;  %v5593_v26 = vadd.f32 %v2903_v38, %v7010_v43  ;;  %3374 = vst [vmem:[%s7045_s9 + $0x98] sm:$0xff] %v3292_v15 }
 0x22b   : > { %v7203_v56 = vadd.f32 %v5592_v49, %v7050_v3  ;;  %3373 = vst [vmem:[%s7045_s9 + $0x90] sm:$0xff] %v3287_v54  ;;  %v5238_v61 = vpop.f32.mrb[52].mxu1 }
 0x22c   : > { %v7207_v27 = vadd.f32 %v5593_v26, %v7050_v3  ;;  %v5158_v40 = vpop.f32.mrb[20].mxu0  ;;  %v3302_v13 = vadd.f32 %v5238_v61, %v7040_v20  ;;  %v3296_v16 = vpop.f32.mrb[53].mxu1 }
 0x22d   : > { %3062 = vst [vmem:[%s7057_s13 + $0x98] sm:$0xff] %v7203_v56  ;;  %v5594_v9 = vadd.f32 %v5158_v40, %v7012_v21  ;;  %v2913_v43 = vpop.f32.mrb[21].mxu0  ;;  %v3297_v2 = vadd.f32 %v7040_v20, %v3296_v16 }
 0x22e   : > { %3061 = vst [vmem:[%s7057_s13 + $0x90] sm:$0xff] %v7207_v27  ;;  %v5595_v0 = vadd.f32 %v2913_v43, %v7014_v48  ;;  %3376 = vst [vmem:[%s7045_s9 + $0xa8] sm:$0xff] %v3302_v13 }
 0x22f   : > { %v7219_v19 = vadd.f32 %v5594_v9, %v7050_v3  ;;  %3375 = vst [vmem:[%s7045_s9 + $0xa0] sm:$0xff] %v3297_v2  ;;  %v5241_v36 = vpop.f32.mrb[54].mxu1 }
 0x230   : > { %v7223_v14 = vadd.f32 %v5595_v0, %v7050_v3  ;;  %v5161_v21 = vpop.f32.mrb[22].mxu0  ;;  %v3312_v55 = vadd.f32 %v5241_v36, %v7040_v20  ;;  %v3306_v31 = vpop.f32.mrb[55].mxu1 }
 0x231   : > { %3064 = vst [vmem:[%s7057_s13 + $0xa8] sm:$0xff] %v7219_v19  ;;  %v5596_v45 = vadd.f32 %v5161_v21, %v7016_v50  ;;  %v2923_v48 = vpop.f32.mrb[23].mxu0  ;;  %v3307_v24 = vadd.f32 %v7040_v20, %v3306_v31 }
 0x232   : > { %3063 = vst [vmem:[%s7057_s13 + $0xa0] sm:$0xff] %v7223_v14  ;;  %v5597_v18 = vadd.f32 %v2923_v48, %v7018_v53  ;;  %3378 = vst [vmem:[%s7045_s9 + $0xb8] sm:$0xff] %v3312_v55 }
 0x233   : > { %v7235_v33 = vadd.f32 %v5596_v45, %v7050_v3  ;;  %3377 = vst [vmem:[%s7045_s9 + $0xb0] sm:$0xff] %v3307_v24  ;;  %v5244_v47 = vpop.f32.mrb[56].mxu1 }
 0x234   : > { %v7239_v57 = vadd.f32 %v5597_v18, %v7050_v3  ;;  %v5164_v50 = vpop.f32.mrb[24].mxu0  ;;  %v3322_v23 = vadd.f32 %v5244_v47, %v7040_v20  ;;  %v3316_v22 = vpop.f32.mrb[57].mxu1 }
 0x235   : > { %3066 = vst [vmem:[%s7057_s13 + $0xb8] sm:$0xff] %v7235_v33  ;;  %v5598_v8 = vadd.f32 %v5164_v50, %v7020_v58  ;;  %v2933_v53 = vpop.f32.mrb[25].mxu0  ;;  %v3317_v29 = vadd.f32 %v7040_v20, %v3316_v22 }
 0x236   : > { %3065 = vst [vmem:[%s7057_s13 + $0xb0] sm:$0xff] %v7239_v57  ;;  %v5599_v30 = vadd.f32 %v2933_v53, %v7022_v60  ;;  %3380 = vst [vmem:[%s7045_s9 + $0xc8] sm:$0xff] %v3322_v23 }
 0x237   : > { %v7251_v15 = vadd.f32 %v5598_v8, %v7050_v3  ;;  %3379 = vst [vmem:[%s7045_s9 + $0xc0] sm:$0xff] %v3317_v29  ;;  %v5247_v41 = vpop.f32.mrb[58].mxu1 }
 0x238   : > { %v7255_v49 = vadd.f32 %v5599_v30, %v7050_v3  ;;  %v5167_v58 = vpop.f32.mrb[26].mxu0  ;;  %v3332_v38 = vadd.f32 %v5247_v41, %v7040_v20  ;;  %v3326_v54 = vpop.f32.mrb[59].mxu1 }
 0x239   : > { %3068 = vst [vmem:[%s7057_s13 + $0xc8] sm:$0xff] %v7251_v15  ;;  %v5600_v26 = vadd.f32 %v5167_v58, %v7024_v63  ;;  %v2943_v60 = vpop.f32.mrb[27].mxu0  ;;  %v3327_v61 = vadd.f32 %v7040_v20, %v3326_v54 }
 0x23a   : > { %3067 = vst [vmem:[%s7057_s13 + $0xc0] sm:$0xff] %v7255_v49  ;;  %v5601_v40 = vadd.f32 %v2943_v60, %v7026_v4  ;;  %3382 = vst [vmem:[%s7045_s9 + $0xd8] sm:$0xff] %v3332_v38 }
 0x23b   : > { %v7267_v13 = vadd.f32 %v5600_v26, %v7050_v3  ;;  %3381 = vst [vmem:[%s7045_s9 + $0xd0] sm:$0xff] %v3327_v61  ;;  %v5250_v16 = vpop.f32.mrb[60].mxu1 }
 0x23c   : > { %v7271_v9 = vadd.f32 %v5601_v40, %v7050_v3  ;;  %v5170_v63 = vpop.f32.mrb[28].mxu0  ;;  %v3342_v43 = vadd.f32 %v5250_v16, %v7040_v20  ;;  %v3336_v2 = vpop.f32.mrb[61].mxu1 }
 0x23d   : > { %3070 = vst [vmem:[%s7057_s13 + $0xd8] sm:$0xff] %v7267_v13  ;;  %v5602_v0 = vadd.f32 %v5170_v63, %v7028_v6  ;;  %v2953_v4 = vpop.f32.mrb[29].mxu0  ;;  %v3337_v36 = vadd.f32 %v7040_v20, %v3336_v2 }
 0x23e   : > { %3069 = vst [vmem:[%s7057_s13 + $0xd0] sm:$0xff] %v7271_v9  ;;  %v5603_v21 = vadd.f32 %v2953_v4, %v7030_v10  ;;  %3384 = vst [vmem:[%s7045_s9 + $0xe8] sm:$0xff] %v3342_v43 }
 0x23f   : > { %v7283_v55 = vadd.f32 %v5602_v0, %v7050_v3  ;;  %3383 = vst [vmem:[%s7045_s9 + $0xe0] sm:$0xff] %v3337_v36  ;;  %v5253_v31 = vpop.f32.mrb[62].mxu1 }
 0x240   : > { %v7287_v6 = vadd.f32 %v5603_v21, %v7050_v3  ;;  %v5173_v45 = vpop.f32.mrb[30].mxu0  ;;  %v3352_v48 = vadd.f32 %v5253_v31, %v7040_v20  ;;  %v3346_v24 = vpop.f32.mrb[63].mxu1  ;;  %3390 = sbr.rel (%p3969_p4) target bundleno = 583 (0x247), region = 44 }
 0x241   : > { %3072 = vst [vmem:[%s7057_s13 + $0xe8] sm:$0xff] %v7283_v55  ;;  %v5604_v10 = vadd.f32 %v5173_v45, %v7032_v17  ;;  %v2963_v18 = vpop.f32.mrb[31].mxu0  ;;  %v3347_v47 = vadd.f32 %v7040_v20, %v3346_v24  ;;  %v5848_v17 = vmov (!%p3969_p4), 0.0  }
 0x242   : > { %3071 = vst [vmem:[%s7057_s13 + $0xe0] sm:$0xff] %v7287_v6  ;;  %v5605_v50 = vadd.f32 %v2963_v18, %v7034_v32  ;;  %3386 = vst [vmem:[%s7045_s9 + $0xf8] sm:$0xff] %v3352_v48 }
 0x243   : > { %v7299_v23 = vadd.f32 %v5604_v10, %v7050_v3  ;;  %3385 = vst [vmem:[%s7045_s9 + $0xf0] sm:$0xff] %v3347_v47  ;;  %3391 = vst [vmem:[%s7434_s7] sm:$0x1] (!%p3969_p4), %v5848_v17 }
 0x244   : > { %v7303_v22 = vadd.f32 %v5605_v50, %v7050_v3  ;;  %3392 = vst [vmem:[%s7435_s8] sm:$0x1] (!%p3969_p4), %v5848_v17 }
 0x245   : > { %3074 = vst [vmem:[%s7057_s13 + $0xf8] sm:$0xff] %v7299_v23 }
 0x246   : > { %3073 = vst [vmem:[%s7057_s13 + $0xf0] sm:$0xff] %v7303_v22 }
 0x247 PF: > { %v3394_v32 = vadd.f32 %v7061_v7, %v7065_v34  ;;  %v3434_v8 = vmul.f32 %v7065_v34, %v7065_v34  ;;  %v3435_v53 = vmul.f32 %v7061_v7, %v7061_v7  ;;  %v3436_v30 = vmul.f32 %v7079_v44, %v7079_v44 }
 0x248   : > { %v3437_v58 = vmul.f32 %v7075_v39, %v7075_v39  ;;  %v3438_v26 = vmul.f32 %v7095_v62, %v7095_v62  ;;  %v3439_v7 = vmul.f32 %v7091_v28, %v7091_v28  ;;  %v3440_v40 = vmul.f32 %v7111_v1, %v7111_v1 }
 0x249   : > { %v3395_v20 = vadd.f32 %v3394_v32, %v7079_v44  ;;  %v3466_v38 = vadd.f32 %v3435_v53, %v3434_v8  ;;  %v3441_v63 = vmul.f32 %v7107_v25, %v7107_v25  ;;  %v3442_v2 = vmul.f32 %v7127_v42, %v7127_v42 }
 0x24a   : > { %v3443_v4 = vmul.f32 %v7123_v5, %v7123_v5  ;;  %v3444_v21 = vmul.f32 %v7143_v59, %v7143_v59  ;;  %v3445_v45 = vmul.f32 %v7139_v52, %v7139_v52  ;;  %v3446_v24 = vmul.f32 %v7159_v11, %v7159_v11 }
 0x24b   : > { %v3396_v3 = vadd.f32 %v3395_v20, %v7075_v39  ;;  %v3467_v34 = vadd.f32 %v3466_v38, %v3436_v30  ;;  %v3447_v18 = vmul.f32 %v7155_v37, %v7155_v37  ;;  %v3448_v50 = vmul.f32 %v7175_v35, %v7175_v35 }
 0x24c   : > { %v3449_v32 = vmul.f32 %v7171_v51, %v7171_v51  ;;  %v3451_v53 = vmul.f32 %v7187_v12, %v7187_v12  ;;  %v3452_v30 = vmul.f32 %v7207_v27, %v7207_v27 }
 0x24d   : > { %v3397_v29 = vadd.f32 %v3396_v3, %v7095_v62  ;;  %v3468_v61 = vadd.f32 %v3467_v34, %v3437_v58  ;;  %v3450_v3 = vmul.f32 %v7191_v46, %v7191_v46  ;;  %v3453_v58 = vmul.f32 %v7203_v56, %v7203_v56 }
 0x24e   : > { %v3455_v34 = vmul.f32 %v7219_v19, %v7219_v19 }
 0x24f   : > { %v3398_v41 = vadd.f32 %v3397_v29, %v7091_v28  ;;  %v3469_v16 = vadd.f32 %v3468_v61, %v3438_v26 }
 0x251   : > { %v3399_v54 = vadd.f32 %v3398_v41, %v7111_v1  ;;  %v3470_v43 = vadd.f32 %v3469_v16, %v3439_v7  ;;  %v3456_v7 = vmul.f32 %v7239_v57, %v7239_v57  ;;  %v3458_v16 = vmul.f32 %v7255_v49, %v7255_v49 }
 0x253   : > { %v3400_v60 = vadd.f32 %v3399_v54, %v7107_v25  ;;  %v3471_v0 = vadd.f32 %v3470_v43, %v3440_v40  ;;  %v3454_v54 = vmul.f32 %v7223_v14, %v7223_v14 }
 0x255   : > { %v3401_v44 = vadd.f32 %v3400_v60, %v7127_v42  ;;  %v3472_v36 = vadd.f32 %v3471_v0, %v3441_v63  ;;  %v3459_v63 = vmul.f32 %v7251_v15, %v7251_v15  ;;  %v3461_v0 = vmul.f32 %v7267_v13, %v7267_v13 }
 0x257   : > { %v3402_v39 = vadd.f32 %v3401_v44, %v7123_v5  ;;  %v3473_v31 = vadd.f32 %v3472_v36, %v3442_v2  ;;  %v3457_v44 = vmul.f32 %v7235_v33, %v7235_v33 }
 0x259   : > { %v3403_v62 = vadd.f32 %v3402_v39, %v7143_v59  ;;  %v3474_v48 = vadd.f32 %v3473_v31, %v3443_v4  ;;  %v3462_v4 = vmul.f32 %v7287_v6, %v7287_v6  ;;  %v3464_v31 = vmul.f32 %v7303_v22, %v7303_v22 }
 0x25b   : > { %v3404_v28 = vadd.f32 %v3403_v62, %v7139_v52  ;;  %v3475_v10 = vadd.f32 %v3474_v48, %v3444_v21  ;;  %v3460_v62 = vmul.f32 %v7271_v9, %v7271_v9 }
 0x25d   : > { %v3405_v1 = vadd.f32 %v3404_v28, %v7159_v11  ;;  %v3476_v47 = vadd.f32 %v3475_v10, %v3445_v45 }
 0x25f   : > { %v3406_v25 = vadd.f32 %v3405_v1, %v7155_v37  ;;  %v3477_v17 = vadd.f32 %v3476_v47, %v3446_v24  ;;  %v3463_v1 = vmul.f32 %v7283_v55, %v7283_v55 }
 0x261   : > { %v3407_v42 = vadd.f32 %v3406_v25, %v7175_v35  ;;  %v3478_v20 = vadd.f32 %v3477_v17, %v3447_v18 }
 0x263   : > { %v3408_v5 = vadd.f32 %v3407_v42, %v7171_v51  ;;  %v3479_v8 = vadd.f32 %v3478_v20, %v3448_v50 }
 0x265   : > { %v3409_v59 = vadd.f32 %v3408_v5, %v7191_v46  ;;  %v3480_v29 = vadd.f32 %v3479_v8, %v3449_v32 }
 0x267   : > { %v3410_v52 = vadd.f32 %v3409_v59, %v7187_v12  ;;  %v3481_v41 = vadd.f32 %v3480_v29, %v3450_v3 }
 0x269   : > { %v3411_v11 = vadd.f32 %v3410_v52, %v7207_v27  ;;  %v3482_v38 = vadd.f32 %v3481_v41, %v3451_v53  ;;  %v3433_v52 = vld [vmem:[%s7435_s8] sm:$0x1] }
 0x26b   : > { %v3412_v37 = vadd.f32 %v3411_v11, %v7203_v56  ;;  %v3483_v26 = vadd.f32 %v3482_v38, %v3452_v30 }
 0x26d   : > { %v3413_v35 = vadd.f32 %v3412_v37, %v7223_v14  ;;  %v3484_v60 = vadd.f32 %v3483_v26, %v3453_v58 }
 0x26f   : > { %v3414_v51 = vadd.f32 %v3413_v35, %v7219_v19  ;;  %v3485_v61 = vadd.f32 %v3484_v60, %v3454_v54 }
 0x271   : > { %v3415_v46 = vadd.f32 %v3414_v51, %v7239_v57  ;;  %v3486_v40 = vadd.f32 %v3485_v61, %v3455_v34 }
 0x273   : > { %v3416_v12 = vadd.f32 %v3415_v46, %v7235_v33  ;;  %v3487_v39 = vadd.f32 %v3486_v40, %v3456_v7 }
 0x275   : > { %v3417_v27 = vadd.f32 %v3416_v12, %v7255_v49  ;;  %v3488_v43 = vadd.f32 %v3487_v39, %v3457_v44 }
 0x277   : > { %v3418_v56 = vadd.f32 %v3417_v27, %v7251_v15  ;;  %v3489_v2 = vadd.f32 %v3488_v43, %v3458_v16 }
 0x279   : > { %v3419_v14 = vadd.f32 %v3418_v56, %v7271_v9  ;;  %v3490_v28 = vadd.f32 %v3489_v2, %v3459_v63 }
 0x27b   : > { %v3420_v19 = vadd.f32 %v3419_v14, %v7267_v13  ;;  %v3491_v36 = vadd.f32 %v3490_v28, %v3460_v62  ;;  %v3465_v13 = vmul.f32 %v7299_v23, %v7299_v23 }
 0x27d   : > { %v3421_v57 = vadd.f32 %v3420_v19, %v7287_v6  ;;  %v3492_v21 = vadd.f32 %v3491_v36, %v3461_v0 }
 0x27f   : > { %v3422_v33 = vadd.f32 %v3421_v57, %v7283_v55  ;;  %v3493_v25 = vadd.f32 %v3492_v21, %v3462_v4  ;;  %v3393_v55 = vld [vmem:[%s7434_s7] sm:$0x1] }
 0x281   : > { %v3423_v49 = vadd.f32 %v3422_v33, %v7303_v22  ;;  %v3494_v48 = vadd.f32 %v3493_v25, %v3463_v1 }
 0x283   : > { %v3424_v15 = vadd.f32 %v3423_v49, %v7299_v23  ;;  %v3495_v24 = vadd.f32 %v3494_v48, %v3464_v31 }
 0x285   : > { %v3425_v9 = vrot.slane %v3424_v15, 4  ;;  %v3496_v10 = vadd.f32 %v3495_v24, %v3465_v13 }
 0x287   : > { %v3426_v45 = vadd.f32 %v3425_v9, %v3424_v15  ;;  %v3497_v18 = vrot.slane %v3496_v10, 4 }
 0x289   : > { %v3427_v42 = vrot.slane %v3426_v45, 2  ;;  %v3498_v59 = vadd.f32 %v3497_v18, %v3496_v10 }
 0x28b   : > { %v3428_v6 = vadd.f32 %v3427_v42, %v3426_v45  ;;  %v3499_v22 = vrot.slane %v3498_v59, 2 }
 0x28d   : > { %v3429_v5 = vrot.slane %v3428_v6, 1  ;;  %v3500_v23 = vadd.f32 %v3499_v22, %v3498_v59 }
 0x28f   : > { %v3430_v47 = vadd.f32 %v3429_v5, %v3428_v6  ;;  %v3501_v17 = vrot.slane %v3500_v23, 1 }
 0x291   : > { %v3431_v50 = vadd.f32 %v3430_v47, %v3393_v55  ;;  %v3502_v32 = vadd.f32 %v3501_v17, %v3500_v23 }
 0x293   : > { %3432 = vst [vmem:[%s7434_s7] sm:$0x1] %v3431_v50  ;;  %v3503_v20 = vadd.f32 %v3502_v32, %v3433_v52 }
 0x295   : > { %3504 = vst [vmem:[%s7435_s8] sm:$0x1] %v3503_v20 }
 0x296 PF: > { %s19_s27 = sadd.s32 1, %s5846_s27  }
 0x297   : > { %p16_p5 = scmp.ge.s32.totalorder %s19_s27, 4  }
 0x299   :  { %18 = sbr.rel (!%p16_p5) target bundleno = 1 (0x1), region = 112 }

// kernel: resnet_forward.4
= control target key start
LH: loop header
LB: loop body
LE: loop exit
PB: predicated region body
PF: predicated region fallthrough
CT: control target
= control target key end

     0   :  { %s5370_s24 = smov 0   ;;  %s6870_s0 = inlined_call_operand.vmem [shape: f32[2,16,16,128], index: 0, kind: input, shape index: {}]   ;;  %s6871_s1 = inlined_call_operand.vmem [shape: f32[1,128], index: 1, kind: input, shape index: {}]   ;;  %s6872_s2 = inlined_call_operand.vmem [shape: f32[1,128], index: 2, kind: input, shape index: {}]   ;;  %s6873_s3 = inlined_call_operand.vmem [shape: f32[9,128,128], index: 3, kind: input, shape index: {}]   ;;  %s6874_s4 = inlined_call_operand.vmem [shape: f32[1,128], index: 4, kind: input, shape index: {}]   ;;  %s6875_s5 = inlined_call_operand.vmem [shape: f32[2,16,16,128], index: 5, kind: output, shape index: {0}]   ;;  %s6876_s6 = inlined_call_operand.vmem [shape: f32[1,128], index: 6, kind: output, shape index: {1}]   ;;  %s6877_s7 = inlined_call_operand.vmem [shape: f32[1,128], index: 7, kind: output, shape index: {2}]  }
   0x1 LB: > { %s5376_s25 = sadd.s32 4294967295, %s5326_s24   ;;  %p3453_p0 = scmp.ge.s32.totalorder %s5326_s24, 1  ;;  %s5326_s24 = sphi %s5370_s24, %s18_s24  }
   0x2   : > { %p232_p1 = scmp.lt.s32.totalorder %s5326_s24, 3 }
   0x4   : > { %p233_p2 = pnand %p3453_p0, %p232_p1 }
   0x6   : > { %236 = sbr.rel (%p233_p2) target bundleno = 631 (0x277), region = 40 }
   0xd   : > { %v3460_v0 = vld [vmem:[%s6873_s3 + $0x80] sm:$0xff]  ;;  %v3461_v1 = vld [vmem:[%s6873_s3 + $0x88] sm:$0xff]  ;;  %p264_p3 = scmp.lt.s32.totalorder %s5376_s25, 1  ;;  %v3462_v5 = vld [vmem:[%s6873_s3 + $0x90] sm:$0xff]  ;;  %v5328_v7 = vmov 0.0   ;;  %p3589_p4 = scmp.ne.s32.totalorder %s5376_s25, 0 }
   0xe   : > { %v3508_v2 = vld [vmem:[%s6873_s3 + $0x200] sm:$0xff]  ;;  %v5390_v3 = vpack.c.bf16 %v3461_v1, %v3460_v0  ;;  %v3509_v4 = vld [vmem:[%s6873_s3 + $0x208] sm:$0xff]  ;;  %v3463_v6 = vld [vmem:[%s6873_s3 + $0x98] sm:$0xff]  ;;  %416 = vst [vmem:[#allocation2] sm:$0xff] %v5328_v7 }
   0xf   : > { %417 = vst [vmem:[#allocation2 + $0x8] sm:$0xff] %v5328_v7  ;;  %418 = vst [vmem:[#allocation2 + $0x10] sm:$0x3] %v5328_v7  ;;  %v5455_v8 = vpack.c.bf16 %v3509_v4, %v3508_v2  ;;  %v4750_v9 = vpack.c.bf16 %v3463_v6, %v3462_v5  ;;  %v3510_v10 = vld [vmem:[%s6873_s3 + $0x210] sm:$0xff]  ;;  %v3511_v11 = vld [vmem:[%s6873_s3 + $0x218] sm:$0xff]  ;;  %s5469_s21 = scalar_select %p264_p3, %s5376_s25, 1 }
  0x10   : > { %419 = vst [vmem:[#allocation2 + $0x18] sm:$0xff] %v5328_v7  ;;  %420 = vst [vmem:[#allocation2 + $0x20] sm:$0xff] %v5328_v7  ;;  %v3464_v12 = vld [vmem:[%s6873_s3 + $0xa0] sm:$0xff]  ;;  %4747 = vmatprep.subr.bf16.mxu1 %v5390_v3  ;;  %v5472_v13 = vpack.c.bf16 %v3511_v11, %v3510_v10  ;;  %v3465_v14 = vld [vmem:[%s6873_s3 + $0xa8] sm:$0xff] }
  0x11   : > { %421 = vst [vmem:[#allocation2 + $0x28] sm:$0x3] %v5328_v7  ;;  %422 = vst [vmem:[#allocation2 + $0x30] sm:$0xff] %v5328_v7  ;;  %v3512_v15 = vld [vmem:[%s6873_s3 + $0x220] sm:$0xff]  ;;  %v3513_v16 = vld [vmem:[%s6873_s3 + $0x228] sm:$0xff]  ;;  %4875 = vmatprep.subr.bf16.mxu0 %v5455_v8  ;;  %4749 = vmatpush3.bf16.msra.mxu1 %v5390_v3  ;;  %v4754_v17 = vpack.c.bf16 %v3465_v14, %v3464_v12  ;;  %s3592_s30 = sshll.u32 %s5469_s21, 8 }
  0x12   : > { %423 = vst [vmem:[#allocation2 + $0x38] sm:$0xff] %v5328_v7  ;;  %424 = vst [vmem:[#allocation2 + $0x40] sm:$0x3] %v5328_v7  ;;  %4877 = vmatpush3.bf16.msra.mxu0 %v5455_v8  ;;  %4751 = vmatprep.subr.bf16.mxu1 %v4750_v9  ;;  %v5488_v18 = vpack.c.bf16 %v3513_v16, %v3512_v15  ;;  %v3466_v19 = vld [vmem:[%s6873_s3 + $0xb0] sm:$0xff]  ;;  %v3467_v20 = vld [vmem:[%s6873_s3 + $0xb8] sm:$0xff]  ;;  %s5507_s18 = scalar_lea.vmem %s6870_s0, %s3592_s30  ;;  %s6590_s23 = scalar_lea.vmem %s6875_s5, %s3592_s30 }
  0x13   : > { %425 = vst [vmem:[#allocation2 + $0x48] sm:$0xff] %v5328_v7  ;;  %426 = vst [vmem:[#allocation2 + $0x50] sm:$0xff] %v5328_v7  ;;  %4879 = vmatprep.subr.bf16.mxu0 %v5472_v13  ;;  %v3514_v21 = vld [vmem:[%s6873_s3 + $0x230] sm:$0xff]  ;;  %v3515_v22 = vld [vmem:[%s6873_s3 + $0x238] sm:$0xff]  ;;  %v4758_v23 = vpack.c.bf16 %v3467_v20, %v3466_v19 }
  0x14   : > { %427 = vst [vmem:[#allocation2 + $0x58] sm:$0x3] %v5328_v7  ;;  %428 = vst [vmem:[#allocation2 + $0x60] sm:$0xff] %v5328_v7  ;;  %v3468_v24 = vld [vmem:[%s6873_s3 + $0xc0] sm:$0xff]  ;;  %v3469_v25 = vld [vmem:[%s6873_s3 + $0xc8] sm:$0xff]  ;;  %v5517_v26 = vpack.c.bf16 %v3515_v22, %v3514_v21 }
  0x15   : > { %429 = vst [vmem:[#allocation2 + $0x68] sm:$0xff] %v5328_v7  ;;  %430 = vst [vmem:[#allocation2 + $0x70] sm:$0x3] %v5328_v7  ;;  %4753 = vmatpush3.bf16.msra.mxu1 %v4750_v9  ;;  %v3516_v27 = vld [vmem:[%s6873_s3 + $0x240] sm:$0xff]  ;;  %v3517_v28 = vld [vmem:[%s6873_s3 + $0x248] sm:$0xff]  ;;  %v4762_v34 = vpack.c.bf16 %v3469_v25, %v3468_v24 }
  0x16   : > { %431 = vst [vmem:[#allocation2 + $0x78] sm:$0xff] %v5328_v7  ;;  %432 = vst [vmem:[#allocation2 + $0x80] sm:$0xff] %v5328_v7  ;;  %4881 = vmatpush3.bf16.msra.mxu0 %v5472_v13  ;;  %4755 = vmatprep.subr.bf16.mxu1 %v4754_v17  ;;  %v551_v29 = vld [vmem:[#allocation2 + $0x1] sm:$0xff]  ;;  %v5529_v31 = vld [vmem:[%s6871_s1] ss:$0 sm:$0xff]  ;;  %v5543_v37 = vpack.c.bf16 %v3517_v28, %v3516_v27 }
  0x17   : > { %433 = vst [vmem:[#allocation2 + $0x88] sm:$0x3] %v5328_v7  ;;  %434 = vst [vmem:[#allocation2 + $0x90] sm:$0xff] %v5328_v7  ;;  %4883 = vmatprep.subr.bf16.mxu0 %v5488_v18  ;;  %4058 = vmatprep.mubr.f32.mxu1 %v551_v29  ;;  %v274_v30 = vld [vmem:[%s5507_s18] sm:$0xff]  ;;  %v3470_v35 = vld [vmem:[%s6873_s3 + $0xd0] sm:$0xff] }
  0x18   : > { %435 = vst [vmem:[#allocation2 + $0x98] sm:$0xff] %v5328_v7  ;;  %436 = vst [vmem:[#allocation2 + $0xa0] sm:$0x3] %v5328_v7  ;;  %v5534_v32 = vld [vmem:[%s6872_s2] ss:$0 sm:$0xff]  ;;  %v313_v33 = vmul.f32 %v5529_v31, %v274_v30  ;;  %v275_v36 = vld [vmem:[%s5507_s18 + $0x8] sm:$0xff] }
  0x19   : > { %437 = vst [vmem:[#allocation2 + $0xa8] sm:$0xff] %v5328_v7  ;;  %438 = vst [vmem:[#allocation2 + $0xb0] sm:$0xff] %v5328_v7  ;;  %4757 = vmatpush3.bf16.msra.mxu1 %v4754_v17  ;;  %v3471_v38 = vld [vmem:[%s6873_s3 + $0xd8] sm:$0xff]  ;;  %v314_v40 = vmul.f32 %v5529_v31, %v275_v36  ;;  %v276_v41 = vld [vmem:[%s5507_s18 + $0x10] sm:$0xff] }
  0x1a   : > { %439 = vst [vmem:[#allocation2 + $0xb8] sm:$0x3] %v5328_v7  ;;  %440 = vst [vmem:[#allocation2 + $0xc0] sm:$0xff] %v5328_v7  ;;  %4885 = vmatpush3.bf16.msra.mxu0 %v5488_v18  ;;  %4759 = vmatprep.subr.bf16.mxu1 %v4758_v23  ;;  %v352_v39 = vadd.f32 %v5534_v32, %v313_v33  ;;  %v277_v42 = vld [vmem:[%s5507_s18 + $0x18] sm:$0xff]  ;;  %v3518_v43 = vld [vmem:[%s6873_s3 + $0x250] sm:$0xff]  ;;  %v315_v45 = vmul.f32 %v5529_v31, %v276_v41 }
  0x1b   : > { %441 = vst [vmem:[#allocation2 + $0xc8] sm:$0xff] %v5328_v7  ;;  %442 = vst [vmem:[#allocation2 + $0xd0] sm:$0x3] %v5328_v7  ;;  %4887 = vmatprep.subr.bf16.mxu0 %v5517_v26  ;;  %v3519_v44 = vld [vmem:[%s6873_s3 + $0x258] sm:$0xff]  ;;  %v316_v46 = vmul.f32 %v5529_v31, %v277_v42  ;;  %v278_v47 = vld [vmem:[%s5507_s18 + $0x20] sm:$0xff]  ;;  %v353_v49 = vadd.f32 %v5534_v32, %v314_v40  ;;  %v4766_v52 = vpack.c.bf16 %v3471_v38, %v3470_v35 }
  0x1c   : > { %443 = vst [vmem:[#allocation2 + $0xd8] sm:$0xff] %v5328_v7  ;;  %444 = vst [vmem:[#allocation2 + $0xe0] sm:$0xff] %v5328_v7  ;;  %v5561_v48 = vmax.f32 %v352_v39, 0.0  ;;  %v317_v50 = vmul.f32 %v5529_v31, %v278_v47  ;;  %v279_v51 = vld [vmem:[%s5507_s18 + $0x28] sm:$0xff]  ;;  %v354_v53 = vadd.f32 %v5534_v32, %v315_v45  ;;  %v280_v55 = vld [vmem:[%s5507_s18 + $0x30] sm:$0xff]  ;;  %v5572_v57 = vpack.c.bf16 %v3519_v44, %v3518_v43 }
  0x1d   : > { %445 = vst [vmem:[#allocation2 + $0xe8] sm:$0x3] %v5328_v7  ;;  %446 = vst [vmem:[#allocation2 + $0xf0] sm:$0xff] %v5328_v7  ;;  %4761 = vmatpush3.bf16.msra.mxu1 %v4758_v23  ;;  %v355_v54 = vadd.f32 %v5534_v32, %v316_v46  ;;  %v281_v56 = vld [vmem:[%s5507_s18 + $0x38] sm:$0xff]  ;;  %v3472_v58 = vld [vmem:[%s6873_s3 + $0xe0] sm:$0xff]  ;;  %v5582_v60 = vmax.f32 %v353_v49, 0.0  ;;  %v318_v62 = vmul.f32 %v5529_v31, %v279_v51 }
  0x1e   : > { %447 = vst [vmem:[#allocation2 + $0xf8] sm:$0xff] %v5328_v7  ;;  %448 = vst [vmem:[#allocation2 + $0x100] sm:$0x3] %v5328_v7  ;;  %4889 = vmatpush3.bf16.msra.mxu0 %v5517_v26  ;;  %4763 = vmatprep.subr.bf16.mxu1 %v4762_v34  ;;  %v3473_v59 = vld [vmem:[%s6873_s3 + $0xe8] sm:$0xff]  ;;  %v356_v61 = vadd.f32 %v5534_v32, %v317_v50  ;;  %v282_v63 = vld [vmem:[%s5507_s18 + $0x40] sm:$0xff]  ;;  %v5593_v2 = vmax.f32 %v354_v53, 0.0  ;;  %v319_v4 = vmul.f32 %v5529_v31, %v280_v55 }
  0x1f   : > { %449 = vst [vmem:[#allocation2 + $0x108] sm:$0xff] %v5328_v7  ;;  %450 = vst [vmem:[#allocation2 + $0x110] sm:$0xff] %v5328_v7  ;;  %4891 = vmatprep.subr.bf16.mxu0 %v5543_v37  ;;  %4378 = vmatprep.mubr.f32.mxu0 %v5561_v48  ;;  %v3520_v0 = vld [vmem:[%s6873_s3 + $0x260] sm:$0xff]  ;;  %v3521_v1 = vld [vmem:[%s6873_s3 + $0x268] sm:$0xff]  ;;  %v5595_v3 = vmax.f32 %v355_v54, 0.0  ;;  %v320_v5 = vmul.f32 %v5529_v31, %v281_v56  ;;  %v357_v10 = vadd.f32 %v5534_v32, %v318_v62 }
  0x20   : > { %451 = vst [vmem:[#allocation2 + $0x118] sm:$0x3] %v5328_v7  ;;  %452 = vst [vmem:[#allocation2 + $0x120] sm:$0xff] %v5328_v7  ;;  %v283_v6 = vld [vmem:[%s5507_s18 + $0x48] sm:$0xff]  ;;  %v5601_v9 = vmax.f32 %v356_v61, 0.0  ;;  %v321_v11 = vmul.f32 %v5529_v31, %v282_v63  ;;  %v284_v12 = vld [vmem:[%s5507_s18 + $0x50] sm:$0xff]  ;;  %v4770_v14 = vpack.c.bf16 %v3473_v59, %v3472_v58  ;;  %v358_v15 = vadd.f32 %v5534_v32, %v319_v4 }
  0x21   : > { %453 = vst [vmem:[#allocation2 + $0x128] sm:$0xff] %v5328_v7  ;;  %454 = vst [vmem:[#allocation2 + $0x130] sm:$0x3] %v5328_v7  ;;  %4765 = vmatpush3.bf16.msra.mxu1 %v4762_v34  ;;  %v359_v16 = vadd.f32 %v5534_v32, %v320_v5  ;;  %v285_v17 = vld [vmem:[%s5507_s18 + $0x58] sm:$0xff]  ;;  %v5613_v19 = vpack.c.bf16 %v3521_v1, %v3520_v0  ;;  %v3474_v20 = vld [vmem:[%s6873_s3 + $0xf0] sm:$0xff]  ;;  %v5622_v22 = vmax.f32 %v357_v10, 0.0 }
  0x22   : > { %455 = vst [vmem:[#allocation2 + $0x138] sm:$0xff] %v5328_v7  ;;  %456 = vst [vmem:[#allocation2 + $0x140] sm:$0xff] %v5328_v7  ;;  %4893 = vmatpush3.bf16.msra.mxu0 %v5543_v37  ;;  %4767 = vmatprep.subr.bf16.mxu1 %v4766_v52  ;;  %v3475_v21 = vld [vmem:[%s6873_s3 + $0xf8] sm:$0xff]  ;;  %v360_v23 = vadd.f32 %v5534_v32, %v321_v11  ;;  %v322_v24 = vmul.f32 %v5529_v31, %v283_v6  ;;  %v286_v25 = vld [vmem:[%s5507_s18 + $0x60] sm:$0xff]  ;;  %v5633_v29 = vmax.f32 %v358_v15, 0.0 }
  0x23   : > { %457 = vst [vmem:[#allocation2 + $0x148] sm:$0x3] %v5328_v7  ;;  %458 = vst [vmem:[#allocation2 + $0x150] sm:$0xff] %v5328_v7  ;;  %4895 = vmatprep.subr.bf16.mxu0 %v5572_v57  ;;  %v3522_v27 = vld [vmem:[%s6873_s3 + $0x270] sm:$0xff]  ;;  %v3523_v28 = vld [vmem:[%s6873_s3 + $0x278] sm:$0xff]  ;;  %v5635_v30 = vmax.f32 %v359_v16, 0.0  ;;  %v323_v33 = vmul.f32 %v5529_v31, %v284_v12  ;;  %v324_v34 = vmul.f32 %v5529_v31, %v285_v17 }
  0x24   : > { %459 = vst [vmem:[#allocation2 + $0x158] sm:$0xff] %v5328_v7  ;;  %460 = vst [vmem:[#allocation2 + $0x160] sm:$0x3] %v5328_v7  ;;  %v287_v35 = vld [vmem:[%s5507_s18 + $0x68] sm:$0xff]  ;;  %v5641_v36 = vmax.f32 %v360_v23, 0.0  ;;  %v361_v38 = vadd.f32 %v5534_v32, %v322_v24  ;;  %v325_v39 = vmul.f32 %v5529_v31, %v286_v25  ;;  %v288_v40 = vld [vmem:[%s5507_s18 + $0x70] sm:$0xff]  ;;  %v4774_v42 = vpack.c.bf16 %v3475_v21, %v3474_v20 }
  0x25   : > { %461 = vst [vmem:[#allocation2 + $0x168] sm:$0xff] %v5328_v7  ;;  %462 = vst [vmem:[#allocation2 + $0x170] sm:$0xff] %v5328_v7  ;;  %4769 = vmatpush3.bf16.msra.mxu1 %v4766_v52  ;;  %v289_v41 = vld [vmem:[%s5507_s18 + $0x78] sm:$0xff]  ;;  %v535_v43 = vld [vmem:[%s6873_s3] sm:$0xff]  ;;  %v362_v45 = vadd.f32 %v5534_v32, %v323_v33  ;;  %v363_v46 = vadd.f32 %v5534_v32, %v324_v34  ;;  %v5659_v47 = vpack.c.bf16 %v3523_v28, %v3522_v27 }
  0x26   : > { %463 = vst [vmem:[#allocation2 + $0x178] sm:$0x3] %v5328_v7  ;;  %464 = vst [vmem:[#allocation2 + $0x180] sm:$0xff] %v5328_v7  ;;  %4897 = vmatpush3.bf16.msra.mxu0 %v5572_v57  ;;  %4771 = vmatprep.subr.bf16.mxu1 %v4770_v14  ;;  %v536_v44 = vld [vmem:[%s6873_s3 + $0x8] sm:$0xff]  ;;  %v3524_v49 = vld [vmem:[%s6873_s3 + $0x280] sm:$0xff]  ;;  %v5668_v51 = vmax.f32 %v361_v38, 0.0  ;;  %v364_v52 = vadd.f32 %v5534_v32, %v325_v39  ;;  %v326_v53 = vmul.f32 %v5529_v31, %v287_v35 }
  0x27   : > { %465 = vst [vmem:[#allocation2 + $0x188] sm:$0xff] %v5328_v7  ;;  %466 = vst [vmem:[#allocation2 + $0x190] sm:$0x3] %v5328_v7  ;;  %4899 = vmatprep.subr.bf16.mxu0 %v5613_v19  ;;  %v3525_v50 = vld [vmem:[%s6873_s3 + $0x288] sm:$0xff]  ;;  %v5672_v54 = vmax.f32 %v362_v45, 0.0  ;;  %v5674_v55 = vmax.f32 %v363_v46, 0.0  ;;  %v327_v56 = vmul.f32 %v5529_v31, %v288_v40  ;;  %v328_v58 = vmul.f32 %v5529_v31, %v289_v41 }
  0x28   : > { %467 = vst [vmem:[#allocation2 + $0x198] sm:$0xff] %v5328_v7  ;;  %468 = vst [vmem:[#allocation2 + $0x1a0] sm:$0xff] %v5328_v7  ;;  %v290_v59 = vld [vmem:[%s5507_s18 + $0x80] sm:$0xff]  ;;  %v291_v61 = vld [vmem:[%s5507_s18 + $0x88] sm:$0xff]  ;;  %v4778_v62 = vpack.c.bf16 %v536_v44, %v535_v43  ;;  %v5687_v1 = vmax.f32 %v364_v52, 0.0  ;;  %v365_v4 = vadd.f32 %v5534_v32, %v326_v53  ;;  %v4906_v6 = vpack.c.bf16 %v3525_v50, %v3524_v49 }
  0x29   : > { %469 = vst [vmem:[#allocation2 + $0x1a8] sm:$0x3] %v5328_v7  ;;  %6901 = vst [vmem:[#allocation3_spill] sm:$0xff] %v5517_v26  ;;  %4773 = vmatpush3.bf16.msra.mxu1 %v4770_v14  ;;  %v3526_v63 = vld [vmem:[%s6873_s3 + $0x290] sm:$0xff]  ;;  %v3527_v0 = vld [vmem:[%s6873_s3 + $0x298] sm:$0xff]  ;;  %v366_v12 = vadd.f32 %v5534_v32, %v327_v56  ;;  %v367_v14 = vadd.f32 %v5534_v32, %v328_v58  ;;  %v329_v17 = vmul.f32 %v5529_v31, %v290_v59 }
  0x2a   : > { %6902 = vst [vmem:[#allocation4_spill] sm:$0xff] %v5543_v37  ;;  %6903 = vst [vmem:[#allocation5_spill] sm:$0xff] %v5572_v57  ;;  %v292_v5 = vld [vmem:[%s5507_s18 + $0x90] sm:$0xff]  ;;  %4901 = vmatpush3.bf16.msra.mxu0 %v5613_v19  ;;  %4775 = vmatprep.subr.bf16.mxu1 %v4774_v42  ;;  %v538_v11 = vld [vmem:[%s6873_s3 + $0x18] sm:$0xff]  ;;  %v5705_v16 = vmax.f32 %v365_v4, 0.0  ;;  %v330_v20 = vmul.f32 %v5529_v31, %v291_v61  ;;  %v5711_v24 = vpack.c.bf16 %v3527_v0, %v3526_v63 }
  0x2b   : > { %471 = vst [vmem:[#allocation2 + $0x19] sm:$0xff] %v5561_v48  ;;  %472 = vst [vmem:[#allocation2 + $0x21] sm:$0xff] %v5582_v60  ;;  %v537_v10 = vld [vmem:[%s6873_s3 + $0x10] sm:$0xff]  ;;  %v293_v15 = vld [vmem:[%s5507_s18 + $0x98] sm:$0xff]  ;;  %4903 = vmatprep.subr.bf16.mxu0 %v5659_v47  ;;  %v331_v21 = vmul.f32 %v5529_v31, %v292_v5  ;;  %v5713_v25 = vmax.f32 %v366_v12, 0.0  ;;  %v5715_v27 = vmax.f32 %v367_v14, 0.0  ;;  %v5723_v38 = vadd.f32 %v5534_v32, %v329_v17 }
  0x2c   : > { %473 = vst [vmem:[#allocation2 + $0x31] sm:$0xff] %v5593_v2  ;;  %474 = vst [vmem:[#allocation2 + $0x39] sm:$0xff] %v5595_v3  ;;  %v294_v23 = vld [vmem:[%s5507_s18 + $0xa0] sm:$0xff]  ;;  %v332_v28 = vmul.f32 %v5529_v31, %v293_v15  ;;  %v295_v33 = vld [vmem:[%s5507_s18 + $0xa8] sm:$0xff]  ;;  %v5719_v35 = vpack.c.bf16 %v538_v11, %v537_v10  ;;  %v5726_v39 = vadd.f32 %v5534_v32, %v330_v20 }
  0x2d   : > { %6904 = vst [vmem:[#allocation6_spill] sm:$0xff] %v5613_v19  ;;  %475 = vst [vmem:[#allocation2 + $0x49] sm:$0xff] %v5601_v9  ;;  %4777 = vmatpush3.bf16.msra.mxu1 %v4774_v42  ;;  %v552_v34 = vld [vmem:[#allocation2 + $0x9] sm:$0xff]  ;;  %v5729_v40 = vadd.f32 %v5534_v32, %v331_v21  ;;  %v3528_v42 = vld [vmem:[%s6873_s3 + $0x2a0] sm:$0xff]  ;;  %v333_v45 = vmul.f32 %v5529_v31, %v294_v23  ;;  %v334_v46 = vmul.f32 %v5529_v31, %v295_v33 }
  0x2e   : > { %476 = vst [vmem:[#allocation2 + $0x51] sm:$0xff] %v5622_v22  ;;  %477 = vst [vmem:[#allocation2 + $0x61] sm:$0xff] %v5633_v29  ;;  %v296_v41 = vld [vmem:[%s5507_s18 + $0xb0] sm:$0xff]  ;;  %4905 = vmatpush3.bf16.msra.mxu0 %v5659_v47  ;;  %4779 = vmatprep.subr.bf16.mxu1 %v4778_v62  ;;  %v3529_v43 = vld [vmem:[%s6873_s3 + $0x2a8] sm:$0xff]  ;;  %v5742_v44 = vadd.f32 %v5534_v32, %v332_v28  ;;  %v400_v50 = vmax.f32 %v5723_v38, 0.0  ;;  %v401_v52 = vmax.f32 %v5726_v39, 0.0 }
  0x2f   : > { %478 = vst [vmem:[#allocation2 + $0x69] sm:$0xff] %v5635_v30  ;;  %6905 = vst [vmem:[#allocation7_spill] sm:$0xff] %v5659_v47  ;;  %v297_v49 = vld [vmem:[%s5507_s18 + $0xb8] sm:$0xff]  ;;  %4907 = vmatprep.subr.bf16.mxu0 %v4906_v6  ;;  %v402_v53 = vmax.f32 %v5729_v40, 0.0  ;;  %v335_v56 = vmul.f32 %v5529_v31, %v296_v41  ;;  %v298_v58 = vld [vmem:[%s5507_s18 + $0xc0] sm:$0xff]  ;;  %v5754_v61 = vadd.f32 %v5534_v32, %v333_v45 }
  0x30   : > { %479 = vst [vmem:[#allocation2 + $0x79] sm:$0xff] %v5641_v36  ;;  %480 = vst [vmem:[#allocation2 + $0x81] sm:$0xff] %v5668_v51  ;;  %4059 = vmatmul.mubr.f32.vlgmr.msra.gmra.mrb[0].mxu1 %v552_v34  ;;  %v403_v59 = vmax.f32 %v5742_v44, 0.0  ;;  %v5757_v63 = vadd.f32 %v5534_v32, %v334_v46  ;;  %v336_v0 = vmul.f32 %v5529_v31, %v297_v49  ;;  %v299_v4 = vld [vmem:[%s5507_s18 + $0xc8] sm:$0xff]  ;;  %v539_v10 = vld [vmem:[%s6873_s3 + $0x20] sm:$0xff] }
  0x31   : > { %481 = vst [vmem:[#allocation2 + $0x91] sm:$0xff] %v5672_v54  ;;  %482 = vst [vmem:[#allocation2 + $0x99] sm:$0xff] %v5674_v55  ;;  %4379 = vmatmul.mubr.f32.vlgmr.msra.gmra.mrb[0].mxu0 %v5582_v60  ;;  %4781 = vmatpush3.bf16.msra.mxu1 %v4778_v62  ;;  %v5762_v5 = vpack.c.bf16 %v3529_v43, %v3528_v42  ;;  %v540_v11 = vld [vmem:[%s6873_s3 + $0x28] sm:$0xff]  ;;  %v5777_v62 = vadd.f32 %v5534_v32, %v335_v56  ;;  %v300_v12 = vld [vmem:[%s5507_s18 + $0xd0] sm:$0xff]  ;;  %v404_v14 = vmax.f32 %v5754_v61, 0.0 }
  0x32   : > { %483 = vst [vmem:[#allocation2 + $0xa9] sm:$0xff] %v5687_v1  ;;  %484 = vst [vmem:[#allocation2 + $0xb1] sm:$0xff] %v5705_v16  ;;  %4909 = vmatpush3.bf16.msra.mxu0 %v4906_v6  ;;  %4061 = vmatprep.mubr.f32.mxu1 %v5561_v48  ;;  %v405_v15 = vmax.f32 %v5757_v63, 0.0  ;;  %v5786_v17 = vadd.f32 %v5534_v32, %v336_v0  ;;  %v337_v20 = vmul.f32 %v5529_v31, %v298_v58  ;;  %v301_v21 = vld [vmem:[%s5507_s18 + $0xd8] sm:$0xff]  ;;  %v302_v33 = vld [vmem:[%s5507_s18 + $0xe0] sm:$0xff] }
  0x33   : > { %485 = vst [vmem:[#allocation2 + $0xc1] sm:$0xff] %v5713_v25  ;;  %486 = vst [vmem:[#allocation2 + $0xc9] sm:$0xff] %v5715_v27  ;;  %4381 = vmatprep.mubr.f32.mxu0 %v5593_v2  ;;  %4911 = vmatprep.subr.bf16.mxu0 %v5711_v24  ;;  %v406_v48 = vmax.f32 %v5777_v62, 0.0  ;;  %v338_v6 = vmul.f32 %v5529_v31, %v299_v4  ;;  %v339_v23 = vmul.f32 %v5529_v31, %v300_v12  ;;  %v3530_v34 = vld [vmem:[%s6873_s3 + $0x2b0] sm:$0xff]  ;;  %v3531_v41 = vld [vmem:[%s6873_s3 + $0x2b8] sm:$0xff] }
  0x34   : > { %487 = vst [vmem:[#allocation2 + $0xd9] sm:$0xff] %v400_v50  ;;  %488 = vst [vmem:[#allocation2 + $0xe1] sm:$0xff] %v401_v52  ;;  %v340_v28 = vmul.f32 %v5529_v31, %v301_v21  ;;  %4062 = vmatmul.mubr.f32.gmra.mrb[2].mxu1 %v5582_v60  ;;  %4783 = vmatprep.subr.bf16.mxu1 %v5719_v35  ;;  %v4786_v42 = vpack.c.bf16 %v540_v11, %v539_v10  ;;  %v407_v43 = vmax.f32 %v5786_v17, 0.0  ;;  %v303_v45 = vld [vmem:[%s5507_s18 + $0xe8] sm:$0xff]  ;;  %v541_v46 = vld [vmem:[%s6873_s3 + $0x30] sm:$0xff] }
  0x35   : > { %489 = vst [vmem:[#allocation2 + $0xf1] sm:$0xff] %v402_v53  ;;  %490 = vst [vmem:[#allocation2 + $0xf9] sm:$0xff] %v403_v59  ;;  %v5811_v60 = vadd.f32 %v5534_v32, %v337_v20  ;;  %4382 = vmatmul.mubr.f32.gmra.mrb[2].mxu0 %v5595_v3  ;;  %4064 = vmatprep.mubr.f32.mxu1 %v5593_v2  ;;  %v542_v49 = vld [vmem:[%s6873_s3 + $0x38] sm:$0xff]  ;;  %v5825_v56 = vadd.f32 %v5534_v32, %v338_v6  ;;  %v3532_v21 = vld [vmem:[%s6873_s3 + $0x2c0] sm:$0xff] }
  0x36   : > { %491 = vst [vmem:[#allocation2 + $0x109] sm:$0xff] %v404_v14  ;;  %492 = vst [vmem:[#allocation2 + $0x111] sm:$0xff] %v405_v15  ;;  %v5828_v58 = vadd.f32 %v5534_v32, %v339_v23  ;;  %v5831_v0 = vadd.f32 %v5534_v32, %v340_v28  ;;  %4913 = vmatpush3.bf16.msra.mxu0 %v5711_v24  ;;  %4384 = vmatprep.mubr.f32.mxu0 %v5601_v9  ;;  %v3533_v6 = vld [vmem:[%s6873_s3 + $0x2c8] sm:$0xff]  ;;  %v3547_v38 = vld [vmem:[%s6873_s3 + $0x338] sm:$0xff] }
  0x37   : > { %493 = vst [vmem:[#allocation2 + $0x121] sm:$0xff] %v406_v48  ;;  %494 = vst [vmem:[#allocation2 + $0x129] sm:$0xff] %v407_v43  ;;  %v408_v2 = vmax.f32 %v5811_v60, 0.0  ;;  %v341_v4 = vmul.f32 %v5529_v31, %v302_v33  ;;  %v342_v10 = vmul.f32 %v5529_v31, %v303_v45  ;;  %4915 = vmatprep.subr.bf16.mxu0 %v5762_v5  ;;  %4785 = vmatpush3.bf16.msra.mxu1 %v5719_v35  ;;  %v544_v33 = vld [vmem:[%s6873_s3 + $0x48] sm:$0xff]  ;;  %v3534_v45 = vld [vmem:[%s6873_s3 + $0x2d0] sm:$0xff] }
  0x38   : > { %v4918_v11 = vpack.c.bf16 %v3531_v41, %v3530_v34  ;;  %v409_v12 = vmax.f32 %v5825_v56, 0.0  ;;  %v410_v24 = vmax.f32 %v5828_v58, 0.0  ;;  %v411_v20 = vmax.f32 %v5831_v0, 0.0  ;;  %4065 = vmatmul.mubr.f32.gmra.mrb[4].mxu1 %v5595_v3  ;;  %4787 = vmatprep.subr.bf16.mxu1 %v4786_v42  ;;  %v543_v3 = vld [vmem:[%s6873_s3 + $0x40] sm:$0xff]  ;;  %v3549_v40 = vld [vmem:[%s6873_s3 + $0x348] sm:$0xff]  ;;  %v3551_v61 = vld [vmem:[%s6873_s3 + $0x358] sm:$0xff] }
  0x39   : > { %v4790_v23 = vpack.c.bf16 %v542_v49, %v541_v46  ;;  %495 = vst [vmem:[#allocation2 + $0x139] sm:$0xff] %v408_v2  ;;  %v5855_v35 = vadd.f32 %v5534_v32, %v341_v4  ;;  %v5858_v28 = vadd.f32 %v5534_v32, %v342_v10  ;;  %4385 = vmatmul.mubr.f32.gmra.mrb[4].mxu0 %v5622_v22  ;;  %v3535_v46 = vld [vmem:[%s6873_s3 + $0x2d8] sm:$0xff]  ;;  %v3537_v4 = vld [vmem:[%s6873_s3 + $0x2e8] sm:$0xff] }
  0x3a   : > { %4067 = vmatprep.mubr.f32.mxu1 %v5601_v9  ;;  %496 = vst [vmem:[#allocation2 + $0x141] sm:$0xff] %v409_v12  ;;  %497 = vst [vmem:[#allocation2 + $0x151] sm:$0xff] %v410_v24  ;;  %4917 = vmatpush3.bf16.msra.mxu0 %v5762_v5  ;;  %v4922_v41 = vpack.c.bf16 %v3533_v6, %v3532_v21  ;;  %v4794_v5 = vpack.c.bf16 %v544_v33, %v543_v3  ;;  %v3538_v6 = vld [vmem:[%s6873_s3 + $0x2f0] sm:$0xff]  ;;  %v305_v33 = vld [vmem:[%s5507_s18 + $0xf8] sm:$0xff] }
  0x3b   : > { %498 = vst [vmem:[#allocation2 + $0x159] sm:$0xff] %v411_v20  ;;  %4387 = vmatprep.mubr.f32.mxu0 %v5633_v29  ;;  %v412_v9 = vmax.f32 %v5855_v35, 0.0  ;;  %v413_v34 = vmax.f32 %v5858_v28, 0.0  ;;  %4919 = vmatprep.subr.bf16.mxu0 %v4918_v11  ;;  %v4926_v49 = vpack.c.bf16 %v3535_v46, %v3534_v45  ;;  %v304_v3 = vld [vmem:[%s5507_s18 + $0xf0] sm:$0xff]  ;;  %v344_v46 = vmul.f32 %v5529_v31, %v305_v33  ;;  %v6010_v39 = vld [vmem:[#allocation2 + $0x62] sm:$0xff]  ;;  %v6026_v44 = vld [vmem:[#allocation2 + $0x7a] sm:$0xff] }
  0x3c   : > { %4789 = vmatpush3.bf16.msra.mxu1 %v4786_v42  ;;  %v546_v42 = vld [vmem:[%s6873_s3 + $0x58] sm:$0xff]  ;;  %v343_v45 = vmul.f32 %v5529_v31, %v304_v3  ;;  %v3541_v31 = vld [vmem:[%s6873_s3 + $0x308] sm:$0xff] }
  0x3d   : > { %4068 = vmatmul.mubr.f32.gmra.mrb[6].mxu1 %v5622_v22  ;;  %4791 = vmatprep.subr.bf16.mxu1 %v4790_v23  ;;  %499 = vst [vmem:[#allocation2 + $0x169] sm:$0xff] %v412_v9  ;;  %500 = vst [vmem:[#allocation2 + $0x171] sm:$0xff] %v413_v34  ;;  %v545_v22 = vld [vmem:[%s6873_s3 + $0x50] sm:$0xff]  ;;  %v5992_v3 = vld [vmem:[#allocation2 + $0x3a] sm:$0xff] }
  0x3e   : > { %4388 = vmatmul.mubr.f32.gmra.mrb[6].mxu0 %v5635_v30  ;;  %4070 = vmatprep.mubr.f32.mxu1 %v5633_v29  ;;  %v3536_v29 = vld [vmem:[%s6873_s3 + $0x2e0] sm:$0xff]  ;;  %v4798_v10 = vpack.c.bf16 %v546_v42, %v545_v22  ;;  %v5938_v22 = vadd.f32 %v5534_v32, %v344_v46  ;;  %v6042_v63 = vld [vmem:[#allocation2 + $0x92] sm:$0xff]  ;;  %v3553_v62 = vld [vmem:[%s6873_s3 + $0x368] sm:$0xff] }
  0x3f   : > { %4921 = vmatpush3.bf16.msra.mxu0 %v4918_v11  ;;  %4390 = vmatprep.mubr.f32.mxu0 %v5641_v36  ;;  %v548_v11 = vld [vmem:[%s6873_s3 + $0x68] sm:$0xff]  ;;  %v4930_v21 = vpack.c.bf16 %v3537_v4, %v3536_v29  ;;  %v3540_v42 = vld [vmem:[%s6873_s3 + $0x300] sm:$0xff]  ;;  %v3555_v60 = vld [vmem:[%s6873_s3 + $0x378] sm:$0xff] }
  0x40   : > { %4923 = vmatprep.subr.bf16.mxu0 %v4922_v41  ;;  %4793 = vmatpush3.bf16.msra.mxu1 %v4790_v23  ;;  %6907 = vst [vmem:[#allocation9_spill] sm:$0xff] %v5938_v22  ;;  %v6878_v4 = vmax.f32 %v5938_v22, 0.0  ;;  %v3552_v46 = vld [vmem:[%s6873_s3 + $0x360] sm:$0xff]  ;;  %v6058_v17 = vld [vmem:[#allocation2 + $0xaa] sm:$0xff]  ;;  %v3479_v35 = vld [vmem:[%s6873_s3 + $0x118] sm:$0xff] }
  0x41   : > { %4071 = vmatmul.mubr.f32.gmra.mrb[8].mxu1 %v5635_v30  ;;  %4795 = vmatprep.subr.bf16.mxu1 %v4794_v5  ;;  %v547_v30 = vld [vmem:[%s6873_s3 + $0x60] sm:$0xff]  ;;  %v3557_v58 = vld [vmem:[%s6873_s3 + $0x388] sm:$0xff]  ;;  %v6109_v28 = vld [vmem:[#allocation2 + $0xf2] sm:$0xff] }
  0x42   : > { %4391 = vmatmul.mubr.f32.gmra.mrb[8].mxu0 %v5668_v51  ;;  %4073 = vmatprep.mubr.f32.mxu1 %v5641_v36  ;;  %v3539_v36 = vld [vmem:[%s6873_s3 + $0x2f8] sm:$0xff]  ;;  %v4802_v23 = vpack.c.bf16 %v548_v11, %v547_v30  ;;  %v4938_v30 = vpack.c.bf16 %v3541_v31, %v3540_v42  ;;  %502 = vst [vmem:[#allocation2 + $0x189] sm:$0xff] %v6878_v4  ;;  %v6074_v56 = vld [vmem:[#allocation2 + $0xc2] sm:$0xff]  ;;  %v3478_v31 = vld [vmem:[%s6873_s3 + $0x110] sm:$0xff] }
  0x43   : > { %4925 = vmatpush3.bf16.msra.mxu0 %v4922_v41  ;;  %4393 = vmatprep.mubr.f32.mxu0 %v5672_v54  ;;  %v549_v41 = vld [vmem:[%s6873_s3 + $0x70] sm:$0xff]  ;;  %v3543_v11 = vld [vmem:[%s6873_s3 + $0x318] sm:$0xff]  ;;  %v3556_v42 = vld [vmem:[%s6873_s3 + $0x380] sm:$0xff] }
  0x44   : > { %4927 = vmatprep.subr.bf16.mxu0 %v4926_v49  ;;  %4797 = vmatpush3.bf16.msra.mxu1 %v4794_v5  ;;  %v4934_v5 = vpack.c.bf16 %v3539_v36, %v3538_v6  ;;  %v5976_v6 = vld [vmem:[#allocation2 + $0x22] sm:$0xff]  ;;  %v6090_v0 = vld [vmem:[#allocation2 + $0xda] sm:$0xff]  ;;  %v6228_v4 = vld [vmem:[#allocation2 + $0xb0] sm:$0xff] }
  0x45   : > { %4074 = vmatmul.mubr.f32.gmra.mrb[10].mxu1 %v5668_v51  ;;  %4799 = vmatprep.subr.bf16.mxu1 %v4798_v10  ;;  %v550_v51 = vld [vmem:[%s6873_s3 + $0x78] sm:$0xff]  ;;  %6914 = vst [vmem:[#allocation16_spill] sm:$0xff] %v6228_v4  ;;  %v6257_v22 = vld [vmem:[#allocation2 + $0xe0] sm:$0xff]  ;;  %v3565_v57 = vld [vmem:[%s6873_s3 + $0x3c8] sm:$0xff] }
  0x46   : > { %4394 = vmatmul.mubr.f32.gmra.mrb[10].mxu0 %v5674_v55  ;;  %4076 = vmatprep.mubr.f32.mxu1 %v5672_v54  ;;  %v5935_v54 = vadd.f32 %v5534_v32, %v343_v45  ;;  %v3476_v32 = vld [vmem:[%s6873_s3 + $0x100] sm:$0xff]  ;;  %v3550_v45 = vld [vmem:[%s6873_s3 + $0x350] sm:$0xff]  ;;  %v3559_v47 = vld [vmem:[%s6873_s3 + $0x398] sm:$0xff] }
  0x47   : > { %4929 = vmatpush3.bf16.msra.mxu0 %v4926_v49  ;;  %4396 = vmatprep.mubr.f32.mxu0 %v5687_v1  ;;  %v4806_v49 = vpack.c.bf16 %v550_v51, %v549_v41  ;;  %v3546_v41 = vld [vmem:[%s6873_s3 + $0x330] sm:$0xff]  ;;  %v3548_v51 = vld [vmem:[%s6873_s3 + $0x340] sm:$0xff]  ;;  %v3563_v19 = vld [vmem:[%s6873_s3 + $0x3b8] sm:$0xff] }
  0x48   : > { %4931 = vmatprep.subr.bf16.mxu0 %v4930_v21  ;;  %4801 = vmatpush3.bf16.msra.mxu1 %v4798_v10  ;;  %6906 = vst [vmem:[#allocation8_spill] sm:$0xff] %v5935_v54  ;;  %v6879_v29 = vmax.f32 %v5935_v54, 0.0  ;;  %v5958_v10 = vld [vmem:[#allocation2 + $0x1a] sm:$0xff]  ;;  %v6286_v37 = vld [vmem:[#allocation2 + $0x110] sm:$0xff] }
  0x49   : > { %4077 = vmatmul.mubr.f32.gmra.mrb[12].mxu1 %v5674_v55  ;;  %4803 = vmatprep.subr.bf16.mxu1 %v4802_v23  ;;  %v3477_v55 = vld [vmem:[%s6873_s3 + $0x108] sm:$0xff]  ;;  %v3564_v54 = vld [vmem:[%s6873_s3 + $0x3c0] sm:$0xff] }
  0x4a   : > { %4397 = vmatmul.mubr.f32.gmra.mrb[12].mxu0 %v5705_v16  ;;  %4079 = vmatprep.mubr.f32.mxu1 %v5687_v1  ;;  %501 = vst [vmem:[#allocation2 + $0x181] sm:$0xff] %v6879_v29  ;;  %v3542_v1 = vld [vmem:[%s6873_s3 + $0x310] sm:$0xff]  ;;  %v6230_v29 = vld [vmem:[#allocation2 + $0xc0] sm:$0xff] }
  0x4b   : > { %4933 = vmatpush3.bf16.msra.mxu0 %v4930_v21  ;;  %4399 = vmatprep.mubr.f32.mxu0 %v5713_v25  ;;  %v5971_v21 = vpack.c.bf16 %v3477_v55, %v3476_v32  ;;  %v4942_v36 = vpack.c.bf16 %v3543_v11, %v3542_v1  ;;  %v3480_v32 = vld [vmem:[%s6873_s3 + $0x120] sm:$0xff]  ;;  %v3481_v55 = vld [vmem:[%s6873_s3 + $0x128] sm:$0xff]  ;;  %6915 = vst [vmem:[#allocation17_spill] sm:$0xff] %v6230_v29 }
  0x4c   : > { %4935 = vmatprep.subr.bf16.mxu0 %v4934_v5  ;;  %4805 = vmatpush3.bf16.msra.mxu1 %v4802_v23  ;;  %v3544_v23 = vld [vmem:[%s6873_s3 + $0x320] sm:$0xff]  ;;  %v6129_v11 = vld [vmem:[#allocation2 + $0x10a] sm:$0xff] }
  0x4d   : > { %4080 = vmatmul.mubr.f32.gmra.mrb[14].mxu1 %v5705_v16  ;;  %4807 = vmatprep.subr.bf16.mxu1 %v4806_v49  ;;  %v5978_v16 = vld [vmem:[#allocation2 + $0x32] sm:$0xff]  ;;  %v6125_v1 = vld [vmem:[#allocation2 + $0xfa] sm:$0xff]  ;;  %v1051_v26 = vld [vmem:[#allocation2 + $0xa] sm:$0xff] }
  0x4e   : > { %4400 = vmatmul.mubr.f32.gmra.mrb[14].mxu0 %v5715_v27  ;;  %4082 = vmatprep.mubr.f32.mxu1 %v5713_v25  ;;  %v3545_v25 = vld [vmem:[%s6873_s3 + $0x328] sm:$0xff] }
  0x4f   : > { %4937 = vmatpush3.bf16.msra.mxu0 %v4934_v5  ;;  %4458 = vmatprep.mubr.f32.mxu0 %v5958_v10  ;;  %v4946_v33 = vpack.c.bf16 %v3545_v25, %v3544_v23  ;;  %v3554_v5 = vld [vmem:[%s6873_s3 + $0x370] sm:$0xff]  ;;  %v3483_v23 = vld [vmem:[%s6873_s3 + $0x138] sm:$0xff] }
  0x50   : > { %4939 = vmatprep.subr.bf16.mxu0 %v4938_v30  ;;  %4809 = vmatpush3.bf16.msra.mxu1 %v4806_v49  ;;  %v6107_v49 = vld [vmem:[#allocation2 + $0x18] sm:$0xff] }
  0x51   : > { %4083 = vmatmul.mubr.f32.gmra.mrb[16].mxu1 %v5715_v27  ;;  %4811 = vmatprep.subr.bf16.mxu1 %v5971_v21  ;;  %v5994_v27 = vld [vmem:[#allocation2 + $0x4a] sm:$0xff]  ;;  %v6140_v25 = vld [vmem:[#allocation2 + $0x38] sm:$0xff] }
  0x52   : > { %4459 = vmatmul.mubr.f32.vlgmr.msra.gmra.mrb[0].mxu0 %v5976_v6  ;;  %4085 = vmatprep.mubr.f32.mxu1 %v400_v50  ;;  %v6008_v50 = vld [vmem:[#allocation2 + $0x52] sm:$0xff] }
  0x53   : > { %4941 = vmatpush3.bf16.msra.mxu0 %v4938_v30  ;;  %4461 = vmatprep.mubr.f32.mxu0 %v5978_v16  ;;  %v6121_v30 = vld [vmem:[#allocation2 + $0x20] sm:$0xff] }
  0x54   : > { %4943 = vmatprep.subr.bf16.mxu0 %v4942_v36 }
  0x55   : > { %4086 = vmatmul.mubr.f32.gmra.mrb[18].mxu1 %v401_v52  ;;  %v4950_v52 = vpack.c.bf16 %v3547_v38, %v3546_v41  ;;  %v6145_v41 = vld [vmem:[#allocation2 + $0x48] sm:$0xff] }
  0x56   : > { %4462 = vmatmul.mubr.f32.gmra.mrb[2].mxu0 %v5992_v3  ;;  %4088 = vmatprep.mubr.f32.mxu1 %v402_v53  ;;  %v6024_v53 = vld [vmem:[#allocation2 + $0x6a] sm:$0xff]  ;;  %v6147_v38 = vld [vmem:[#allocation2 + $0x122] sm:$0xff] }
  0x57   : > { %4464 = vmatprep.mubr.f32.mxu0 %v5994_v27  ;;  %4945 = vmatpush3.bf16.msra.mxu0 %v4942_v36  ;;  %v4818_v36 = vpack.c.bf16 %v3481_v55, %v3480_v32  ;;  %v6197_v32 = vld [vmem:[#allocation2 + $0x15a] sm:$0xff]  ;;  %v6199_v55 = vld [vmem:[#allocation2 + $0x90] sm:$0xff] }
  0x58   : > { %4947 = vmatprep.subr.bf16.mxu0 %v4946_v33  ;;  %6911 = vst [vmem:[#allocation13_spill] sm:$0xff] %v6199_v55 }
  0x59   : > { %4089 = vmatmul.mubr.f32.gmra.mrb[20].mxu1 %v403_v59  ;;  %v4954_v59 = vpack.c.bf16 %v3549_v40, %v3548_v51  ;;  %v3484_v51 = vld [vmem:[%s6873_s3 + $0x140] sm:$0xff]  ;;  %v3485_v40 = vld [vmem:[%s6873_s3 + $0x148] sm:$0xff] }
  0x5a   : > { %4465 = vmatmul.mubr.f32.gmra.mrb[4].mxu0 %v6008_v50  ;;  %4091 = vmatprep.mubr.f32.mxu1 %v404_v14  ;;  %v6040_v14 = vld [vmem:[#allocation2 + $0x82] sm:$0xff] }
  0x5b   : > { %4467 = vmatprep.mubr.f32.mxu0 %v6010_v39  ;;  %4949 = vmatpush3.bf16.msra.mxu0 %v4946_v33  ;;  %v6143_v33 = vld [vmem:[#allocation2 + $0x112] sm:$0xff] }
  0x5c   : > { %4951 = vmatprep.subr.bf16.mxu0 %v4950_v52 }
  0x5d   : > { %4092 = vmatmul.mubr.f32.gmra.mrb[22].mxu1 %v405_v15  ;;  %v4958_v15 = vpack.c.bf16 %v3551_v61, %v3550_v45  ;;  %v6161_v45 = vld [vmem:[#allocation2 + $0x12a] sm:$0xff]  ;;  %v6163_v61 = vld [vmem:[#allocation2 + $0x60] sm:$0xff] }
  0x5e   : > { %4468 = vmatmul.mubr.f32.gmra.mrb[6].mxu0 %v6024_v53  ;;  %4094 = vmatprep.mubr.f32.mxu1 %v406_v48  ;;  %v6056_v48 = vld [vmem:[#allocation2 + $0x9a] sm:$0xff] }
  0x5f   : > { %4470 = vmatprep.mubr.f32.mxu0 %v6026_v44  ;;  %4953 = vmatpush3.bf16.msra.mxu0 %v4950_v52 }
  0x60   : > { %4955 = vmatprep.subr.bf16.mxu0 %v4954_v59 }
  0x61   : > { %4095 = vmatmul.mubr.f32.gmra.mrb[24].mxu1 %v407_v43  ;;  %v4962_v43 = vpack.c.bf16 %v3553_v62, %v3552_v46  ;;  %v4826_v46 = vpack.c.bf16 %v3485_v40, %v3484_v51  ;;  %v3486_v62 = vld [vmem:[%s6873_s3 + $0x150] sm:$0xff]  ;;  %v6212_v51 = vld [vmem:[#allocation2 + $0x98] sm:$0xff] }
  0x62   : > { %4471 = vmatmul.mubr.f32.gmra.mrb[8].mxu0 %v6040_v14  ;;  %4097 = vmatprep.mubr.f32.mxu1 %v408_v2  ;;  %v6072_v2 = vld [vmem:[#allocation2 + $0xb2] sm:$0xff]  ;;  %6912 = vst [vmem:[#allocation14_spill] sm:$0xff] %v6212_v51 }
  0x63   : > { %4473 = vmatprep.mubr.f32.mxu0 %v6042_v63  ;;  %4957 = vmatpush3.bf16.msra.mxu0 %v4954_v59  ;;  %v6158_v59 = vld [vmem:[#allocation2 + $0x50] sm:$0xff] }
  0x64   : > { %4959 = vmatprep.subr.bf16.mxu0 %v4958_v15  ;;  %v6215_v40 = vld [vmem:[#allocation2 + $0x172] sm:$0xff] }
  0x65   : > { %4098 = vmatmul.mubr.f32.gmra.mrb[26].mxu1 %v409_v12  ;;  %v4966_v12 = vpack.c.bf16 %v3555_v60, %v3554_v5  ;;  %v6176_v5 = vld [vmem:[#allocation2 + $0x68] sm:$0xff] }
  0x66   : > { %4474 = vmatmul.mubr.f32.gmra.mrb[10].mxu0 %v6056_v48  ;;  %4100 = vmatprep.mubr.f32.mxu1 %v410_v24  ;;  %v6088_v24 = vld [vmem:[#allocation2 + $0xca] sm:$0xff]  ;;  %6908 = vst [vmem:[#allocation10_spill] sm:$0xff] %v6176_v5  ;;  %v6179_v60 = vld [vmem:[#allocation2 + $0x142] sm:$0xff] }
  0x67   : > { %4476 = vmatprep.mubr.f32.mxu0 %v6058_v17  ;;  %4961 = vmatpush3.bf16.msra.mxu0 %v4958_v15  ;;  %v6165_v15 = vld [vmem:[#allocation2 + $0x13a] sm:$0xff] }
  0x68   : > { %4963 = vmatprep.subr.bf16.mxu0 %v4962_v43 }
  0x69   : > { %4101 = vmatmul.mubr.f32.gmra.mrb[28].mxu1 %v411_v20  ;;  %v6092_v20 = vpack.c.bf16 %v3557_v58, %v3556_v42  ;;  %v6183_v42 = vld [vmem:[#allocation2 + $0x152] sm:$0xff] }
  0x6a   : > { %4477 = vmatmul.mubr.f32.gmra.mrb[12].mxu0 %v6072_v2  ;;  %4103 = vmatprep.mubr.f32.mxu1 %v412_v9  ;;  %v6105_v9 = vld [vmem:[#allocation2 + $0xe2] sm:$0xff] }
  0x6b   : > { %4479 = vmatprep.mubr.f32.mxu0 %v6074_v56  ;;  %4965 = vmatpush3.bf16.msra.mxu0 %v4962_v43  ;;  %v3487_v43 = vld [vmem:[%s6873_s3 + $0x158] sm:$0xff] }
  0x6c   : > { %4967 = vmatprep.subr.bf16.mxu0 %v4966_v12  ;;  %v4830_v58 = vpack.c.bf16 %v3487_v43, %v3486_v62  ;;  %v1998_v62 = vld [vmem:[#allocation2 + $0x182] sm:$0xff] }
  0x6d   : > { %4104 = vmatmul.mubr.f32.gmra.mrb[30].mxu1 %v413_v34  ;;  %v4814_v34 = vpack.c.bf16 %v3479_v35, %v3478_v31  ;;  %v3488_v31 = vld [vmem:[%s6873_s3 + $0x160] sm:$0xff]  ;;  %v3489_v35 = vld [vmem:[%s6873_s3 + $0x168] sm:$0xff] }
  0x6e   : > { %4480 = vmatmul.mubr.f32.gmra.mrb[14].mxu0 %v6088_v24  ;;  %4138 = vmatprep.mubr.f32.mxu1 %v5328_v7 }
  0x6f   : > { %4482 = vmatprep.mubr.f32.mxu0 %v6090_v0  ;;  %4969 = vmatpush3.bf16.msra.mxu0 %v4966_v12  ;;  %v6181_v12 = vld [vmem:[#allocation2 + $0x78] sm:$0xff] }
  0x70   : > { %4971 = vmatprep.subr.bf16.mxu0 %v6092_v20  ;;  %6909 = vst [vmem:[#allocation11_spill] sm:$0xff] %v6181_v12 }
  0x71   : > { %4139 = vmatmul.mubr.f32.vlgmr.msra.gmra.mrb[0].mxu1 %v5328_v7  ;;  %v6127_v7 = vld [vmem:[#allocation2 + $0x30] sm:$0xff] }
  0x72   : > { %4483 = vmatmul.mubr.f32.gmra.mrb[16].mxu0 %v6105_v9  ;;  %4813 = vmatpush3.bf16.msra.mxu1 %v5971_v21  ;;  %v3482_v21 = vld [vmem:[%s6873_s3 + $0x130] sm:$0xff] }
  0x73   : > { %4141 = vmatprep.mubr.f32.mxu1 %v6107_v49  ;;  %4485 = vmatprep.mubr.f32.mxu0 %v6109_v28  ;;  %v4822_v52 = vpack.c.bf16 %v3483_v23, %v3482_v21  ;;  %v4834_v21 = vpack.c.bf16 %v3489_v35, %v3488_v31  ;;  %v3490_v23 = vld [vmem:[%s6873_s3 + $0x170] sm:$0xff]  ;;  %v3492_v31 = vld [vmem:[%s6873_s3 + $0x180] sm:$0xff]  ;;  %v3493_v35 = vld [vmem:[%s6873_s3 + $0x188] sm:$0xff] }
  0x74   : > { %4815 = vmatprep.subr.bf16.mxu1 %v4814_v34 }
  0x75   : > { %4142 = vmatmul.mubr.f32.gmra.mrb[2].mxu1 %v6121_v30 }
  0x76   : > { %4486 = vmatmul.mubr.f32.gmra.mrb[18].mxu0 %v6125_v1  ;;  %4144 = vmatprep.mubr.f32.mxu1 %v6127_v7 }
  0x77   : > { %4488 = vmatprep.mubr.f32.mxu0 %v6129_v11  ;;  %4817 = vmatpush3.bf16.msra.mxu1 %v4814_v34  ;;  %v6194_v34 = vld [vmem:[#allocation2 + $0x80] sm:$0xff] }
  0x78   : > { %4819 = vmatprep.subr.bf16.mxu1 %v4818_v36  ;;  %6910 = vst [vmem:[#allocation12_spill] sm:$0xff] %v6194_v34 }
  0x79   : > { %4145 = vmatmul.mubr.f32.gmra.mrb[4].mxu1 %v6140_v25 }
  0x7a   : > { %4489 = vmatmul.mubr.f32.gmra.mrb[20].mxu0 %v6143_v33  ;;  %4147 = vmatprep.mubr.f32.mxu1 %v6145_v41 }
  0x7b   : > { %4491 = vmatprep.mubr.f32.mxu0 %v6147_v38  ;;  %4821 = vmatpush3.bf16.msra.mxu1 %v4818_v36  ;;  %v6201_v36 = vld [vmem:[#allocation2 + $0x16a] sm:$0xff] }
  0x7c   : > { %4823 = vmatprep.subr.bf16.mxu1 %v4822_v52 }
  0x7d   : > { %4148 = vmatmul.mubr.f32.gmra.mrb[6].mxu1 %v6158_v59 }
  0x7e   : > { %4492 = vmatmul.mubr.f32.gmra.mrb[22].mxu0 %v6161_v45  ;;  %4150 = vmatprep.mubr.f32.mxu1 %v6163_v61 }
  0x7f   : > { %4494 = vmatprep.mubr.f32.mxu0 %v6165_v15  ;;  %4825 = vmatpush3.bf16.msra.mxu1 %v4822_v52  ;;  %v3491_v52 = vld [vmem:[%s6873_s3 + $0x178] sm:$0xff] }
  0x80   : > { %4827 = vmatprep.subr.bf16.mxu1 %v4826_v46  ;;  %v4838_v43 = vpack.c.bf16 %v3491_v52, %v3490_v23  ;;  %v6232_v23 = vpack.c.bf16 %v3493_v35, %v3492_v31  ;;  %v3558_v52 = vld [vmem:[%s6873_s3 + $0x390] sm:$0xff]  ;;  %v3560_v35 = vld [vmem:[%s6873_s3 + $0x3a0] sm:$0xff] }
  0x81   : > { %4151 = vmatmul.mubr.f32.gmra.mrb[8].mxu1 %v6176_v5  ;;  %v4974_v31 = vpack.c.bf16 %v3559_v47, %v3558_v52  ;;  %v6261_v47 = vld [vmem:[#allocation2 + $0xf0] sm:$0xff] }
  0x82   : > { %4495 = vmatmul.mubr.f32.gmra.mrb[24].mxu0 %v6179_v60  ;;  %4153 = vmatprep.mubr.f32.mxu1 %v6181_v12  ;;  %v3562_v52 = vld [vmem:[%s6873_s3 + $0x3b0] sm:$0xff] }
  0x83   : > { %4497 = vmatprep.mubr.f32.mxu0 %v6183_v42  ;;  %4829 = vmatpush3.bf16.msra.mxu1 %v4826_v46  ;;  %v6217_v46 = vld [vmem:[#allocation2 + $0xa8] sm:$0xff] }
  0x84   : > { %4831 = vmatprep.subr.bf16.mxu1 %v4830_v58  ;;  %6913 = vst [vmem:[#allocation15_spill] sm:$0xff] %v6217_v46 }
  0x85   : > { %4154 = vmatmul.mubr.f32.gmra.mrb[10].mxu1 %v6194_v34 }
  0x86   : > { %4498 = vmatmul.mubr.f32.gmra.mrb[26].mxu0 %v6197_v32  ;;  %4156 = vmatprep.mubr.f32.mxu1 %v6199_v55 }
  0x87   : > { %4500 = vmatprep.mubr.f32.mxu0 %v6201_v36  ;;  %4833 = vmatpush3.bf16.msra.mxu1 %v4830_v58  ;;  %v1999_v58 = vld [vmem:[#allocation2 + $0x18a] sm:$0xff] }
  0x88   : > { %4835 = vmatprep.subr.bf16.mxu1 %v4834_v21 }
  0x89   : > { %4157 = vmatmul.mubr.f32.gmra.mrb[12].mxu1 %v6212_v51 }
  0x8a   : > { %4501 = vmatmul.mubr.f32.gmra.mrb[28].mxu0 %v6215_v40  ;;  %4159 = vmatprep.mubr.f32.mxu1 %v6217_v46 }
  0x8b   : > { %4503 = vmatprep.mubr.f32.mxu0 %v1998_v62  ;;  %4837 = vmatpush3.bf16.msra.mxu1 %v4834_v21  ;;  %v6242_v62 = vld [vmem:[#allocation2 + $0xc8] sm:$0xff]  ;;  %v6245_v21 = vld [vmem:[#allocation2 + $0xd8] sm:$0xff] }
  0x8c   : > { %4839 = vmatprep.subr.bf16.mxu1 %v4838_v43  ;;  %6916 = vst [vmem:[#allocation18_spill] sm:$0xff] %v6242_v62 }
  0x8d   : > { %4160 = vmatmul.mubr.f32.gmra.mrb[14].mxu1 %v6228_v4 }
  0x8e   : > { %4504 = vmatmul.mubr.f32.gmra.mrb[30].mxu0 %v1999_v58  ;;  %4162 = vmatprep.mubr.f32.mxu1 %v6230_v29  ;;  %v3561_v58 = vld [vmem:[%s6873_s3 + $0x3a8] sm:$0xff] }
  0x8f   : > { %4538 = vmatprep.mubr.f32.mxu0 %v6127_v7  ;;  %4841 = vmatpush3.bf16.msra.mxu1 %v4838_v43  ;;  %v4978_v43 = vpack.c.bf16 %v3561_v58, %v3560_v35  ;;  %v6275_v35 = vld [vmem:[#allocation2 + $0x108] sm:$0xff]  ;;  %v4982_v58 = vpack.c.bf16 %v3563_v19, %v3562_v52  ;;  %v4986_v19 = vpack.c.bf16 %v3565_v57, %v3564_v54  ;;  %v3566_v52 = vld [vmem:[%s6873_s3 + $0x3d0] sm:$0xff]  ;;  %v3568_v54 = vld [vmem:[%s6873_s3 + $0x3e0] sm:$0xff] }
  0x90   : > { %4843 = vmatprep.subr.bf16.mxu1 %v6232_v23 }
  0x91   : > { %4163 = vmatmul.mubr.f32.gmra.mrb[16].mxu1 %v6242_v62 }
  0x92   : > { %4539 = vmatmul.mubr.f32.vlgmr.msra.gmra.mrb[0].mxu0 %v6140_v25  ;;  %4165 = vmatprep.mubr.f32.mxu1 %v6245_v21 }
  0x93   : > { %4973 = vmatpush3.bf16.msra.mxu0 %v6092_v20  ;;  %4541 = vmatprep.mubr.f32.mxu0 %v6145_v41  ;;  %v6272_v20 = vld [vmem:[#allocation2 + $0xf8] sm:$0xff] }
  0x94   : > { %4975 = vmatprep.subr.bf16.mxu0 %v4974_v31 }
  0x95   : > { %4166 = vmatmul.mubr.f32.gmra.mrb[18].mxu1 %v6257_v22 }
  0x96   : > { %4542 = vmatmul.mubr.f32.gmra.mrb[2].mxu0 %v6158_v59  ;;  %4168 = vmatprep.mubr.f32.mxu1 %v6261_v47 }
  0x97   : > { %4544 = vmatprep.mubr.f32.mxu0 %v6163_v61  ;;  %4977 = vmatpush3.bf16.msra.mxu0 %v4974_v31  ;;  %v6289_v31 = vld [vmem:[#allocation2 + $0x120] sm:$0xff] }
  0x98   : > { %4979 = vmatprep.subr.bf16.mxu0 %v4978_v43 }
  0x99   : > { %4169 = vmatmul.mubr.f32.gmra.mrb[20].mxu1 %v6272_v20 }
  0x9a   : > { %4545 = vmatmul.mubr.f32.gmra.mrb[4].mxu0 %v6176_v5  ;;  %4171 = vmatprep.mubr.f32.mxu1 %v6275_v35  ;;  %v3567_v5 = vld [vmem:[%s6873_s3 + $0x3d8] sm:$0xff] }
  0x9b   : > { %4547 = vmatprep.mubr.f32.mxu0 %v6181_v12  ;;  %4981 = vmatpush3.bf16.msra.mxu0 %v4978_v43  ;;  %v6300_v12 = vld [vmem:[#allocation2 + $0x128] sm:$0xff]  ;;  %v6303_v43 = vld [vmem:[#allocation2 + $0x138] sm:$0xff]  ;;  %v4990_v57 = vpack.c.bf16 %v3567_v5, %v3566_v52  ;;  %v3570_v52 = vld [vmem:[%s6873_s3 + $0x3f0] sm:$0xff] }
  0x9c   : > { %4983 = vmatprep.subr.bf16.mxu0 %v4982_v58 }
  0x9d   : > { %4172 = vmatmul.mubr.f32.gmra.mrb[22].mxu1 %v6286_v37 }
  0x9e   : > { %4548 = vmatmul.mubr.f32.gmra.mrb[6].mxu0 %v6194_v34  ;;  %4174 = vmatprep.mubr.f32.mxu1 %v6289_v31  ;;  %v3569_v34 = vld [vmem:[%s6873_s3 + $0x3e8] sm:$0xff] }
  0x9f   : > { %4550 = vmatprep.mubr.f32.mxu0 %v6199_v55  ;;  %4985 = vmatpush3.bf16.msra.mxu0 %v4982_v58  ;;  %v6314_v55 = vld [vmem:[#allocation2 + $0x140] sm:$0xff]  ;;  %v6317_v58 = vld [vmem:[#allocation2 + $0x150] sm:$0xff]  ;;  %v4994_v5 = vpack.c.bf16 %v3569_v34, %v3568_v54 }
  0xa0   : > { %4987 = vmatprep.subr.bf16.mxu0 %v4986_v19  ;;  %v3572_v54 = vld [vmem:[%s6873_s3 + $0x400] sm:$0xff] }
  0xa1   : > { %4175 = vmatmul.mubr.f32.gmra.mrb[24].mxu1 %v6300_v12 }
  0xa2   : > { %4551 = vmatmul.mubr.f32.gmra.mrb[8].mxu0 %v6212_v51  ;;  %4177 = vmatprep.mubr.f32.mxu1 %v6303_v43  ;;  %v3571_v51 = vld [vmem:[%s6873_s3 + $0x3f8] sm:$0xff] }
  0xa3   : > { %4553 = vmatprep.mubr.f32.mxu0 %v6217_v46  ;;  %4989 = vmatpush3.bf16.msra.mxu0 %v4986_v19  ;;  %v6328_v46 = vld [vmem:[#allocation2 + $0x158] sm:$0xff]  ;;  %v6331_v19 = vld [vmem:[#allocation2 + $0x168] sm:$0xff]  ;;  %v4998_v34 = vpack.c.bf16 %v3571_v51, %v3570_v52  ;;  %v3494_v52 = vld [vmem:[%s6873_s3 + $0x190] sm:$0xff] }
  0xa4   : > { %4991 = vmatprep.subr.bf16.mxu0 %v4990_v57 }
  0xa5   : > { %4178 = vmatmul.mubr.f32.gmra.mrb[26].mxu1 %v6314_v55 }
  0xa6   : > { %4554 = vmatmul.mubr.f32.gmra.mrb[10].mxu0 %v6228_v4  ;;  %4180 = vmatprep.mubr.f32.mxu1 %v6317_v58  ;;  %v3573_v4 = vld [vmem:[%s6873_s3 + $0x408] sm:$0xff] }
  0xa7   : > { %4556 = vmatprep.mubr.f32.mxu0 %v6230_v29  ;;  %4993 = vmatpush3.bf16.msra.mxu0 %v4990_v57  ;;  %v6342_v29 = vld [vmem:[#allocation2 + $0x170] sm:$0xff]  ;;  %v1050_v57 = vld [vmem:[#allocation2 + $0x2] sm:$0xff]  ;;  %v6345_v51 = vpack.c.bf16 %v3573_v4, %v3572_v54 }
  0xa8   : > { %4995 = vmatprep.subr.bf16.mxu0 %v4994_v5  ;;  %v3496_v4 = vld [vmem:[%s6873_s3 + $0x1a0] sm:$0xff]  ;;  %v3497_v54 = vld [vmem:[%s6873_s3 + $0x1a8] sm:$0xff] }
  0xa9   : > { %4181 = vmatmul.mubr.f32.gmra.mrb[28].mxu1 %v6328_v46 }
  0xaa   : > { %4557 = vmatmul.mubr.f32.gmra.mrb[12].mxu0 %v6242_v62  ;;  %4183 = vmatprep.mubr.f32.mxu1 %v6331_v19  ;;  %v3495_v62 = vld [vmem:[%s6873_s3 + $0x198] sm:$0xff] }
  0xab   : > { %4559 = vmatprep.mubr.f32.mxu0 %v6245_v21  ;;  %4997 = vmatpush3.bf16.msra.mxu0 %v4994_v5  ;;  %v4846_v5 = vpack.c.bf16 %v3495_v62, %v3494_v52  ;;  %v4850_v62 = vpack.c.bf16 %v3497_v54, %v3496_v4  ;;  %v3505_v52 = vld [vmem:[%s6873_s3 + $0x1e8] sm:$0xff]  ;;  %v3507_v4 = vld [vmem:[%s6873_s3 + $0x1f8] sm:$0xff] }
  0xac   : > { %4999 = vmatprep.subr.bf16.mxu0 %v4998_v34 }
  0xad   : > { %4184 = vmatmul.mubr.f32.gmra.mrb[30].mxu1 %v6342_v29 }
  0xae   : > { %4560 = vmatmul.mubr.f32.gmra.mrb[14].mxu0 %v6257_v22  ;;  %4218 = vmatprep.mubr.f32.mxu1 %v1050_v57  ;;  %v3503_v57 = vld [vmem:[%s6873_s3 + $0x1d8] sm:$0xff] }
  0xaf   : > { %4562 = vmatprep.mubr.f32.mxu0 %v6261_v47  ;;  %5001 = vmatpush3.bf16.msra.mxu0 %v4998_v34  ;;  %v3499_v34 = vld [vmem:[%s6873_s3 + $0x1b8] sm:$0xff] }
  0xb0   : > { %5003 = vmatprep.subr.bf16.mxu0 %v6345_v51 }
  0xb1   : > { %4219 = vmatmul.mubr.f32.vlgmr.msra.gmra.mrb[0].mxu1 %v1051_v26  ;;  %v3498_v26 = vld [vmem:[%s6873_s3 + $0x1b0] sm:$0xff] }
  0xb2   : > { %4563 = vmatmul.mubr.f32.gmra.mrb[16].mxu0 %v6272_v20  ;;  %4845 = vmatpush3.bf16.msra.mxu1 %v6232_v23  ;;  %v3501_v23 = vld [vmem:[%s6873_s3 + $0x1c8] sm:$0xff] }
  0xb3   : > { %4221 = vmatprep.mubr.f32.mxu1 %v5958_v10  ;;  %4565 = vmatprep.mubr.f32.mxu0 %v6275_v35  ;;  %v4854_v10 = vpack.c.bf16 %v3499_v34, %v3498_v26  ;;  %v3575_v26 = vld [vmem:[%s6873_s3 + $0x418] sm:$0xff] }
  0xb4   : > { %4847 = vmatprep.subr.bf16.mxu1 %v4846_v5 }
  0xb5   : > { %4222 = vmatmul.mubr.f32.gmra.mrb[2].mxu1 %v5976_v6  ;;  %v3500_v6 = vld [vmem:[%s6873_s3 + $0x1c0] sm:$0xff] }
  0xb6   : > { %4566 = vmatmul.mubr.f32.gmra.mrb[18].mxu0 %v6286_v37  ;;  %4224 = vmatprep.mubr.f32.mxu1 %v5978_v16  ;;  %v4858_v16 = vpack.c.bf16 %v3501_v23, %v3500_v6  ;;  %v2585_v6 = vld [vmem:[#allocation2 + $0x61] sm:$0xff] }
  0xb7   : > { %4568 = vmatprep.mubr.f32.mxu0 %v6289_v31  ;;  %4849 = vmatpush3.bf16.msra.mxu1 %v4846_v5 }
  0xb8   : > { %4851 = vmatprep.subr.bf16.mxu1 %v4850_v62 }
  0xb9   : > { %4225 = vmatmul.mubr.f32.gmra.mrb[4].mxu1 %v5992_v3  ;;  %v3502_v3 = vld [vmem:[%s6873_s3 + $0x1d0] sm:$0xff] }
  0xba   : > { %4569 = vmatmul.mubr.f32.gmra.mrb[20].mxu0 %v6300_v12  ;;  %4227 = vmatprep.mubr.f32.mxu1 %v5994_v27  ;;  %v4862_v27 = vpack.c.bf16 %v3503_v57, %v3502_v3  ;;  %v3581_v57 = vld [vmem:[%s6873_s3 + $0x448] sm:$0xff] }
  0xbb   : > { %4571 = vmatprep.mubr.f32.mxu0 %v6303_v43  ;;  %4853 = vmatpush3.bf16.msra.mxu1 %v4850_v62  ;;  %v2581_v62 = vld [vmem:[#allocation2 + $0x31] sm:$0xff] }
  0xbc   : > { %4855 = vmatprep.subr.bf16.mxu1 %v4854_v10 }
  0xbd   : > { %4228 = vmatmul.mubr.f32.gmra.mrb[6].mxu1 %v6008_v50  ;;  %v3504_v50 = vld [vmem:[%s6873_s3 + $0x1e0] sm:$0xff] }
  0xbe   : > { %4572 = vmatmul.mubr.f32.gmra.mrb[22].mxu0 %v6314_v55  ;;  %4230 = vmatprep.mubr.f32.mxu1 %v6010_v39  ;;  %v6407_v39 = vld [vmem:[#allocation2 + $0x180] sm:$0xff]  ;;  %v4866_v5 = vpack.c.bf16 %v3505_v52, %v3504_v50  ;;  %v3583_v52 = vld [vmem:[%s6873_s3 + $0x458] sm:$0xff] }
  0xbf   : > { %4574 = vmatprep.mubr.f32.mxu0 %v6317_v58  ;;  %4857 = vmatpush3.bf16.msra.mxu1 %v4854_v10  ;;  %v3577_v10 = vld [vmem:[%s6873_s3 + $0x428] sm:$0xff] }
  0xc0   : > { %4859 = vmatprep.subr.bf16.mxu1 %v4858_v16 }
  0xc1   : > { %4231 = vmatmul.mubr.f32.gmra.mrb[8].mxu1 %v6024_v53  ;;  %v3506_v53 = vld [vmem:[%s6873_s3 + $0x1f0] sm:$0xff] }
  0xc2   : > { %4575 = vmatmul.mubr.f32.gmra.mrb[24].mxu0 %v6328_v46  ;;  %4233 = vmatprep.mubr.f32.mxu1 %v6026_v44  ;;  %v6419_v44 = vld [vmem:[#allocation2 + $0x188] sm:$0xff]  ;;  %v4870_v54 = vpack.c.bf16 %v3507_v4, %v3506_v53 }
  0xc3   : > { %4577 = vmatprep.mubr.f32.mxu0 %v6331_v19  ;;  %4861 = vmatpush3.bf16.msra.mxu1 %v4858_v16  ;;  %v3579_v16 = vld [vmem:[%s6873_s3 + $0x438] sm:$0xff]  ;;  %v3585_v4 = vld [vmem:[%s6873_s3 + $0x468] sm:$0xff] }
  0xc4   : > { %4863 = vmatprep.subr.bf16.mxu1 %v4862_v27 }
  0xc5   : > { %4234 = vmatmul.mubr.f32.gmra.mrb[10].mxu1 %v6040_v14  ;;  %v5316_v14 = vld [vmem:[#allocation2] sm:$0xff] }
  0xc6   : > { %4578 = vmatmul.mubr.f32.gmra.mrb[26].mxu0 %v6342_v29  ;;  %4236 = vmatprep.mubr.f32.mxu1 %v6042_v63  ;;  %v3574_v63 = vld [vmem:[%s6873_s3 + $0x410] sm:$0xff] }
  0xc7   : > { %4580 = vmatprep.mubr.f32.mxu0 %v6407_v39  ;;  %4865 = vmatpush3.bf16.msra.mxu1 %v4862_v27  ;;  %v5006_v34 = vpack.c.bf16 %v3575_v26, %v3574_v63  ;;  %v2589_v27 = vld [vmem:[#allocation2 + $0x91] sm:$0xff]  ;;  %v6482_v63 = vld [vmem:[#allocation2 + $0xd9] sm:$0xff] }
  0xc8   : > { %4867 = vmatprep.subr.bf16.mxu1 %v4866_v5 }
  0xc9   : > { %4237 = vmatmul.mubr.f32.gmra.mrb[12].mxu1 %v6056_v48  ;;  %v2582_v48 = vld [vmem:[#allocation2 + $0x39] sm:$0xff] }
  0xca   : > { %4581 = vmatmul.mubr.f32.gmra.mrb[28].mxu0 %v6419_v44  ;;  %4239 = vmatprep.mubr.f32.mxu1 %v6058_v17  ;;  %v2583_v17 = vld [vmem:[#allocation2 + $0x49] sm:$0xff] }
  0xcb   : > { %4583 = vmatprep.mubr.f32.mxu0 %v5316_v14  ;;  %4869 = vmatpush3.bf16.msra.mxu1 %v4866_v5  ;;  %v2591_v5 = vld [vmem:[#allocation2 + $0xa9] sm:$0xff] }
  0xcc   : > { %4871 = vmatprep.subr.bf16.mxu1 %v4870_v54 }
  0xcd   : > { %4240 = vmatmul.mubr.f32.gmra.mrb[14].mxu1 %v6072_v2  ;;  %v3576_v2 = vld [vmem:[%s6873_s3 + $0x420] sm:$0xff] }
  0xce   : > { %4584 = vmatmul.mubr.f32.gmra.mrb[30].mxu0 %v5316_v14  ;;  %4242 = vmatprep.mubr.f32.mxu1 %v6074_v56  ;;  %v2584_v56 = vld [vmem:[#allocation2 + $0x51] sm:$0xff]  ;;  %v5010_v23 = vpack.c.bf16 %v3577_v10, %v3576_v2  ;;  %v6923_v2 = vld [vmem:[#allocation5_spill] sm:$0xff]  ;;  %v6924_v10 = vld [vmem:[#allocation14_spill] sm:$0xff] }
  0xcf   : > { %4618 = vmatprep.mubr.f32.mxu0 %v2581_v62  ;;  %4873 = vmatpush3.bf16.msra.mxu1 %v4870_v54  ;;  %v2593_v54 = vld [vmem:[#allocation2 + $0xc1] sm:$0xff]  ;;  %v3587_v62 = vld [vmem:[%s6873_s3 + $0x478] sm:$0xff] }
  0xd0   : > { %5034 = vmatprep.subr.bf16.mxu1 %v5455_v8 }
  0xd1   : > { %4243 = vmatmul.mubr.f32.gmra.mrb[16].mxu1 %v6088_v24  ;;  %v3578_v24 = vld [vmem:[%s6873_s3 + $0x430] sm:$0xff] }
  0xd2   : > { %4619 = vmatmul.mubr.f32.vlgmr.msra.gmra.mrb[0].mxu0 %v2582_v48  ;;  %4245 = vmatprep.mubr.f32.mxu1 %v6090_v0  ;;  %v2586_v0 = vld [vmem:[#allocation2 + $0x69] sm:$0xff]  ;;  %v5014_v3 = vpack.c.bf16 %v3579_v16, %v3578_v24  ;;  %v6489_v48 = vld [vmem:[#allocation2 + $0xf1] sm:$0xff]  ;;  %v2611_v16 = vld [vmem:[#allocation2 + $0x199] sm:$0xff] }
  0xd3   : > { %5005 = vmatpush3.bf16.msra.mxu0 %v6345_v51  ;;  %4621 = vmatprep.mubr.f32.mxu0 %v2583_v17  ;;  %v2587_v51 = vld [vmem:[#allocation2 + $0x79] sm:$0xff] }
  0xd4   : > { %5007 = vmatprep.subr.bf16.mxu0 %v5006_v34  ;;  %v5317_v17 = vld [vmem:[#allocation2 + $0x159] sm:$0xff] }
  0xd5   : > { %4246 = vmatmul.mubr.f32.gmra.mrb[18].mxu1 %v6105_v9  ;;  %v3580_v9 = vld [vmem:[%s6873_s3 + $0x440] sm:$0xff] }
  0xd6   : > { %4622 = vmatmul.mubr.f32.gmra.mrb[2].mxu0 %v2584_v56  ;;  %4248 = vmatprep.mubr.f32.mxu1 %v6109_v28  ;;  %v2588_v28 = vld [vmem:[#allocation2 + $0x81] sm:$0xff]  ;;  %v5018_v50 = vpack.c.bf16 %v3581_v57, %v3580_v9  ;;  %v5319_v56 = vld [vmem:[#allocation2 + $0x171] sm:$0xff] }
  0xd7   : > { %4624 = vmatprep.mubr.f32.mxu0 %v2585_v6  ;;  %5009 = vmatpush3.bf16.msra.mxu0 %v5006_v34  ;;  %v5318_v34 = vld [vmem:[#allocation2 + $0x169] sm:$0xff]  ;;  %v6932_v57 = vld [vmem:[#allocation17_spill] sm:$0xff] }
  0xd8   : > { %5011 = vmatprep.subr.bf16.mxu0 %v5010_v23  ;;  %v6925_v6 = vld [vmem:[#allocation15_spill] sm:$0xff] }
  0xd9   : > { %4249 = vmatmul.mubr.f32.gmra.mrb[20].mxu1 %v6125_v1  ;;  %v3582_v1 = vld [vmem:[%s6873_s3 + $0x450] sm:$0xff] }
  0xda   : > { %4625 = vmatmul.mubr.f32.gmra.mrb[4].mxu0 %v2586_v0  ;;  %4251 = vmatprep.mubr.f32.mxu1 %v6129_v11  ;;  %v2590_v11 = vld [vmem:[#allocation2 + $0x99] sm:$0xff]  ;;  %v5022_v53 = vpack.c.bf16 %v3583_v52, %v3582_v1  ;;  %v6928_v0 = vld [vmem:[#allocation6_spill] sm:$0xff] }
  0xdb   : > { %4627 = vmatprep.mubr.f32.mxu0 %v2587_v51  ;;  %5013 = vmatpush3.bf16.msra.mxu0 %v5010_v23  ;;  %v6926_v23 = vld [vmem:[#allocation8_spill] sm:$0xff]  ;;  %v6934_v1 = vld [vmem:[#allocation18_spill] sm:$0xff] }
  0xdc   : > { %5015 = vmatprep.subr.bf16.mxu0 %v5014_v3  ;;  %v6927_v24 = vmax.f32 %v6926_v23, 0.0  ;;  %v6929_v51 = vld [vmem:[#allocation16_spill] sm:$0xff] }
  0xdd   : > { %4252 = vmatmul.mubr.f32.gmra.mrb[22].mxu1 %v6143_v33  ;;  %v3584_v33 = vld [vmem:[%s6873_s3 + $0x460] sm:$0xff] }
  0xde   : > { %4628 = vmatmul.mubr.f32.gmra.mrb[6].mxu0 %v2588_v28  ;;  %4254 = vmatprep.mubr.f32.mxu1 %v6147_v38  ;;  %v2592_v38 = vld [vmem:[#allocation2 + $0xb1] sm:$0xff]  ;;  %v5026_v14 = vpack.c.bf16 %v3585_v4, %v3584_v33  ;;  %v2612_v28 = vld [vmem:[#allocation2 + $0x1a1] sm:$0xff] }
  0xdf   : > { %4630 = vmatprep.mubr.f32.mxu0 %v2589_v27  ;;  %5017 = vmatpush3.bf16.msra.mxu0 %v5014_v3  ;;  %v6930_v3 = vld [vmem:[#allocation9_spill] sm:$0xff]  ;;  %v2887_v27 = vld [vmem:[#allocation2 + $0x32] sm:$0xff] }
  0xe0   : > { %5019 = vmatprep.subr.bf16.mxu0 %v5018_v50  ;;  %v6931_v9 = vmax.f32 %v6930_v3, 0.0  ;;  %v2888_v52 = vld [vmem:[#allocation2 + $0x3a] sm:$0xff]  ;;  %v2895_v4 = vld [vmem:[#allocation2 + $0x92] sm:$0xff] }
  0xe1   : > { %4255 = vmatmul.mubr.f32.gmra.mrb[24].mxu1 %v6161_v45  ;;  %v3586_v45 = vld [vmem:[%s6873_s3 + $0x470] sm:$0xff]  ;;  %v2893_v33 = vld [vmem:[#allocation2 + $0x7a] sm:$0xff] }
  0xe2   : > { %4631 = vmatmul.mubr.f32.gmra.mrb[8].mxu0 %v2590_v11  ;;  %4257 = vmatprep.mubr.f32.mxu1 %v6165_v15  ;;  %v2594_v15 = vld [vmem:[#allocation2 + $0xc9] sm:$0xff]  ;;  %v5030_v26 = vpack.c.bf16 %v3587_v62, %v3586_v45  ;;  %v1689_v62 = vld [vmem:[#allocation2 + $0x159] sm:$0xff] }
  0xe3   : > { %4633 = vmatprep.mubr.f32.mxu0 %v2591_v5  ;;  %5021 = vmatpush3.bf16.msra.mxu0 %v5018_v50  ;;  %v6933_v50 = vld [vmem:[#allocation7_spill] sm:$0xff] }
  0xe4   : > { %5023 = vmatprep.subr.bf16.mxu0 %v5022_v53  ;;  %v2889_v11 = vld [vmem:[#allocation2 + $0x4a] sm:$0xff]  ;;  %v2890_v5 = vld [vmem:[#allocation2 + $0x52] sm:$0xff] }
  0xe5   : > { %4258 = vmatmul.mubr.f32.gmra.mrb[26].mxu1 %v6179_v60  ;;  %v6487_v60 = vld [vmem:[#allocation2 + $0xe1] sm:$0xff]  ;;  %v2913_v45 = vld [vmem:[#allocation2 + $0x16a] sm:$0xff] }
  0xe6   : > { %4634 = vmatmul.mubr.f32.gmra.mrb[10].mxu0 %v2592_v38  ;;  %4260 = vmatprep.mubr.f32.mxu1 %v6183_v42  ;;  %v6495_v42 = vld [vmem:[#allocation2 + $0xf9] sm:$0xff]  ;;  %v2910_v38 = vld [vmem:[#allocation2 + $0x142] sm:$0xff] }
  0xe7   : > { %4636 = vmatprep.mubr.f32.mxu0 %v2593_v54  ;;  %5025 = vmatpush3.bf16.msra.mxu0 %v5022_v53  ;;  %v2891_v53 = vld [vmem:[#allocation2 + $0x62] sm:$0xff]  ;;  %v2911_v54 = vld [vmem:[#allocation2 + $0x152] sm:$0xff] }
  0xe8   : > { %5027 = vmatprep.subr.bf16.mxu0 %v5026_v14 }
  0xe9   : > { %4261 = vmatmul.mubr.f32.gmra.mrb[28].mxu1 %v6197_v32  ;;  %v6497_v32 = vld [vmem:[#allocation2 + $0x109] sm:$0xff] }
  0xea   : > { %4637 = vmatmul.mubr.f32.gmra.mrb[12].mxu0 %v2594_v15  ;;  %4263 = vmatprep.mubr.f32.mxu1 %v6201_v36  ;;  %v6504_v36 = vld [vmem:[#allocation2 + $0x111] sm:$0xff] }
  0xeb   : > { %4639 = vmatprep.mubr.f32.mxu0 %v6482_v63  ;;  %5029 = vmatpush3.bf16.msra.mxu0 %v5026_v14  ;;  %v2912_v14 = vld [vmem:[#allocation2 + $0x15a] sm:$0xff]  ;;  %v2914_v15 = vld [vmem:[#allocation2 + $0x172] sm:$0xff] }
  0xec   : > { %5031 = vmatprep.subr.bf16.mxu0 %v5030_v26 }
  0xed   : > { %4264 = vmatmul.mubr.f32.gmra.mrb[30].mxu1 %v6215_v40  ;;  %v6919_v40 = vld [vmem:[#allocation11_spill] sm:$0xff] }
  0xee   : > { %4640 = vmatmul.mubr.f32.gmra.mrb[14].mxu0 %v6487_v60  ;;  %4298 = vmatprep.mubr.f32.mxu1 %v6107_v49  ;;  %v6506_v49 = vld [vmem:[#allocation2 + $0x121] sm:$0xff] }
  0xef   : > { %4642 = vmatprep.mubr.f32.mxu0 %v6489_v48  ;;  %5033 = vmatpush3.bf16.msra.mxu0 %v5030_v26  ;;  %v2915_v26 = vld [vmem:[#allocation2 + $0x182] sm:$0xff] }
  0xf1   : > { %4299 = vmatmul.mubr.f32.vlgmr.msra.gmra.mrb[0].mxu1 %v6121_v30  ;;  %v6513_v30 = vld [vmem:[#allocation2 + $0x129] sm:$0xff] }
  0xf2   : > { %4643 = vmatmul.mubr.f32.gmra.mrb[16].mxu0 %v6495_v42  ;;  %5042 = vmatpush3.bf16.msra.mxu1 %v5455_v8  ;;  %v6516_v8 = vld [vmem:[#allocation2 + $0x139] sm:$0xff] }
  0xf3   : > { %4301 = vmatprep.mubr.f32.mxu1 %v6127_v7  ;;  %4645 = vmatprep.mubr.f32.mxu0 %v6497_v32  ;;  %v6523_v7 = vld [vmem:[#allocation2 + $0x141] sm:$0xff] }
  0xf4   : > { %5035 = vmatprep.subr.bf16.mxu1 %v5472_v13 }
  0xf5   : > { %4302 = vmatmul.mubr.f32.gmra.mrb[2].mxu1 %v6140_v25  ;;  %v6526_v25 = vld [vmem:[#allocation2 + $0x151] sm:$0xff] }
  0xf6   : > { %4646 = vmatmul.mubr.f32.gmra.mrb[18].mxu0 %v6504_v36  ;;  %4304 = vmatprep.mubr.f32.mxu1 %v6145_v41  ;;  %v6917_v41 = vld [vmem:[#allocation3_spill] sm:$0xff] }
  0xf7   : > { %4648 = vmatprep.mubr.f32.mxu0 %v6506_v49  ;;  %5043 = vmatpush3.bf16.msra.mxu1 %v5472_v13  ;;  %v6918_v13 = vld [vmem:[#allocation10_spill] sm:$0xff] }
  0xf8   : > { %5036 = vmatprep.subr.bf16.mxu1 %v5488_v18 }
  0xf9   : > { %4305 = vmatmul.mubr.f32.gmra.mrb[4].mxu1 %v6158_v59  ;;  %v6920_v59 = vld [vmem:[#allocation4_spill] sm:$0xff] }
  0xfa   : > { %4649 = vmatmul.mubr.f32.gmra.mrb[20].mxu0 %v6513_v30  ;;  %4307 = vmatprep.mubr.f32.mxu1 %v6163_v61  ;;  %v6921_v61 = vld [vmem:[#allocation12_spill] sm:$0xff] }
  0xfb   : > { %4651 = vmatprep.mubr.f32.mxu0 %v6516_v8  ;;  %5044 = vmatpush3.bf16.msra.mxu1 %v5488_v18  ;;  %v6922_v18 = vld [vmem:[#allocation13_spill] sm:$0xff] }
  0xfc   : > { %5037 = vmatprep.subr.bf16.mxu1 %v6917_v41 }
  0xfd   : > { %4308 = vmatmul.mubr.f32.gmra.mrb[6].mxu1 %v6918_v13 }
  0xfe   : > { %4652 = vmatmul.mubr.f32.gmra.mrb[22].mxu0 %v6523_v7  ;;  %4310 = vmatprep.mubr.f32.mxu1 %v6919_v40 }
  0xff   : > { %4654 = vmatprep.mubr.f32.mxu0 %v6526_v25  ;;  %5045 = vmatpush3.bf16.msra.mxu1 %v6917_v41 }
 0x100   : > { %5038 = vmatprep.subr.bf16.mxu1 %v6920_v59 }
 0x101   : > { %4311 = vmatmul.mubr.f32.gmra.mrb[8].mxu1 %v6921_v61 }
 0x102   : > { %4655 = vmatmul.mubr.f32.gmra.mrb[24].mxu0 %v5317_v17  ;;  %4313 = vmatprep.mubr.f32.mxu1 %v6922_v18 }
 0x103   : > { %4657 = vmatprep.mubr.f32.mxu0 %v5318_v34  ;;  %5046 = vmatpush3.bf16.msra.mxu1 %v6920_v59 }
 0x104   : > { %5039 = vmatprep.subr.bf16.mxu1 %v6923_v2 }
 0x105   : > { %4314 = vmatmul.mubr.f32.gmra.mrb[10].mxu1 %v6924_v10 }
 0x106   : > { %4658 = vmatmul.mubr.f32.gmra.mrb[26].mxu0 %v5319_v56  ;;  %4316 = vmatprep.mubr.f32.mxu1 %v6925_v6 }
 0x107   : > { %4660 = vmatprep.mubr.f32.mxu0 %v6927_v24  ;;  %5047 = vmatpush3.bf16.msra.mxu1 %v6923_v2  ;;  %v6583_v24 = vld [vmem:[%s6874_s4] ss:$0 sm:$0xff] }
 0x108   : > { %5040 = vmatprep.subr.bf16.mxu1 %v6928_v0 }
 0x109   : > { %4317 = vmatmul.mubr.f32.gmra.mrb[12].mxu1 %v6929_v51 }
 0x10a   : > { %4661 = vmatmul.mubr.f32.gmra.mrb[28].mxu0 %v6931_v9  ;;  %4319 = vmatprep.mubr.f32.mxu1 %v6932_v57 }
 0x10b   : > { %4663 = vmatprep.mubr.f32.mxu0 %v2611_v16  ;;  %5048 = vmatpush3.bf16.msra.mxu1 %v6928_v0 }
 0x10c   : > { %5041 = vmatprep.subr.bf16.mxu1 %v6933_v50 }
 0x10d   : > { %4320 = vmatmul.mubr.f32.gmra.mrb[14].mxu1 %v6934_v1 }
 0x10e   : > { %4664 = vmatmul.mubr.f32.gmra.mrb[30].mxu0 %v2612_v28  ;;  %4322 = vmatprep.mubr.f32.mxu1 %v6245_v21  ;;  %v2892_v21 = vld [vmem:[#allocation2 + $0x6a] sm:$0xff] }
 0x10f   : > { %4698 = vmatprep.mubr.f32.mxu0 %v2887_v27  ;;  %5049 = vmatpush3.bf16.msra.mxu1 %v6933_v50 }
 0x111   : > { %4323 = vmatmul.mubr.f32.gmra.mrb[16].mxu1 %v6257_v22  ;;  %v2894_v22 = vld [vmem:[#allocation2 + $0x82] sm:$0xff] }
 0x112   : > { %4699 = vmatmul.mubr.f32.vlgmr.msra.gmra.mrb[0].mxu0 %v2888_v52  ;;  %4325 = vmatprep.mubr.f32.mxu1 %v6261_v47  ;;  %v2896_v47 = vld [vmem:[#allocation2 + $0x9a] sm:$0xff] }
 0x113   : > { %4701 = vmatprep.mubr.f32.mxu0 %v2889_v11 }
 0x115   : > { %4326 = vmatmul.mubr.f32.gmra.mrb[18].mxu1 %v6272_v20  ;;  %v2897_v20 = vld [vmem:[#allocation2 + $0xaa] sm:$0xff] }
 0x116   : > { %4702 = vmatmul.mubr.f32.gmra.mrb[2].mxu0 %v2890_v5  ;;  %4328 = vmatprep.mubr.f32.mxu1 %v6275_v35  ;;  %v2899_v35 = vld [vmem:[#allocation2 + $0xc2] sm:$0xff] }
 0x117   : > { %4704 = vmatprep.mubr.f32.mxu0 %v2891_v53 }
 0x119   : > { %4329 = vmatmul.mubr.f32.gmra.mrb[20].mxu1 %v6286_v37  ;;  %v2898_v37 = vld [vmem:[#allocation2 + $0xb2] sm:$0xff] }
 0x11a   : > { %4705 = vmatmul.mubr.f32.gmra.mrb[4].mxu0 %v2892_v21  ;;  %4331 = vmatprep.mubr.f32.mxu1 %v6289_v31  ;;  %v2901_v31 = vld [vmem:[#allocation2 + $0xda] sm:$0xff] }
 0x11b   : > { %4707 = vmatprep.mubr.f32.mxu0 %v2893_v33 }
 0x11d   : > { %4332 = vmatmul.mubr.f32.gmra.mrb[22].mxu1 %v6300_v12  ;;  %v2900_v12 = vld [vmem:[#allocation2 + $0xca] sm:$0xff] }
 0x11e   : > { %4708 = vmatmul.mubr.f32.gmra.mrb[6].mxu0 %v2894_v22  ;;  %4334 = vmatprep.mubr.f32.mxu1 %v6303_v43  ;;  %v2903_v43 = vld [vmem:[#allocation2 + $0xf2] sm:$0xff] }
 0x11f   : > { %4710 = vmatprep.mubr.f32.mxu0 %v2895_v4 }
 0x121   : > { %4335 = vmatmul.mubr.f32.gmra.mrb[24].mxu1 %v6314_v55  ;;  %v2902_v55 = vld [vmem:[#allocation2 + $0xe2] sm:$0xff] }
 0x122   : > { %4711 = vmatmul.mubr.f32.gmra.mrb[8].mxu0 %v2896_v47  ;;  %4337 = vmatprep.mubr.f32.mxu1 %v6317_v58  ;;  %v2905_v58 = vld [vmem:[#allocation2 + $0x10a] sm:$0xff] }
 0x123   : > { %4713 = vmatprep.mubr.f32.mxu0 %v2897_v20 }
 0x125   : > { %4338 = vmatmul.mubr.f32.gmra.mrb[26].mxu1 %v6328_v46  ;;  %v2904_v46 = vld [vmem:[#allocation2 + $0xfa] sm:$0xff] }
 0x126   : > { %4714 = vmatmul.mubr.f32.gmra.mrb[10].mxu0 %v2898_v37  ;;  %4340 = vmatprep.mubr.f32.mxu1 %v6331_v19  ;;  %v2907_v19 = vld [vmem:[#allocation2 + $0x122] sm:$0xff] }
 0x127   : > { %4716 = vmatprep.mubr.f32.mxu0 %v2899_v35 }
 0x129   : > { %4341 = vmatmul.mubr.f32.gmra.mrb[28].mxu1 %v6342_v29  ;;  %v2906_v29 = vld [vmem:[#allocation2 + $0x112] sm:$0xff] }
 0x12a   : > { %4717 = vmatmul.mubr.f32.gmra.mrb[12].mxu0 %v2900_v12  ;;  %4343 = vmatprep.mubr.f32.mxu1 %v6407_v39  ;;  %v2908_v39 = vld [vmem:[#allocation2 + $0x12a] sm:$0xff] }
 0x12b   : > { %4719 = vmatprep.mubr.f32.mxu0 %v2901_v31 }
 0x12d   : > { %4344 = vmatmul.mubr.f32.gmra.mrb[30].mxu1 %v6419_v44  ;;  %v2909_v44 = vld [vmem:[#allocation2 + $0x13a] sm:$0xff] }
 0x12e   : > { %4720 = vmatmul.mubr.f32.gmra.mrb[14].mxu0 %v2902_v55  ;;  %4402 = vmatprep.mubr.f32.mxu1 %v6482_v63  ;;  %v1690_v63 = vld [vmem:[#allocation2 + $0x169] sm:$0xff] }
 0x12f   : > { %4722 = vmatprep.mubr.f32.mxu0 %v2903_v43 }
 0x131   : > { %4403 = vmatmul.mubr.f32.vlgmr.msra.gmra.mrb[16].mxu1 %v6487_v60  ;;  %v1691_v60 = vld [vmem:[#allocation2 + $0x171] sm:$0xff] }
 0x132   : > { %4723 = vmatmul.mubr.f32.gmra.mrb[16].mxu0 %v2904_v46  ;;  %4405 = vmatprep.mubr.f32.mxu1 %v6489_v48  ;;  %v2916_v48 = vld [vmem:[#allocation2 + $0x18a] sm:$0xff] }
 0x133   : > { %4725 = vmatprep.mubr.f32.mxu0 %v2905_v58 }
 0x135   : > { %4406 = vmatmul.mubr.f32.gmra.mrb[18].mxu1 %v6495_v42  ;;  %v1692_v42 = vld [vmem:[#allocation2 + $0x181] sm:$0xff] }
 0x136   : > { %4726 = vmatmul.mubr.f32.gmra.mrb[18].mxu0 %v2906_v29  ;;  %4408 = vmatprep.mubr.f32.mxu1 %v6497_v32  ;;  %v2917_v32 = vld [vmem:[#allocation2 + $0x19a] sm:$0xff] }
 0x137   : > { %4728 = vmatprep.mubr.f32.mxu0 %v2907_v19 }
 0x139   : > { %4409 = vmatmul.mubr.f32.gmra.mrb[20].mxu1 %v6504_v36  ;;  %v1693_v36 = vld [vmem:[#allocation2 + $0x189] sm:$0xff] }
 0x13a   : > { %4729 = vmatmul.mubr.f32.gmra.mrb[20].mxu0 %v2908_v39  ;;  %4411 = vmatprep.mubr.f32.mxu1 %v6506_v49  ;;  %v2918_v49 = vld [vmem:[#allocation2 + $0x1a2] sm:$0xff] }
 0x13b   : > { %4731 = vmatprep.mubr.f32.mxu0 %v2909_v44 }
 0x13d   : > { %4412 = vmatmul.mubr.f32.gmra.mrb[22].mxu1 %v6513_v30 }
 0x13e   : > { %4732 = vmatmul.mubr.f32.gmra.mrb[22].mxu0 %v2910_v38  ;;  %4414 = vmatprep.mubr.f32.mxu1 %v6516_v8 }
 0x13f   : > { %4734 = vmatprep.mubr.f32.mxu0 %v2911_v54 }
 0x141   : > { %4415 = vmatmul.mubr.f32.gmra.mrb[24].mxu1 %v6523_v7 }
 0x142   : > { %4735 = vmatmul.mubr.f32.gmra.mrb[24].mxu0 %v2912_v14  ;;  %4417 = vmatprep.mubr.f32.mxu1 %v6526_v25 }
 0x143   : > { %4737 = vmatprep.mubr.f32.mxu0 %v2913_v45 }
 0x145   : > { %4418 = vmatmul.mubr.f32.gmra.mrb[26].mxu1 %v1689_v62 }
 0x146   : > { %4738 = vmatmul.mubr.f32.gmra.mrb[26].mxu0 %v2914_v15  ;;  %4420 = vmatprep.mubr.f32.mxu1 %v1690_v63 }
 0x147   : > { %4740 = vmatprep.mubr.f32.mxu0 %v2915_v26 }
 0x149   : > { %4421 = vmatmul.mubr.f32.gmra.mrb[28].mxu1 %v1691_v60 }
 0x14a   : > { %4741 = vmatmul.mubr.f32.gmra.mrb[28].mxu0 %v2916_v48  ;;  %4423 = vmatprep.mubr.f32.mxu1 %v1692_v42 }
 0x14b   : > { %4743 = vmatprep.mubr.f32.mxu0 %v2917_v32 }
 0x14d   : > { %4424 = vmatmul.mubr.f32.gmra.mrb[30].mxu1 %v1693_v36 }
 0x14e   : > { %4744 = vmatmul.mubr.f32.gmra.mrb[30].mxu0 %v2918_v49 }
 0x1c4   : > { %v4300_v30 = vpop.f32.mrb[0].mxu1 }
 0x1c5   : > { %v1471_v8 = vpop.f32.mrb[1].mxu1 }
 0x1c8   : > { %v4303_v7 = vpop.f32.mrb[2].mxu1 }
 0x1c9   : > { %v1481_v25 = vpop.f32.mrb[3].mxu1 }
 0x1cc   : > { %v4306_v41 = vpop.f32.mrb[4].mxu1 }
 0x1cd   : > { %v1491_v13 = vpop.f32.mrb[5].mxu1 }
 0x1d0   : > { %v4309_v40 = vpop.f32.mrb[6].mxu1 }
 0x1d1   : > { %v1501_v59 = vpop.f32.mrb[7].mxu1 }
 0x1d4   : > { %v4312_v61 = vpop.f32.mrb[8].mxu1 }
 0x1d5   : > { %v1511_v17 = vpop.f32.mrb[9].mxu1 }
 0x1d8   : > { %v4315_v18 = vpop.f32.mrb[10].mxu1 }
 0x1d9   : > { %v1521_v34 = vpop.f32.mrb[11].mxu1 }
 0x1dc   : > { %v4318_v2 = vpop.f32.mrb[12].mxu1 }
 0x1dd   : > { %v1531_v10 = vpop.f32.mrb[13].mxu1 }
 0x1e0   : > { %v4321_v56 = vpop.f32.mrb[14].mxu1 }
 0x1e1   : > { %v1541_v6 = vpop.f32.mrb[15].mxu1 }
 0x1e5   : > { %v4700_v23 = vpop.f32.mrb[0].mxu0 }
 0x1e6   : > { %v5050_v16 = vadd.f32 %v4700_v23, %v4300_v30  ;;  %v3002_v0 = vpop.f32.mrb[1].mxu0 }
 0x1e7   : > { %v5051_v51 = vadd.f32 %v3002_v0, %v1471_v8 }
 0x1e8   : > { %v6593_v3 = vadd.f32 %v5050_v16, %v6583_v24 }
 0x1e9   : > { %v6596_v9 = vadd.f32 %v5051_v51, %v6583_v24  ;;  %v4703_v57 = vpop.f32.mrb[2].mxu0 }
 0x1ea   : > { %3233 = vst [vmem:[%s6590_s23 + $0x8] sm:$0xff] %v6593_v3  ;;  %v5052_v28 = vadd.f32 %v4703_v57, %v4303_v7  ;;  %v3012_v27 = vpop.f32.mrb[3].mxu0 }
 0x1eb   : > { %3232 = vst [vmem:[%s6590_s23] sm:$0xff] %v6596_v9  ;;  %v5053_v50 = vadd.f32 %v3012_v27, %v1481_v25 }
 0x1ec   : > { %v6603_v1 = vadd.f32 %v5052_v28, %v6583_v24 }
 0x1ed   : > { %v6606_v52 = vadd.f32 %v5053_v50, %v6583_v24  ;;  %v4706_v11 = vpop.f32.mrb[4].mxu0 }
 0x1ee   : > { %3235 = vst [vmem:[%s6590_s23 + $0x18] sm:$0xff] %v6603_v1  ;;  %v5054_v5 = vadd.f32 %v4706_v11, %v4306_v41  ;;  %v3022_v53 = vpop.f32.mrb[5].mxu0 }
 0x1ef   : > { %3234 = vst [vmem:[%s6590_s23 + $0x10] sm:$0xff] %v6606_v52  ;;  %v5055_v21 = vadd.f32 %v3022_v53, %v1491_v13 }
 0x1f0   : > { %v6613_v33 = vadd.f32 %v5054_v5, %v6583_v24 }
 0x1f1   : > { %v6616_v22 = vadd.f32 %v5055_v21, %v6583_v24  ;;  %v4709_v4 = vpop.f32.mrb[6].mxu0 }
 0x1f2   : > { %3237 = vst [vmem:[%s6590_s23 + $0x28] sm:$0xff] %v6613_v33  ;;  %v5056_v47 = vadd.f32 %v4709_v4, %v4309_v40  ;;  %v3032_v20 = vpop.f32.mrb[7].mxu0 }
 0x1f3   : > { %3236 = vst [vmem:[%s6590_s23 + $0x20] sm:$0xff] %v6616_v22  ;;  %v5057_v37 = vadd.f32 %v3032_v20, %v1501_v59 }
 0x1f4   : > { %v6623_v35 = vadd.f32 %v5056_v47, %v6583_v24 }
 0x1f5   : > { %v6626_v12 = vadd.f32 %v5057_v37, %v6583_v24  ;;  %v4712_v31 = vpop.f32.mrb[8].mxu0 }
 0x1f6   : > { %3239 = vst [vmem:[%s6590_s23 + $0x38] sm:$0xff] %v6623_v35  ;;  %v5058_v55 = vadd.f32 %v4712_v31, %v4312_v61  ;;  %v3042_v43 = vpop.f32.mrb[9].mxu0 }
 0x1f7   : > { %3238 = vst [vmem:[%s6590_s23 + $0x30] sm:$0xff] %v6626_v12  ;;  %v5059_v46 = vadd.f32 %v3042_v43, %v1511_v17 }
 0x1f8   : > { %v6633_v58 = vadd.f32 %v5058_v55, %v6583_v24 }
 0x1f9   : > { %v6636_v29 = vadd.f32 %v5059_v46, %v6583_v24  ;;  %v4715_v19 = vpop.f32.mrb[10].mxu0 }
 0x1fa   : > { %3241 = vst [vmem:[%s6590_s23 + $0x48] sm:$0xff] %v6633_v58  ;;  %v5060_v39 = vadd.f32 %v4715_v19, %v4315_v18  ;;  %v3052_v44 = vpop.f32.mrb[11].mxu0 }
 0x1fb   : > { %3240 = vst [vmem:[%s6590_s23 + $0x40] sm:$0xff] %v6636_v29  ;;  %v5061_v38 = vadd.f32 %v3052_v44, %v1521_v34 }
 0x1fc   : > { %v6643_v54 = vadd.f32 %v5060_v39, %v6583_v24 }
 0x1fd   : > { %v6646_v14 = vadd.f32 %v5061_v38, %v6583_v24  ;;  %v4718_v45 = vpop.f32.mrb[12].mxu0 }
 0x1fe   : > { %3243 = vst [vmem:[%s6590_s23 + $0x58] sm:$0xff] %v6643_v54  ;;  %v5062_v62 = vadd.f32 %v4718_v45, %v4318_v2  ;;  %v3062_v15 = vpop.f32.mrb[13].mxu0 }
 0x1ff   : > { %3242 = vst [vmem:[%s6590_s23 + $0x50] sm:$0xff] %v6646_v14  ;;  %v5063_v63 = vadd.f32 %v3062_v15, %v1531_v10 }
 0x200   : > { %v6653_v26 = vadd.f32 %v5062_v62, %v6583_v24 }
 0x201   : > { %v6656_v60 = vadd.f32 %v5063_v63, %v6583_v24  ;;  %v4721_v48 = vpop.f32.mrb[14].mxu0 }
 0x202   : > { %3245 = vst [vmem:[%s6590_s23 + $0x68] sm:$0xff] %v6653_v26  ;;  %v5064_v42 = vadd.f32 %v4721_v48, %v4321_v56  ;;  %v3072_v32 = vpop.f32.mrb[15].mxu0 }
 0x203   : > { %3244 = vst [vmem:[%s6590_s23 + $0x60] sm:$0xff] %v6656_v60  ;;  %v5065_v36 = vadd.f32 %v3072_v32, %v1541_v6 }
 0x204   : > { %v6663_v49 = vadd.f32 %v5064_v42, %v6583_v24  ;;  %v4404_v30 = vpop.f32.mrb[16].mxu1 }
 0x205   : > { %v6666_v8 = vadd.f32 %v5065_v36, %v6583_v24  ;;  %v4724_v7 = vpop.f32.mrb[16].mxu0  ;;  %v1857_v25 = vpop.f32.mrb[17].mxu1 }
 0x206   : > { %3247 = vst [vmem:[%s6590_s23 + $0x78] sm:$0xff] %v6663_v49  ;;  %v5066_v41 = vadd.f32 %v4724_v7, %v4404_v30  ;;  %v3082_v13 = vpop.f32.mrb[17].mxu0 }
 0x207   : > { %3246 = vst [vmem:[%s6590_s23 + $0x70] sm:$0xff] %v6666_v8  ;;  %v5067_v40 = vadd.f32 %v3082_v13, %v1857_v25 }
 0x208   : > { %v6673_v59 = vadd.f32 %v5066_v41, %v6583_v24  ;;  %v4407_v61 = vpop.f32.mrb[18].mxu1 }
 0x209   : > { %v6676_v17 = vadd.f32 %v5067_v40, %v6583_v24  ;;  %v4727_v18 = vpop.f32.mrb[18].mxu0  ;;  %v1867_v34 = vpop.f32.mrb[19].mxu1 }
 0x20a   : > { %3249 = vst [vmem:[%s6590_s23 + $0x88] sm:$0xff] %v6673_v59  ;;  %v5068_v2 = vadd.f32 %v4727_v18, %v4407_v61  ;;  %v3092_v10 = vpop.f32.mrb[19].mxu0 }
 0x20b   : > { %3248 = vst [vmem:[%s6590_s23 + $0x80] sm:$0xff] %v6676_v17  ;;  %v5069_v56 = vadd.f32 %v3092_v10, %v1867_v34 }
 0x20c   : > { %v6683_v6 = vadd.f32 %v5068_v2, %v6583_v24  ;;  %v4410_v23 = vpop.f32.mrb[20].mxu1 }
 0x20d   : > { %v6686_v16 = vadd.f32 %v5069_v56, %v6583_v24  ;;  %v4730_v0 = vpop.f32.mrb[20].mxu0  ;;  %v1877_v51 = vpop.f32.mrb[21].mxu1 }
 0x20e   : > { %3251 = vst [vmem:[%s6590_s23 + $0x98] sm:$0xff] %v6683_v6  ;;  %v5070_v57 = vadd.f32 %v4730_v0, %v4410_v23  ;;  %v3102_v28 = vpop.f32.mrb[21].mxu0 }
 0x20f   : > { %3250 = vst [vmem:[%s6590_s23 + $0x90] sm:$0xff] %v6686_v16  ;;  %v5071_v27 = vadd.f32 %v3102_v28, %v1877_v51 }
 0x210   : > { %v6693_v50 = vadd.f32 %v5070_v57, %v6583_v24  ;;  %v4413_v11 = vpop.f32.mrb[22].mxu1 }
 0x211   : > { %v6696_v5 = vadd.f32 %v5071_v27, %v6583_v24  ;;  %v4733_v53 = vpop.f32.mrb[22].mxu0  ;;  %v1887_v21 = vpop.f32.mrb[23].mxu1  ;;  %v5329_v27 = vmov (!%p3589_p4), 0.0  }
 0x212   : > { %3253 = vst [vmem:[%s6590_s23 + $0xa8] sm:$0xff] %v6693_v50  ;;  %v5072_v4 = vadd.f32 %v4733_v53, %v4413_v11  ;;  %v3112_v47 = vpop.f32.mrb[23].mxu0  ;;  %3268 = vst [vmem:[%s6876_s6] sm:$0x1] (!%p3589_p4), %v5329_v27 }
 0x213   : > { %3252 = vst [vmem:[%s6590_s23 + $0xa0] sm:$0xff] %v6696_v5  ;;  %v5073_v20 = vadd.f32 %v3112_v47, %v1887_v21  ;;  %3269 = vst [vmem:[%s6877_s7] sm:$0x1] (!%p3589_p4), %v5329_v27 }
 0x214   : > { %v6703_v37 = vadd.f32 %v5072_v4, %v6583_v24  ;;  %v4416_v31 = vpop.f32.mrb[24].mxu1 }
 0x215   : > { %v6706_v55 = vadd.f32 %v5073_v20, %v6583_v24  ;;  %v4736_v43 = vpop.f32.mrb[24].mxu0  ;;  %v1897_v46 = vpop.f32.mrb[25].mxu1 }
 0x216   : > { %3255 = vst [vmem:[%s6590_s23 + $0xb8] sm:$0xff] %v6703_v37  ;;  %v5074_v19 = vadd.f32 %v4736_v43, %v4416_v31  ;;  %v3122_v39 = vpop.f32.mrb[25].mxu0 }
 0x217   : > { %3254 = vst [vmem:[%s6590_s23 + $0xb0] sm:$0xff] %v6706_v55  ;;  %v5075_v44 = vadd.f32 %v3122_v39, %v1897_v46 }
 0x218   : > { %v6713_v38 = vadd.f32 %v5074_v19, %v6583_v24  ;;  %v4419_v45 = vpop.f32.mrb[26].mxu1 }
 0x219   : > { %v6716_v62 = vadd.f32 %v5075_v44, %v6583_v24  ;;  %v4739_v15 = vpop.f32.mrb[26].mxu0  ;;  %v1907_v63 = vpop.f32.mrb[27].mxu1 }
 0x21a   : > { %3257 = vst [vmem:[%s6590_s23 + $0xc8] sm:$0xff] %v6713_v38  ;;  %v5076_v48 = vadd.f32 %v4739_v15, %v4419_v45  ;;  %v3132_v42 = vpop.f32.mrb[27].mxu0 }
 0x21b   : > { %3256 = vst [vmem:[%s6590_s23 + $0xc0] sm:$0xff] %v6716_v62  ;;  %v5077_v32 = vadd.f32 %v3132_v42, %v1907_v63 }
 0x21c   : > { %v6723_v36 = vadd.f32 %v5076_v48, %v6583_v24  ;;  %v4422_v30 = vpop.f32.mrb[28].mxu1 }
 0x21d   : > { %v6726_v7 = vadd.f32 %v5077_v32, %v6583_v24  ;;  %v4742_v25 = vpop.f32.mrb[28].mxu0  ;;  %v1917_v41 = vpop.f32.mrb[29].mxu1 }
 0x21e   : > { %3259 = vst [vmem:[%s6590_s23 + $0xd8] sm:$0xff] %v6723_v36  ;;  %v5078_v13 = vadd.f32 %v4742_v25, %v4422_v30  ;;  %v3142_v40 = vpop.f32.mrb[29].mxu0 }
 0x21f   : > { %3258 = vst [vmem:[%s6590_s23 + $0xd0] sm:$0xff] %v6726_v7  ;;  %v5079_v61 = vadd.f32 %v3142_v40, %v1917_v41 }
 0x220   : > { %v6733_v18 = vadd.f32 %v5078_v13, %v6583_v24  ;;  %v4425_v34 = vpop.f32.mrb[30].mxu1 }
 0x221   : > { %v6736_v2 = vadd.f32 %v5079_v61, %v6583_v24  ;;  %v4745_v10 = vpop.f32.mrb[30].mxu0  ;;  %v1927_v56 = vpop.f32.mrb[31].mxu1  ;;  %3267 = sbr.rel (%p3589_p4) target bundleno = 552 (0x228), region = 44 }
 0x222   : > { %3261 = vst [vmem:[%s6590_s23 + $0xe8] sm:$0xff] %v6733_v18  ;;  %v5080_v23 = vadd.f32 %v4745_v10, %v4425_v34  ;;  %v3152_v0 = vpop.f32.mrb[31].mxu0 }
 0x223   : > { %3260 = vst [vmem:[%s6590_s23 + $0xe0] sm:$0xff] %v6736_v2  ;;  %v5081_v51 = vadd.f32 %v3152_v0, %v1927_v56 }
 0x224   : > { %v6743_v57 = vadd.f32 %v5080_v23, %v6583_v24 }
 0x225   : > { %v6746_v28 = vadd.f32 %v5081_v51, %v6583_v24 }
 0x226   : > { %3263 = vst [vmem:[%s6590_s23 + $0xf8] sm:$0xff] %v6743_v57 }
 0x227   : > { %3262 = vst [vmem:[%s6590_s23 + $0xf0] sm:$0xff] %v6746_v28 }
 0x228 PF: > { %v3271_v24 = vadd.f32 %v6593_v3, %v6596_v9  ;;  %v3311_v21 = vmul.f32 %v6596_v9, %v6596_v9  ;;  %v3312_v4 = vmul.f32 %v6593_v3, %v6593_v3  ;;  %v3313_v20 = vmul.f32 %v6606_v52, %v6606_v52 }
 0x229   : > { %v3314_v43 = vmul.f32 %v6603_v1, %v6603_v1  ;;  %v3315_v39 = vmul.f32 %v6616_v22, %v6616_v22  ;;  %v3316_v3 = vmul.f32 %v6613_v33, %v6613_v33  ;;  %v3317_v15 = vmul.f32 %v6626_v12, %v6626_v12 }
 0x22a   : > { %v3272_v11 = vadd.f32 %v3271_v24, %v6606_v52  ;;  %v3343_v46 = vadd.f32 %v3312_v4, %v3311_v21  ;;  %v3318_v48 = vmul.f32 %v6623_v35, %v6623_v35  ;;  %v3319_v32 = vmul.f32 %v6636_v29, %v6636_v29 }
 0x22b   : > { %v3320_v25 = vmul.f32 %v6633_v58, %v6633_v58  ;;  %v3321_v13 = vmul.f32 %v6646_v14, %v6646_v14  ;;  %v3322_v61 = vmul.f32 %v6643_v54, %v6643_v54  ;;  %v3323_v10 = vmul.f32 %v6656_v60, %v6656_v60 }
 0x22c   : > { %v3273_v53 = vadd.f32 %v3272_v11, %v6603_v1  ;;  %v3344_v9 = vadd.f32 %v3343_v46, %v3313_v20  ;;  %v3324_v23 = vmul.f32 %v6653_v26, %v6653_v26  ;;  %v3325_v51 = vmul.f32 %v6666_v8, %v6666_v8 }
 0x22d   : > { %v3326_v24 = vmul.f32 %v6663_v49, %v6663_v49  ;;  %v3328_v4 = vmul.f32 %v6673_v59, %v6673_v59  ;;  %v3329_v20 = vmul.f32 %v6686_v16, %v6686_v16 }
 0x22e   : > { %v3274_v47 = vadd.f32 %v3273_v53, %v6616_v22  ;;  %v3345_v45 = vadd.f32 %v3344_v9, %v3314_v43  ;;  %v3327_v53 = vmul.f32 %v6676_v17, %v6676_v17  ;;  %v3330_v43 = vmul.f32 %v6683_v6, %v6683_v6 }
 0x22f   : > { %v3332_v9 = vmul.f32 %v6693_v50, %v6693_v50 }
 0x230   : > { %v3275_v31 = vadd.f32 %v3274_v47, %v6613_v33  ;;  %v3346_v63 = vadd.f32 %v3345_v45, %v3315_v39 }
 0x232   : > { %v3276_v19 = vadd.f32 %v3275_v31, %v6626_v12  ;;  %v3347_v42 = vadd.f32 %v3346_v63, %v3316_v3  ;;  %v3333_v3 = vmul.f32 %v6706_v55, %v6706_v55  ;;  %v3335_v63 = vmul.f32 %v6716_v62, %v6716_v62 }
 0x234   : > { %v3277_v44 = vadd.f32 %v3276_v19, %v6623_v35  ;;  %v3348_v30 = vadd.f32 %v3347_v42, %v3317_v15  ;;  %v3331_v19 = vmul.f32 %v6696_v5, %v6696_v5 }
 0x236   : > { %v3278_v52 = vadd.f32 %v3277_v44, %v6636_v29  ;;  %v3349_v41 = vadd.f32 %v3348_v30, %v3318_v48  ;;  %v3336_v48 = vmul.f32 %v6713_v38, %v6713_v38  ;;  %v3338_v30 = vmul.f32 %v6723_v36, %v6723_v36 }
 0x238   : > { %v3279_v1 = vadd.f32 %v3278_v52, %v6633_v58  ;;  %v3350_v40 = vadd.f32 %v3349_v41, %v3319_v32  ;;  %v3334_v52 = vmul.f32 %v6703_v37, %v6703_v37 }
 0x23a   : > { %v3280_v22 = vadd.f32 %v3279_v1, %v6646_v14  ;;  %v3351_v34 = vadd.f32 %v3350_v40, %v3320_v25  ;;  %v3339_v25 = vmul.f32 %v6736_v2, %v6736_v2  ;;  %v3341_v40 = vmul.f32 %v6746_v28, %v6746_v28 }
 0x23c   : > { %v3281_v33 = vadd.f32 %v3280_v22, %v6643_v54  ;;  %v3352_v56 = vadd.f32 %v3351_v34, %v3321_v13  ;;  %v3337_v22 = vmul.f32 %v6726_v7, %v6726_v7 }
 0x23e   : > { %v3282_v12 = vadd.f32 %v3281_v33, %v6656_v60  ;;  %v3353_v0 = vadd.f32 %v3352_v56, %v3322_v61 }
 0x240   : > { %v3283_v35 = vadd.f32 %v3282_v12, %v6653_v26  ;;  %v3354_v27 = vadd.f32 %v3353_v0, %v3323_v10  ;;  %v3340_v12 = vmul.f32 %v6733_v18, %v6733_v18 }
 0x242   : > { %v3284_v29 = vadd.f32 %v3283_v35, %v6666_v8  ;;  %v3355_v11 = vadd.f32 %v3354_v27, %v3324_v23 }
 0x244   : > { %v3285_v58 = vadd.f32 %v3284_v29, %v6663_v49  ;;  %v3356_v21 = vadd.f32 %v3355_v11, %v3325_v51 }
 0x246   : > { %v3286_v14 = vadd.f32 %v3285_v58, %v6676_v17  ;;  %v3357_v47 = vadd.f32 %v3356_v21, %v3326_v24 }
 0x248   : > { %v3287_v54 = vadd.f32 %v3286_v14, %v6673_v59  ;;  %v3358_v31 = vadd.f32 %v3357_v47, %v3327_v53 }
 0x24a   : > { %v3288_v60 = vadd.f32 %v3287_v54, %v6686_v16  ;;  %v3359_v46 = vadd.f32 %v3358_v31, %v3328_v4  ;;  %v3310_v54 = vld [vmem:[%s6877_s7] sm:$0x1] }
 0x24c   : > { %v3289_v26 = vadd.f32 %v3288_v60, %v6683_v6  ;;  %v3360_v39 = vadd.f32 %v3359_v46, %v3329_v20 }
 0x24e   : > { %v3290_v8 = vadd.f32 %v3289_v26, %v6696_v5  ;;  %v3361_v44 = vadd.f32 %v3360_v39, %v3330_v43 }
 0x250   : > { %v3291_v49 = vadd.f32 %v3290_v8, %v6693_v50  ;;  %v3362_v45 = vadd.f32 %v3361_v44, %v3331_v19 }
 0x252   : > { %v3292_v17 = vadd.f32 %v3291_v49, %v6706_v55  ;;  %v3363_v15 = vadd.f32 %v3362_v45, %v3332_v9 }
 0x254   : > { %v3293_v59 = vadd.f32 %v3292_v17, %v6703_v37  ;;  %v3364_v1 = vadd.f32 %v3363_v15, %v3333_v3 }
 0x256   : > { %v3294_v16 = vadd.f32 %v3293_v59, %v6716_v62  ;;  %v3365_v42 = vadd.f32 %v3364_v1, %v3334_v52 }
 0x258   : > { %v3295_v6 = vadd.f32 %v3294_v16, %v6713_v38  ;;  %v3366_v32 = vadd.f32 %v3365_v42, %v3335_v63 }
 0x25a   : > { %v3296_v5 = vadd.f32 %v3295_v6, %v6726_v7  ;;  %v3367_v33 = vadd.f32 %v3366_v32, %v3336_v48 }
 0x25c   : > { %v3297_v50 = vadd.f32 %v3296_v5, %v6723_v36  ;;  %v3368_v41 = vadd.f32 %v3367_v33, %v3337_v22  ;;  %v3342_v36 = vmul.f32 %v6743_v57, %v6743_v57 }
 0x25e   : > { %v3298_v55 = vadd.f32 %v3297_v50, %v6736_v2  ;;  %v3369_v13 = vadd.f32 %v3368_v41, %v3338_v30 }
 0x260   : > { %v3299_v37 = vadd.f32 %v3298_v55, %v6733_v18  ;;  %v3370_v35 = vadd.f32 %v3369_v13, %v3339_v25  ;;  %v3270_v18 = vld [vmem:[%s6876_s6] sm:$0x1] }
 0x262   : > { %v3300_v62 = vadd.f32 %v3299_v37, %v6746_v28  ;;  %v3371_v34 = vadd.f32 %v3370_v35, %v3340_v12 }
 0x264   : > { %v3301_v38 = vadd.f32 %v3300_v62, %v6743_v57  ;;  %v3372_v10 = vadd.f32 %v3371_v34, %v3341_v40 }
 0x266   : > { %v3302_v7 = vrot.slane %v3301_v38, 4  ;;  %v3373_v56 = vadd.f32 %v3372_v10, %v3342_v36 }
 0x268   : > { %v3303_v61 = vadd.f32 %v3302_v7, %v3301_v38  ;;  %v3374_v23 = vrot.slane %v3373_v56, 4 }
 0x26a   : > { %v3304_v29 = vrot.slane %v3303_v61, 2  ;;  %v3375_v14 = vadd.f32 %v3374_v23, %v3373_v56 }
 0x26c   : > { %v3305_v2 = vadd.f32 %v3304_v29, %v3303_v61  ;;  %v3376_v28 = vrot.slane %v3375_v14, 2 }
 0x26e   : > { %v3306_v58 = vrot.slane %v3305_v2, 1  ;;  %v3377_v57 = vadd.f32 %v3376_v28, %v3375_v14 }
 0x270   : > { %v3307_v0 = vadd.f32 %v3306_v58, %v3305_v2  ;;  %v3378_v27 = vrot.slane %v3377_v57, 1 }
 0x272   : > { %v3308_v51 = vadd.f32 %v3307_v0, %v3270_v18  ;;  %v3379_v24 = vadd.f32 %v3378_v27, %v3377_v57 }
 0x274   : > { %3309 = vst [vmem:[%s6876_s6] sm:$0x1] %v3308_v51  ;;  %v3380_v11 = vadd.f32 %v3379_v24, %v3310_v54 }
 0x276   : > { %3381 = vst [vmem:[%s6877_s7] sm:$0x1] %v3380_v11 }
 0x277 PF: > { %s18_s24 = sadd.s32 1, %s5326_s24  }
 0x278   : > { %p15_p5 = scmp.ge.s32.totalorder %s18_s24, 4  }
 0x27a   :  { %17 = sbr.rel (!%p15_p5) target bundleno = 1 (0x1), region = 100 }

</bundles_post_ra>
